<compile_context>
chip_gen: v5e
topology: v5e:2x2
jax: 0.10.0
libtpu: 0.0.40
codegen_flags: <defaults>
</compile_context>

<pallas_src>
import math

import jax
import jax.numpy as jnp
from jax.experimental import pallas as pl
from jax.experimental.pallas import tpu as pltpu

# ---------------- config ----------------
IMG = 32
PATCH = 16
CHANNELS = 3
HIDDEN = 128
HEADS = 4
HEAD_DIM = HIDDEN // HEADS
MLP = 4 * HIDDEN
LAYERS = 2
NUM_LABELS = 7
PAD_LABELS = 128            # classifier output padded to lane-dense 128
LN_EPS = 1e-12
NUM_PATCHES = (IMG // PATCH) ** 2
SEQ = NUM_PATCHES + 1
PATCH_DIM = CHANNELS * PATCH * PATCH


# ---------------- in-kernel helpers ----------------
def _layernorm(x, g, b):
    mean = jnp.mean(x, axis=-1, keepdims=True)
    var = jnp.mean(jnp.square(x - mean), axis=-1, keepdims=True)
    return (x - mean) * jax.lax.rsqrt(var + LN_EPS) * g + b


def _gelu(y):
    # Exact erf-GELU, matching HF ViT's "gelu" activation (erf runs on the EUP).
    return 0.5 * y * (1.0 + jax.lax.erf(y * (1.0 / math.sqrt(2.0))))


# ---------------- fused ViT kernel ----------------
def _vit_kernel(
    patches_ref, w_patch_ref, b_patch_ref, cls_ref, pos_ref,
    lnf_g_ref, lnf_b_ref, w_cls_ref, b_cls_ref,
    ln1_g_ref, ln1_b_ref, w_qkv_ref, b_qkv_ref, wo_ref, bo_ref,
    ln2_g_ref, ln2_b_ref, w1_ref, b1_ref, w2_ref, b2_ref,
    logits_ref, h_ref, ctx_ref,
):
    """One grid step == one encoder layer; hidden state lives in VMEM scratch."""
    layer = pl.program_id(0)
    n_batch = h_ref.shape[0] // SEQ

    # ---- layer 0: patch-embedding matmul + CLS token + position embeddings ----
    @pl.when(layer == 0)
    def _embed():
        emb = (jnp.dot(patches_ref[...], w_patch_ref[...],
                       preferred_element_type=jnp.float32) + b_patch_ref[...])
        cls_v = cls_ref[...]                      # (1, HIDDEN)
        pos_v = pos_ref[...]                      # (SEQ, HIDDEN)
        for b in range(n_batch):                  # static unroll (tiny B)
            h_ref[b * SEQ:b * SEQ + 1, :] = cls_v + pos_v[0:1, :]
            h_ref[b * SEQ + 1:(b + 1) * SEQ, :] = (
                emb[b * NUM_PATCHES:(b + 1) * NUM_PATCHES, :] + pos_v[1:, :])

    h = h_ref[...]

    # ---- self-attention block (pre-LN), fused QKV (wide N = 3*HIDDEN matmul) ----
    xn = _layernorm(h, ln1_g_ref[...], ln1_b_ref[...])
    qkv = (jnp.dot(xn, w_qkv_ref[...], preferred_element_type=jnp.float32)
           + b_qkv_ref[...])
    q = qkv[:, 0 * HIDDEN:1 * HIDDEN]
    k = qkv[:, 1 * HIDDEN:2 * HIDDEN]
    v = qkv[:, 2 * HIDDEN:3 * HIDDEN]

    # All B*HEADS heads in-kernel; heads are contiguous lane slices, so there
    # are no HBM round trips and no host-side split/merge-head transposes.
    scale = 1.0 / math.sqrt(HEAD_DIM)
    for b in range(n_batch):                      # static unroll
        r0, r1 = b * SEQ, (b + 1) * SEQ
        for hh in range(HEADS):                   # static unroll
            c0, c1 = hh * HEAD_DIM, (hh + 1) * HEAD_DIM
            qh = q[r0:r1, c0:c1]
            kh = k[r0:r1, c0:c1]
            vh = v[r0:r1, c0:c1]
            s = jnp.dot(qh, kh.T, preferred_element_type=jnp.float32) * scale
            s = s - jnp.max(s, axis=-1, keepdims=True)
            p = jnp.exp(s)
            # softmax denominator via EUP reciprocal (keeps the VALU slot free)
            p = p * pl.reciprocal(jnp.sum(p, axis=-1, keepdims=True), approx=True)
            ctx_ref[r0:r1, c0:c1] = jnp.dot(p, vh,
                                            preferred_element_type=jnp.float32)

    h = h + (jnp.dot(ctx_ref[...], wo_ref[...],
                     preferred_element_type=jnp.float32) + bo_ref[...])

    # ---- MLP block (pre-LN); (M, MLP) intermediate never leaves VMEM ----
    xn2 = _layernorm(h, ln2_g_ref[...], ln2_b_ref[...])
    mid = _gelu(jnp.dot(xn2, w1_ref[...], preferred_element_type=jnp.float32)
                + b1_ref[...])
    h = h + (jnp.dot(mid, w2_ref[...], preferred_element_type=jnp.float32)
             + b2_ref[...])

    h_ref[...] = h

    # ---- last layer: final LayerNorm -> CLS token -> classifier (lane-padded) ----
    @pl.when(layer == LAYERS - 1)
    def _head():
        hn = _layernorm(h, lnf_g_ref[...], lnf_b_ref[...])
        for b in range(n_batch):                  # static unroll
            cls_tok = hn[b * SEQ:b * SEQ + 1, :]  # last_hidden_state[:, 0]
            logits_ref[b:b + 1, :] = (
                jnp.dot(cls_tok, w_cls_ref[...],
                        preferred_element_type=jnp.float32) + b_cls_ref[...])


# ---------------- parameters ----------------
def init_params(key):
    def nrm(k, shape, scale=0.02):
        return scale * jax.random.normal(k, shape, dtype=jnp.float32)

    keys = iter(jax.random.split(key, 16))
    return {
        "patch_w": nrm(next(keys), (HIDDEN, CHANNELS, PATCH, PATCH)),
        "patch_b": jnp.zeros((1, HIDDEN), jnp.float32),
        "cls": nrm(next(keys), (1, HIDDEN)),
        "pos": nrm(next(keys), (SEQ, HIDDEN)),
        "ln_f_g": jnp.ones((1, HIDDEN), jnp.float32),
        "ln_f_b": jnp.zeros((1, HIDDEN), jnp.float32),
        "cls_w": nrm(next(keys), (HIDDEN, NUM_LABELS)),
        "cls_b": jnp.zeros((NUM_LABELS,), jnp.float32),
        # per-layer weights stacked on a leading LAYERS axis (grid axis)
        "ln1_g": jnp.ones((LAYERS, 1, HIDDEN), jnp.float32),
        "ln1_b": jnp.zeros((LAYERS, 1, HIDDEN), jnp.float32),
        "w_qkv": nrm(next(keys), (LAYERS, HIDDEN, 3 * HIDDEN)),
        "b_qkv": jnp.zeros((LAYERS, 1, 3 * HIDDEN), jnp.float32),
        "wo": nrm(next(keys), (LAYERS, HIDDEN, HIDDEN)),
        "bo": jnp.zeros((LAYERS, 1, HIDDEN), jnp.float32),
        "ln2_g": jnp.ones((LAYERS, 1, HIDDEN), jnp.float32),
        "ln2_b": jnp.zeros((LAYERS, 1, HIDDEN), jnp.float32),
        "w1": nrm(next(keys), (LAYERS, HIDDEN, MLP)),
        "b1": jnp.zeros((LAYERS, 1, MLP), jnp.float32),
        "w2": nrm(next(keys), (LAYERS, MLP, HIDDEN)),
        "b2": jnp.zeros((LAYERS, 1, HIDDEN), jnp.float32),
    }


# ---------------- forward pass (wrapper glue + single pallas_call) ----------------
def vit_forward(params, pixel_values):
    B = pixel_values.shape[0]

    # Conv2d(C, HIDDEN, k=s=PATCH) == extract non-overlapping patches (flattened
    # in (c, kh, kw) order matching the PyTorch weight layout) + matmul in-kernel.
    x = pixel_values.reshape(B, CHANNELS, IMG // PATCH, PATCH, IMG // PATCH, PATCH)
    x = x.transpose(0, 2, 4, 1, 3, 5).reshape(B * NUM_PATCHES, PATCH_DIM)
    w_patch = params["patch_w"].reshape(HIDDEN, PATCH_DIM).T

    # Lane-pad the 7-wide classifier to 128 so the output store is unmasked.
    w_cls = jnp.zeros((HIDDEN, PAD_LABELS), jnp.float32)
    w_cls = w_cls.at[:, :NUM_LABELS].set(params["cls_w"])
    b_cls = jnp.zeros((1, PAD_LABELS), jnp.float32)
    b_cls = b_cls.at[0, :NUM_LABELS].set(params["cls_b"])

    def const_spec(shape):
        n = len(shape)
        return pl.BlockSpec(shape, lambda l, n=n: (0,) * n)

    def layer_spec(tail):
        n = len(tail)
        return pl.BlockSpec((None,) + tuple(tail), lambda l, n=n: (l,) + (0,) * n)

    in_specs = [
        const_spec((B * NUM_PATCHES, PATCH_DIM)),   # patches
        const_spec((PATCH_DIM, HIDDEN)),            # patch proj weight
        const_spec((1, HIDDEN)),                    # patch proj bias
        const_spec((1, HIDDEN)),                    # CLS token
        const_spec((SEQ, HIDDEN)),                  # position embeddings
        const_spec((1, HIDDEN)),                    # final LN gamma
        const_spec((1, HIDDEN)),                    # final LN beta
        const_spec((HIDDEN, PAD_LABELS)),           # classifier W (padded)
        const_spec((1, PAD_LABELS)),                # classifier b (padded)
        layer_spec((1, HIDDEN)),                    # ln1 gamma
        layer_spec((1, HIDDEN)),                    # ln1 beta
        layer_spec((HIDDEN, 3 * HIDDEN)),           # fused QKV weight
        layer_spec((1, 3 * HIDDEN)),                # fused QKV bias
        layer_spec((HIDDEN, HIDDEN)),               # attn out-proj weight
        layer_spec((1, HIDDEN)),                    # attn out-proj bias
        layer_spec((1, HIDDEN)),                    # ln2 gamma
        layer_spec((1, HIDDEN)),                    # ln2 beta
        layer_spec((HIDDEN, MLP)),                  # MLP up-proj weight
        layer_spec((1, MLP)),                       # MLP up-proj bias
        layer_spec((MLP, HIDDEN)),                  # MLP down-proj weight
        layer_spec((1, HIDDEN)),                    # MLP down-proj bias
    ]

    grid_spec = pltpu.PrefetchScalarGridSpec(
        num_scalar_prefetch=0,
        grid=(LAYERS,),                             # one step per encoder layer
        in_specs=in_specs,
        out_specs=pl.BlockSpec((B, PAD_LABELS), lambda l: (0, 0)),
        scratch_shapes=[
            pltpu.VMEM((B * SEQ, HIDDEN), jnp.float32),   # hidden-state carry
            pltpu.VMEM((B * SEQ, HIDDEN), jnp.float32),   # attention context
        ],
    )

    # TODO(synk): for real ViT shapes (seq 197 / hidden 768) set
    # vmem_limit_bytes explicitly and add a leading "parallel" batch grid axis
    # to use v7x's second TensorCore; here the workload is tiny so one call on
    # one core is optimal.
    logits_pad = pl.pallas_call(
        _vit_kernel,
        grid_spec=grid_spec,
        out_shape=jax.ShapeDtypeStruct((B, PAD_LABELS), jnp.float32),
        compiler_params=pltpu.CompilerParams(dimension_semantics=("arbitrary",)),
    )(x, w_patch, params["patch_b"], params["cls"], params["pos"],
      params["ln_f_g"], params["ln_f_b"], w_cls, b_cls,
      params["ln1_g"], params["ln1_b"], params["w_qkv"], params["b_qkv"],
      params["wo"], params["bo"], params["ln2_g"], params["ln2_b"],
      params["w1"], params["b1"], params["w2"], params["b2"])

    # nn.Dropout(0.1) is identity at inference.
    return logits_pad[:, :NUM_LABELS]


if __name__ == "__main__":
    key = jax.random.PRNGKey(0)
    pkey, xkey = jax.random.split(key)
    params = init_params(pkey)
    pixel_values = jax.random.normal(xkey, (2, CHANNELS, IMG, IMG), dtype=jnp.float32)
    logits = jax.jit(vit_forward)(params, pixel_values)
    jax.block_until_ready(logits)
    assert logits.shape == (2, NUM_LABELS)
    assert bool(jnp.all(jnp.isfinite(logits)))
    print("KERNEL_OK")
</pallas_src>

<mosaic_0001>
module attributes {stable_mosaic.version = 11 : i64} {
  func.func @_vit_kernel(%arg0: i32, %arg1: memref<8x768xf32, #tpu.memory_space<vmem>>, %arg2: memref<768x128xf32, #tpu.memory_space<vmem>>, %arg3: memref<1x128xf32, #tpu.memory_space<vmem>>, %arg4: memref<1x128xf32, #tpu.memory_space<vmem>>, %arg5: memref<5x128xf32, #tpu.memory_space<vmem>>, %arg6: memref<1x128xf32, #tpu.memory_space<vmem>>, %arg7: memref<1x128xf32, #tpu.memory_space<vmem>>, %arg8: memref<128x128xf32, #tpu.memory_space<vmem>>, %arg9: memref<1x128xf32, #tpu.memory_space<vmem>>, %arg10: memref<1x1x128xf32, #tpu.memory_space<vmem>>, %arg11: memref<1x1x128xf32, #tpu.memory_space<vmem>>, %arg12: memref<1x128x384xf32, #tpu.memory_space<vmem>>, %arg13: memref<1x1x384xf32, #tpu.memory_space<vmem>>, %arg14: memref<1x128x128xf32, #tpu.memory_space<vmem>>, %arg15: memref<1x1x128xf32, #tpu.memory_space<vmem>>, %arg16: memref<1x1x128xf32, #tpu.memory_space<vmem>>, %arg17: memref<1x1x128xf32, #tpu.memory_space<vmem>>, %arg18: memref<1x128x512xf32, #tpu.memory_space<vmem>>, %arg19: memref<1x1x512xf32, #tpu.memory_space<vmem>>, %arg20: memref<1x512x128xf32, #tpu.memory_space<vmem>>, %arg21: memref<1x1x128xf32, #tpu.memory_space<vmem>>, %arg22: memref<2x128xf32, #tpu.memory_space<vmem>>, %arg23: memref<10x128xf32, #tpu.memory_space<vmem>>, %arg24: memref<10x128xf32, #tpu.memory_space<vmem>>) attributes {dimension_semantics = [#tpu.dimension_semantics<arbitrary>], iteration_bounds = array<i64: 2>, scalar_prefetch = 0 : i64, scratch_operands = 2 : i64, tpu.core_type = #tpu.core_type<tc>, window_params = [{pipeline_mode = #tpu.pipeline_mode<synchronous>, transform_indices = @transform_0, window_bounds = array<i64: 8, 768>}, {pipeline_mode = #tpu.pipeline_mode<synchronous>, transform_indices = @transform_1, window_bounds = array<i64: 768, 128>}, {pipeline_mode = #tpu.pipeline_mode<synchronous>, transform_indices = @transform_2, window_bounds = array<i64: 1, 128>}, {pipeline_mode = #tpu.pipeline_mode<synchronous>, transform_indices = @transform_3, window_bounds = array<i64: 1, 128>}, {pipeline_mode = #tpu.pipeline_mode<synchronous>, transform_indices = @transform_4, window_bounds = array<i64: 5, 128>}, {pipeline_mode = #tpu.pipeline_mode<synchronous>, transform_indices = @transform_5, window_bounds = array<i64: 1, 128>}, {pipeline_mode = #tpu.pipeline_mode<synchronous>, transform_indices = @transform_6, window_bounds = array<i64: 1, 128>}, {pipeline_mode = #tpu.pipeline_mode<synchronous>, transform_indices = @transform_7, window_bounds = array<i64: 128, 128>}, {pipeline_mode = #tpu.pipeline_mode<synchronous>, transform_indices = @transform_8, window_bounds = array<i64: 1, 128>}, {transform_indices = @transform_9, window_bounds = array<i64: 1, 1, 128>}, {transform_indices = @transform_10, window_bounds = array<i64: 1, 1, 128>}, {transform_indices = @transform_11, window_bounds = array<i64: 1, 128, 384>}, {transform_indices = @transform_12, window_bounds = array<i64: 1, 1, 384>}, {transform_indices = @transform_13, window_bounds = array<i64: 1, 128, 128>}, {transform_indices = @transform_14, window_bounds = array<i64: 1, 1, 128>}, {transform_indices = @transform_15, window_bounds = array<i64: 1, 1, 128>}, {transform_indices = @transform_16, window_bounds = array<i64: 1, 1, 128>}, {transform_indices = @transform_17, window_bounds = array<i64: 1, 128, 512>}, {transform_indices = @transform_18, window_bounds = array<i64: 1, 1, 512>}, {transform_indices = @transform_19, window_bounds = array<i64: 1, 512, 128>}, {transform_indices = @transform_20, window_bounds = array<i64: 1, 1, 128>}, {pipeline_mode = #tpu.pipeline_mode<synchronous>, transform_indices = @transform_21, window_bounds = array<i64: 2, 128>}]} {
    %c0_i32 = arith.constant 0 : i32
    %0 = arith.cmpi eq, %arg0, %c0_i32 : i32
    %1 = arith.extui %0 : i1 to i32
    %c0_i32_0 = arith.constant 0 : i32
    %2 = arith.cmpi ne, %1, %c0_i32_0 : i32
    scf.if %2 {
      %c0_111 = arith.constant 0 : index
      %c0_112 = arith.constant 0 : index
      %254 = vector.load %arg1[%c0_111, %c0_112] : memref<8x768xf32, #tpu.memory_space<vmem>>, vector<8x768xf32>
      %c0_113 = arith.constant 0 : index
      %c0_114 = arith.constant 0 : index
      %255 = vector.load %arg2[%c0_113, %c0_114] : memref<768x128xf32, #tpu.memory_space<vmem>>, vector<768x128xf32>
      %cst_115 = arith.constant dense<0.000000e+00> : vector<8x128xf32>
      %256 = tpu.matmul %254, %255, %cst_115 {dimension_numbers = #tpu.dot_dimension_numbers<[1], [0], [0], [1], [0, 0, 1, 1], [], []>} : vector<8x768xf32>, vector<768x128xf32>, vector<8x128xf32> -> vector<8x128xf32>
      %c0_116 = arith.constant 0 : index
      %c0_117 = arith.constant 0 : index
      %257 = vector.load %arg3[%c0_116, %c0_117] : memref<1x128xf32, #tpu.memory_space<vmem>>, vector<1x128xf32>
      %258 = vector.broadcast %257 : vector<1x128xf32> to vector<8x128xf32>
      %259 = arith.addf %256, %258 : vector<8x128xf32>
      %c0_118 = arith.constant 0 : index
      %c0_119 = arith.constant 0 : index
      %260 = vector.load %arg4[%c0_118, %c0_119] : memref<1x128xf32, #tpu.memory_space<vmem>>, vector<1x128xf32>
      %c0_120 = arith.constant 0 : index
      %c0_121 = arith.constant 0 : index
      %261 = vector.load %arg5[%c0_120, %c0_121] : memref<5x128xf32, #tpu.memory_space<vmem>>, vector<5x128xf32>
      %262 = vector.extract_strided_slice %261 {offsets = [0, 0], sizes = [1, 128], strides = [1, 1]} : vector<5x128xf32> to vector<1x128xf32>
      %263 = arith.addf %260, %262 : vector<1x128xf32>
      %c0_122 = arith.constant 0 : index
      %c0_123 = arith.constant 0 : index
      %264 = vector.load %arg23[%c0_122, %c0_123] : memref<10x128xf32, #tpu.memory_space<vmem>>, vector<1x128xf32>
      tpu.vector_store %arg23[%c0_122, %c0_123], %263 {strides = array<i32>} : memref<10x128xf32, #tpu.memory_space<vmem>>, vector<1x128xf32>,
      %265 = vector.extract_strided_slice %259 {offsets = [0, 0], sizes = [4, 128], strides = [1, 1]} : vector<8x128xf32> to vector<4x128xf32>
      %266 = vector.extract_strided_slice %261 {offsets = [1, 0], sizes = [4, 128], strides = [1, 1]} : vector<5x128xf32> to vector<4x128xf32>
      %267 = arith.addf %265, %266 : vector<4x128xf32>
      %c1 = arith.constant 1 : index
      %c0_124 = arith.constant 0 : index
      %268 = vector.load %arg23[%c1, %c0_124] : memref<10x128xf32, #tpu.memory_space<vmem>>, vector<4x128xf32>
      tpu.vector_store %arg23[%c1, %c0_124], %267 {strides = array<i32>} : memref<10x128xf32, #tpu.memory_space<vmem>>, vector<4x128xf32>,
      %269 = vector.extract_strided_slice %261 {offsets = [0, 0], sizes = [1, 128], strides = [1, 1]} : vector<5x128xf32> to vector<1x128xf32>
      %270 = arith.addf %260, %269 : vector<1x128xf32>
      %c5_125 = arith.constant 5 : index
      %c0_126 = arith.constant 0 : index
      %271 = vector.load %arg23[%c5_125, %c0_126] : memref<10x128xf32, #tpu.memory_space<vmem>>, vector<1x128xf32>
      tpu.vector_store %arg23[%c5_125, %c0_126], %270 {strides = array<i32>} : memref<10x128xf32, #tpu.memory_space<vmem>>, vector<1x128xf32>,
      %272 = vector.extract_strided_slice %259 {offsets = [4, 0], sizes = [4, 128], strides = [1, 1]} : vector<8x128xf32> to vector<4x128xf32>
      %273 = vector.extract_strided_slice %261 {offsets = [1, 0], sizes = [4, 128], strides = [1, 1]} : vector<5x128xf32> to vector<4x128xf32>
      %274 = arith.addf %272, %273 : vector<4x128xf32>
      %c6 = arith.constant 6 : index
      %c0_127 = arith.constant 0 : index
      %275 = vector.load %arg23[%c6, %c0_127] : memref<10x128xf32, #tpu.memory_space<vmem>>, vector<4x128xf32>
      tpu.vector_store %arg23[%c6, %c0_127], %274 {strides = array<i32>} : memref<10x128xf32, #tpu.memory_space<vmem>>, vector<4x128xf32>,
    } else {
    }
    %c0 = arith.constant 0 : index
    %c0_1 = arith.constant 0 : index
    %3 = vector.load %arg23[%c0, %c0_1] : memref<10x128xf32, #tpu.memory_space<vmem>>, vector<10x128xf32>
    %c0_2 = arith.constant 0 : index
    %c0_3 = arith.constant 0 : index
    %c0_4 = arith.constant 0 : index
    %4 = vector.load %arg10[%c0_2, %c0_3, %c0_4] : memref<1x1x128xf32, #tpu.memory_space<vmem>>, vector<1x1x128xf32>
    %5 = vector.shape_cast %4 : vector<1x1x128xf32> to vector<1x128xf32>
    %c0_5 = arith.constant 0 : index
    %c0_6 = arith.constant 0 : index
    %c0_7 = arith.constant 0 : index
    %6 = vector.load %arg11[%c0_5, %c0_6, %c0_7] : memref<1x1x128xf32, #tpu.memory_space<vmem>>, vector<1x1x128xf32>
    %7 = vector.shape_cast %6 : vector<1x1x128xf32> to vector<1x128xf32>
    %cst = arith.constant dense<0.000000e+00> : vector<10xf32>
    %8 = vector.multi_reduction <add>, %3, %cst [1] : vector<10x128xf32> to vector<10xf32>
    %9 = vector.shape_cast %8 : vector<10xf32> to vector<10x1xf32>
    %cst_8 = arith.constant 1.280000e+02 : f32
    %10 = vector.broadcast %cst_8 : f32 to vector<10x1xf32>
    %11 = arith.divf %9, %10 : vector<10x1xf32>
    %12 = vector.broadcast %11 : vector<10x1xf32> to vector<10x128xf32>
    %13 = arith.subf %3, %12 : vector<10x128xf32>
    %14 = arith.mulf %13, %13 : vector<10x128xf32>
    %cst_9 = arith.constant dense<0.000000e+00> : vector<10xf32>
    %15 = vector.multi_reduction <add>, %14, %cst_9 [1] : vector<10x128xf32> to vector<10xf32>
    %16 = vector.shape_cast %15 : vector<10xf32> to vector<10x1xf32>
    %cst_10 = arith.constant 1.280000e+02 : f32
    %17 = vector.broadcast %cst_10 : f32 to vector<10x1xf32>
    %18 = arith.divf %16, %17 : vector<10x1xf32>
    %19 = vector.broadcast %11 : vector<10x1xf32> to vector<10x128xf32>
    %20 = arith.subf %3, %19 : vector<10x128xf32>
    %cst_11 = arith.constant 9.99999996E-13 : f32
    %21 = vector.broadcast %cst_11 : f32 to vector<10x1xf32>
    %22 = arith.addf %18, %21 : vector<10x1xf32>
    %23 = math.rsqrt %22 : vector<10x1xf32>
    %24 = vector.broadcast %23 : vector<10x1xf32> to vector<10x128xf32>
    %25 = arith.mulf %20, %24 : vector<10x128xf32>
    %26 = vector.broadcast %5 : vector<1x128xf32> to vector<10x128xf32>
    %27 = arith.mulf %25, %26 : vector<10x128xf32>
    %28 = vector.broadcast %7 : vector<1x128xf32> to vector<10x128xf32>
    %29 = arith.addf %27, %28 : vector<10x128xf32>
    %c0_12 = arith.constant 0 : index
    %c0_13 = arith.constant 0 : index
    %c0_14 = arith.constant 0 : index
    %30 = vector.load %arg12[%c0_12, %c0_13, %c0_14] : memref<1x128x384xf32, #tpu.memory_space<vmem>>, vector<1x128x384xf32>
    %31 = vector.shape_cast %30 : vector<1x128x384xf32> to vector<128x384xf32>
    %cst_15 = arith.constant dense<0.000000e+00> : vector<10x384xf32>
    %32 = tpu.matmul %29, %31, %cst_15 {dimension_numbers = #tpu.dot_dimension_numbers<[1], [0], [0], [1], [0, 0, 1, 1], [], []>} : vector<10x128xf32>, vector<128x384xf32>, vector<10x384xf32> -> vector<10x384xf32>
    %c0_16 = arith.constant 0 : index
    %c0_17 = arith.constant 0 : index
    %c0_18 = arith.constant 0 : index
    %33 = vector.load %arg13[%c0_16, %c0_17, %c0_18] : memref<1x1x384xf32, #tpu.memory_space<vmem>>, vector<1x1x384xf32>
    %34 = vector.shape_cast %33 : vector<1x1x384xf32> to vector<1x384xf32>
    %35 = vector.broadcast %34 : vector<1x384xf32> to vector<10x384xf32>
    %36 = arith.addf %32, %35 : vector<10x384xf32>
    %37 = vector.extract_strided_slice %36 {offsets = [0, 0], sizes = [10, 128], strides = [1, 1]} : vector<10x384xf32> to vector<10x128xf32>
    %38 = vector.extract_strided_slice %36 {offsets = [0, 128], sizes = [10, 128], strides = [1, 1]} : vector<10x384xf32> to vector<10x128xf32>
    %39 = vector.extract_strided_slice %36 {offsets = [0, 256], sizes = [10, 128], strides = [1, 1]} : vector<10x384xf32> to vector<10x128xf32>
    %40 = vector.extract_strided_slice %37 {offsets = [0, 0], sizes = [5, 32], strides = [1, 1]} : vector<10x128xf32> to vector<5x32xf32>
    %41 = vector.extract_strided_slice %38 {offsets = [0, 0], sizes = [5, 32], strides = [1, 1]} : vector<10x128xf32> to vector<5x32xf32>
    %42 = vector.extract_strided_slice %39 {offsets = [0, 0], sizes = [5, 32], strides = [1, 1]} : vector<10x128xf32> to vector<5x32xf32>
    %43 = tpu.transpose %41, [1, 0] : vector<5x32xf32> -> vector<32x5xf32>
    %cst_19 = arith.constant dense<0.000000e+00> : vector<5x5xf32>
    %44 = tpu.matmul %40, %43, %cst_19 {dimension_numbers = #tpu.dot_dimension_numbers<[1], [0], [0], [1], [0, 0, 1, 1], [], []>} : vector<5x32xf32>, vector<32x5xf32>, vector<5x5xf32> -> vector<5x5xf32>
    %cst_20 = arith.constant 0.176776692 : f32
    %45 = vector.broadcast %cst_20 : f32 to vector<5x5xf32>
    %46 = arith.mulf %44, %45 : vector<5x5xf32>
    %cst_21 = arith.constant dense<0xFF800000> : vector<5xf32>
    %47 = vector.multi_reduction <maximumf>, %46, %cst_21 [1] : vector<5x5xf32> to vector<5xf32>
    %48 = vector.shape_cast %47 : vector<5xf32> to vector<5x1xf32>
    %49 = vector.broadcast %48 : vector<5x1xf32> to vector<5x5xf32>
    %50 = arith.subf %46, %49 : vector<5x5xf32>
    %51 = math.exp %50 : vector<5x5xf32>
    %cst_22 = arith.constant dense<0.000000e+00> : vector<5xf32>
    %52 = vector.multi_reduction <add>, %51, %cst_22 [1] : vector<5x5xf32> to vector<5xf32>
    %53 = vector.shape_cast %52 : vector<5xf32> to vector<5x1xf32>
    %54 = tpu.reciprocal %53 {approx = true} : vector<5x1xf32> -> vector<5x1xf32>
    %55 = vector.broadcast %54 : vector<5x1xf32> to vector<5x5xf32>
    %56 = arith.mulf %51, %55 : vector<5x5xf32>
    %cst_23 = arith.constant dense<0.000000e+00> : vector<5x32xf32>
    %57 = tpu.matmul %56, %42, %cst_23 {dimension_numbers = #tpu.dot_dimension_numbers<[1], [0], [0], [1], [0, 0, 1, 1], [], []>} : vector<5x5xf32>, vector<5x32xf32>, vector<5x32xf32> -> vector<5x32xf32>
    %c0_24 = arith.constant 0 : index
    %c0_25 = arith.constant 0 : index
    %58 = vector.load %arg24[%c0_24, %c0_25] : memref<10x128xf32, #tpu.memory_space<vmem>>, vector<5x32xf32>
    tpu.vector_store %arg24[%c0_24, %c0_25], %57 {strides = array<i32>} : memref<10x128xf32, #tpu.memory_space<vmem>>, vector<5x32xf32>,
    %59 = vector.extract_strided_slice %37 {offsets = [0, 32], sizes = [5, 32], strides = [1, 1]} : vector<10x128xf32> to vector<5x32xf32>
    %60 = vector.extract_strided_slice %38 {offsets = [0, 32], sizes = [5, 32], strides = [1, 1]} : vector<10x128xf32> to vector<5x32xf32>
    %61 = vector.extract_strided_slice %39 {offsets = [0, 32], sizes = [5, 32], strides = [1, 1]} : vector<10x128xf32> to vector<5x32xf32>
    %62 = tpu.transpose %60, [1, 0] : vector<5x32xf32> -> vector<32x5xf32>
    %cst_26 = arith.constant dense<0.000000e+00> : vector<5x5xf32>
    %63 = tpu.matmul %59, %62, %cst_26 {dimension_numbers = #tpu.dot_dimension_numbers<[1], [0], [0], [1], [0, 0, 1, 1], [], []>} : vector<5x32xf32>, vector<32x5xf32>, vector<5x5xf32> -> vector<5x5xf32>
    %cst_27 = arith.constant 0.176776692 : f32
    %64 = vector.broadcast %cst_27 : f32 to vector<5x5xf32>
    %65 = arith.mulf %63, %64 : vector<5x5xf32>
    %cst_28 = arith.constant dense<0xFF800000> : vector<5xf32>
    %66 = vector.multi_reduction <maximumf>, %65, %cst_28 [1] : vector<5x5xf32> to vector<5xf32>
    %67 = vector.shape_cast %66 : vector<5xf32> to vector<5x1xf32>
    %68 = vector.broadcast %67 : vector<5x1xf32> to vector<5x5xf32>
    %69 = arith.subf %65, %68 : vector<5x5xf32>
    %70 = math.exp %69 : vector<5x5xf32>
    %cst_29 = arith.constant dense<0.000000e+00> : vector<5xf32>
    %71 = vector.multi_reduction <add>, %70, %cst_29 [1] : vector<5x5xf32> to vector<5xf32>
    %72 = vector.shape_cast %71 : vector<5xf32> to vector<5x1xf32>
    %73 = tpu.reciprocal %72 {approx = true} : vector<5x1xf32> -> vector<5x1xf32>
    %74 = vector.broadcast %73 : vector<5x1xf32> to vector<5x5xf32>
    %75 = arith.mulf %70, %74 : vector<5x5xf32>
    %cst_30 = arith.constant dense<0.000000e+00> : vector<5x32xf32>
    %76 = tpu.matmul %75, %61, %cst_30 {dimension_numbers = #tpu.dot_dimension_numbers<[1], [0], [0], [1], [0, 0, 1, 1], [], []>} : vector<5x5xf32>, vector<5x32xf32>, vector<5x32xf32> -> vector<5x32xf32>
    %c0_31 = arith.constant 0 : index
    %c32 = arith.constant 32 : index
    %77 = vector.load %arg24[%c0_31, %c32] : memref<10x128xf32, #tpu.memory_space<vmem>>, vector<5x32xf32>
    tpu.vector_store %arg24[%c0_31, %c32], %76 {strides = array<i32>} : memref<10x128xf32, #tpu.memory_space<vmem>>, vector<5x32xf32>,
    %78 = vector.extract_strided_slice %37 {offsets = [0, 64], sizes = [5, 32], strides = [1, 1]} : vector<10x128xf32> to vector<5x32xf32>
    %79 = vector.extract_strided_slice %38 {offsets = [0, 64], sizes = [5, 32], strides = [1, 1]} : vector<10x128xf32> to vector<5x32xf32>
    %80 = vector.extract_strided_slice %39 {offsets = [0, 64], sizes = [5, 32], strides = [1, 1]} : vector<10x128xf32> to vector<5x32xf32>
    %81 = tpu.transpose %79, [1, 0] : vector<5x32xf32> -> vector<32x5xf32>
    %cst_32 = arith.constant dense<0.000000e+00> : vector<5x5xf32>
    %82 = tpu.matmul %78, %81, %cst_32 {dimension_numbers = #tpu.dot_dimension_numbers<[1], [0], [0], [1], [0, 0, 1, 1], [], []>} : vector<5x32xf32>, vector<32x5xf32>, vector<5x5xf32> -> vector<5x5xf32>
    %cst_33 = arith.constant 0.176776692 : f32
    %83 = vector.broadcast %cst_33 : f32 to vector<5x5xf32>
    %84 = arith.mulf %82, %83 : vector<5x5xf32>
    %cst_34 = arith.constant dense<0xFF800000> : vector<5xf32>
    %85 = vector.multi_reduction <maximumf>, %84, %cst_34 [1] : vector<5x5xf32> to vector<5xf32>
    %86 = vector.shape_cast %85 : vector<5xf32> to vector<5x1xf32>
    %87 = vector.broadcast %86 : vector<5x1xf32> to vector<5x5xf32>
    %88 = arith.subf %84, %87 : vector<5x5xf32>
    %89 = math.exp %88 : vector<5x5xf32>
    %cst_35 = arith.constant dense<0.000000e+00> : vector<5xf32>
    %90 = vector.multi_reduction <add>, %89, %cst_35 [1] : vector<5x5xf32> to vector<5xf32>
    %91 = vector.shape_cast %90 : vector<5xf32> to vector<5x1xf32>
    %92 = tpu.reciprocal %91 {approx = true} : vector<5x1xf32> -> vector<5x1xf32>
    %93 = vector.broadcast %92 : vector<5x1xf32> to vector<5x5xf32>
    %94 = arith.mulf %89, %93 : vector<5x5xf32>
    %cst_36 = arith.constant dense<0.000000e+00> : vector<5x32xf32>
    %95 = tpu.matmul %94, %80, %cst_36 {dimension_numbers = #tpu.dot_dimension_numbers<[1], [0], [0], [1], [0, 0, 1, 1], [], []>} : vector<5x5xf32>, vector<5x32xf32>, vector<5x32xf32> -> vector<5x32xf32>
    %c0_37 = arith.constant 0 : index
    %c64 = arith.constant 64 : index
    %96 = vector.load %arg24[%c0_37, %c64] : memref<10x128xf32, #tpu.memory_space<vmem>>, vector<5x32xf32>
    tpu.vector_store %arg24[%c0_37, %c64], %95 {strides = array<i32>} : memref<10x128xf32, #tpu.memory_space<vmem>>, vector<5x32xf32>,
    %97 = vector.extract_strided_slice %37 {offsets = [0, 96], sizes = [5, 32], strides = [1, 1]} : vector<10x128xf32> to vector<5x32xf32>
    %98 = vector.extract_strided_slice %38 {offsets = [0, 96], sizes = [5, 32], strides = [1, 1]} : vector<10x128xf32> to vector<5x32xf32>
    %99 = vector.extract_strided_slice %39 {offsets = [0, 96], sizes = [5, 32], strides = [1, 1]} : vector<10x128xf32> to vector<5x32xf32>
    %100 = tpu.transpose %98, [1, 0] : vector<5x32xf32> -> vector<32x5xf32>
    %cst_38 = arith.constant dense<0.000000e+00> : vector<5x5xf32>
    %101 = tpu.matmul %97, %100, %cst_38 {dimension_numbers = #tpu.dot_dimension_numbers<[1], [0], [0], [1], [0, 0, 1, 1], [], []>} : vector<5x32xf32>, vector<32x5xf32>, vector<5x5xf32> -> vector<5x5xf32>
    %cst_39 = arith.constant 0.176776692 : f32
    %102 = vector.broadcast %cst_39 : f32 to vector<5x5xf32>
    %103 = arith.mulf %101, %102 : vector<5x5xf32>
    %cst_40 = arith.constant dense<0xFF800000> : vector<5xf32>
    %104 = vector.multi_reduction <maximumf>, %103, %cst_40 [1] : vector<5x5xf32> to vector<5xf32>
    %105 = vector.shape_cast %104 : vector<5xf32> to vector<5x1xf32>
    %106 = vector.broadcast %105 : vector<5x1xf32> to vector<5x5xf32>
    %107 = arith.subf %103, %106 : vector<5x5xf32>
    %108 = math.exp %107 : vector<5x5xf32>
    %cst_41 = arith.constant dense<0.000000e+00> : vector<5xf32>
    %109 = vector.multi_reduction <add>, %108, %cst_41 [1] : vector<5x5xf32> to vector<5xf32>
    %110 = vector.shape_cast %109 : vector<5xf32> to vector<5x1xf32>
    %111 = tpu.reciprocal %110 {approx = true} : vector<5x1xf32> -> vector<5x1xf32>
    %112 = vector.broadcast %111 : vector<5x1xf32> to vector<5x5xf32>
    %113 = arith.mulf %108, %112 : vector<5x5xf32>
    %cst_42 = arith.constant dense<0.000000e+00> : vector<5x32xf32>
    %114 = tpu.matmul %113, %99, %cst_42 {dimension_numbers = #tpu.dot_dimension_numbers<[1], [0], [0], [1], [0, 0, 1, 1], [], []>} : vector<5x5xf32>, vector<5x32xf32>, vector<5x32xf32> -> vector<5x32xf32>
    %c0_43 = arith.constant 0 : index
    %c96 = arith.constant 96 : index
    %115 = vector.load %arg24[%c0_43, %c96] : memref<10x128xf32, #tpu.memory_space<vmem>>, vector<5x32xf32>
    tpu.vector_store %arg24[%c0_43, %c96], %114 {strides = array<i32>} : memref<10x128xf32, #tpu.memory_space<vmem>>, vector<5x32xf32>,
    %116 = vector.extract_strided_slice %37 {offsets = [5, 0], sizes = [5, 32], strides = [1, 1]} : vector<10x128xf32> to vector<5x32xf32>
    %117 = vector.extract_strided_slice %38 {offsets = [5, 0], sizes = [5, 32], strides = [1, 1]} : vector<10x128xf32> to vector<5x32xf32>
    %118 = vector.extract_strided_slice %39 {offsets = [5, 0], sizes = [5, 32], strides = [1, 1]} : vector<10x128xf32> to vector<5x32xf32>
    %119 = tpu.transpose %117, [1, 0] : vector<5x32xf32> -> vector<32x5xf32>
    %cst_44 = arith.constant dense<0.000000e+00> : vector<5x5xf32>
    %120 = tpu.matmul %116, %119, %cst_44 {dimension_numbers = #tpu.dot_dimension_numbers<[1], [0], [0], [1], [0, 0, 1, 1], [], []>} : vector<5x32xf32>, vector<32x5xf32>, vector<5x5xf32> -> vector<5x5xf32>
    %cst_45 = arith.constant 0.176776692 : f32
    %121 = vector.broadcast %cst_45 : f32 to vector<5x5xf32>
    %122 = arith.mulf %120, %121 : vector<5x5xf32>
    %cst_46 = arith.constant dense<0xFF800000> : vector<5xf32>
    %123 = vector.multi_reduction <maximumf>, %122, %cst_46 [1] : vector<5x5xf32> to vector<5xf32>
    %124 = vector.shape_cast %123 : vector<5xf32> to vector<5x1xf32>
    %125 = vector.broadcast %124 : vector<5x1xf32> to vector<5x5xf32>
    %126 = arith.subf %122, %125 : vector<5x5xf32>
    %127 = math.exp %126 : vector<5x5xf32>
    %cst_47 = arith.constant dense<0.000000e+00> : vector<5xf32>
    %128 = vector.multi_reduction <add>, %127, %cst_47 [1] : vector<5x5xf32> to vector<5xf32>
    %129 = vector.shape_cast %128 : vector<5xf32> to vector<5x1xf32>
    %130 = tpu.reciprocal %129 {approx = true} : vector<5x1xf32> -> vector<5x1xf32>
    %131 = vector.broadcast %130 : vector<5x1xf32> to vector<5x5xf32>
    %132 = arith.mulf %127, %131 : vector<5x5xf32>
    %cst_48 = arith.constant dense<0.000000e+00> : vector<5x32xf32>
    %133 = tpu.matmul %132, %118, %cst_48 {dimension_numbers = #tpu.dot_dimension_numbers<[1], [0], [0], [1], [0, 0, 1, 1], [], []>} : vector<5x5xf32>, vector<5x32xf32>, vector<5x32xf32> -> vector<5x32xf32>
    %c5 = arith.constant 5 : index
    %c0_49 = arith.constant 0 : index
    %134 = vector.load %arg24[%c5, %c0_49] : memref<10x128xf32, #tpu.memory_space<vmem>>, vector<5x32xf32>
    tpu.vector_store %arg24[%c5, %c0_49], %133 {strides = array<i32>} : memref<10x128xf32, #tpu.memory_space<vmem>>, vector<5x32xf32>,
    %135 = vector.extract_strided_slice %37 {offsets = [5, 32], sizes = [5, 32], strides = [1, 1]} : vector<10x128xf32> to vector<5x32xf32>
    %136 = vector.extract_strided_slice %38 {offsets = [5, 32], sizes = [5, 32], strides = [1, 1]} : vector<10x128xf32> to vector<5x32xf32>
    %137 = vector.extract_strided_slice %39 {offsets = [5, 32], sizes = [5, 32], strides = [1, 1]} : vector<10x128xf32> to vector<5x32xf32>
    %138 = tpu.transpose %136, [1, 0] : vector<5x32xf32> -> vector<32x5xf32>
    %cst_50 = arith.constant dense<0.000000e+00> : vector<5x5xf32>
    %139 = tpu.matmul %135, %138, %cst_50 {dimension_numbers = #tpu.dot_dimension_numbers<[1], [0], [0], [1], [0, 0, 1, 1], [], []>} : vector<5x32xf32>, vector<32x5xf32>, vector<5x5xf32> -> vector<5x5xf32>
    %cst_51 = arith.constant 0.176776692 : f32
    %140 = vector.broadcast %cst_51 : f32 to vector<5x5xf32>
    %141 = arith.mulf %139, %140 : vector<5x5xf32>
    %cst_52 = arith.constant dense<0xFF800000> : vector<5xf32>
    %142 = vector.multi_reduction <maximumf>, %141, %cst_52 [1] : vector<5x5xf32> to vector<5xf32>
    %143 = vector.shape_cast %142 : vector<5xf32> to vector<5x1xf32>
    %144 = vector.broadcast %143 : vector<5x1xf32> to vector<5x5xf32>
    %145 = arith.subf %141, %144 : vector<5x5xf32>
    %146 = math.exp %145 : vector<5x5xf32>
    %cst_53 = arith.constant dense<0.000000e+00> : vector<5xf32>
    %147 = vector.multi_reduction <add>, %146, %cst_53 [1] : vector<5x5xf32> to vector<5xf32>
    %148 = vector.shape_cast %147 : vector<5xf32> to vector<5x1xf32>
    %149 = tpu.reciprocal %148 {approx = true} : vector<5x1xf32> -> vector<5x1xf32>
    %150 = vector.broadcast %149 : vector<5x1xf32> to vector<5x5xf32>
    %151 = arith.mulf %146, %150 : vector<5x5xf32>
    %cst_54 = arith.constant dense<0.000000e+00> : vector<5x32xf32>
    %152 = tpu.matmul %151, %137, %cst_54 {dimension_numbers = #tpu.dot_dimension_numbers<[1], [0], [0], [1], [0, 0, 1, 1], [], []>} : vector<5x5xf32>, vector<5x32xf32>, vector<5x32xf32> -> vector<5x32xf32>
    %c5_55 = arith.constant 5 : index
    %c32_56 = arith.constant 32 : index
    %153 = vector.load %arg24[%c5_55, %c32_56] : memref<10x128xf32, #tpu.memory_space<vmem>>, vector<5x32xf32>
    tpu.vector_store %arg24[%c5_55, %c32_56], %152 {strides = array<i32>} : memref<10x128xf32, #tpu.memory_space<vmem>>, vector<5x32xf32>,
    %154 = vector.extract_strided_slice %37 {offsets = [5, 64], sizes = [5, 32], strides = [1, 1]} : vector<10x128xf32> to vector<5x32xf32>
    %155 = vector.extract_strided_slice %38 {offsets = [5, 64], sizes = [5, 32], strides = [1, 1]} : vector<10x128xf32> to vector<5x32xf32>
    %156 = vector.extract_strided_slice %39 {offsets = [5, 64], sizes = [5, 32], strides = [1, 1]} : vector<10x128xf32> to vector<5x32xf32>
    %157 = tpu.transpose %155, [1, 0] : vector<5x32xf32> -> vector<32x5xf32>
    %cst_57 = arith.constant dense<0.000000e+00> : vector<5x5xf32>
    %158 = tpu.matmul %154, %157, %cst_57 {dimension_numbers = #tpu.dot_dimension_numbers<[1], [0], [0], [1], [0, 0, 1, 1], [], []>} : vector<5x32xf32>, vector<32x5xf32>, vector<5x5xf32> -> vector<5x5xf32>
    %cst_58 = arith.constant 0.176776692 : f32
    %159 = vector.broadcast %cst_58 : f32 to vector<5x5xf32>
    %160 = arith.mulf %158, %159 : vector<5x5xf32>
    %cst_59 = arith.constant dense<0xFF800000> : vector<5xf32>
    %161 = vector.multi_reduction <maximumf>, %160, %cst_59 [1] : vector<5x5xf32> to vector<5xf32>
    %162 = vector.shape_cast %161 : vector<5xf32> to vector<5x1xf32>
    %163 = vector.broadcast %162 : vector<5x1xf32> to vector<5x5xf32>
    %164 = arith.subf %160, %163 : vector<5x5xf32>
    %165 = math.exp %164 : vector<5x5xf32>
    %cst_60 = arith.constant dense<0.000000e+00> : vector<5xf32>
    %166 = vector.multi_reduction <add>, %165, %cst_60 [1] : vector<5x5xf32> to vector<5xf32>
    %167 = vector.shape_cast %166 : vector<5xf32> to vector<5x1xf32>
    %168 = tpu.reciprocal %167 {approx = true} : vector<5x1xf32> -> vector<5x1xf32>
    %169 = vector.broadcast %168 : vector<5x1xf32> to vector<5x5xf32>
    %170 = arith.mulf %165, %169 : vector<5x5xf32>
    %cst_61 = arith.constant dense<0.000000e+00> : vector<5x32xf32>
    %171 = tpu.matmul %170, %156, %cst_61 {dimension_numbers = #tpu.dot_dimension_numbers<[1], [0], [0], [1], [0, 0, 1, 1], [], []>} : vector<5x5xf32>, vector<5x32xf32>, vector<5x32xf32> -> vector<5x32xf32>
    %c5_62 = arith.constant 5 : index
    %c64_63 = arith.constant 64 : index
    %172 = vector.load %arg24[%c5_62, %c64_63] : memref<10x128xf32, #tpu.memory_space<vmem>>, vector<5x32xf32>
    tpu.vector_store %arg24[%c5_62, %c64_63], %171 {strides = array<i32>} : memref<10x128xf32, #tpu.memory_space<vmem>>, vector<5x32xf32>,
    %173 = vector.extract_strided_slice %37 {offsets = [5, 96], sizes = [5, 32], strides = [1, 1]} : vector<10x128xf32> to vector<5x32xf32>
    %174 = vector.extract_strided_slice %38 {offsets = [5, 96], sizes = [5, 32], strides = [1, 1]} : vector<10x128xf32> to vector<5x32xf32>
    %175 = vector.extract_strided_slice %39 {offsets = [5, 96], sizes = [5, 32], strides = [1, 1]} : vector<10x128xf32> to vector<5x32xf32>
    %176 = tpu.transpose %174, [1, 0] : vector<5x32xf32> -> vector<32x5xf32>
    %cst_64 = arith.constant dense<0.000000e+00> : vector<5x5xf32>
    %177 = tpu.matmul %173, %176, %cst_64 {dimension_numbers = #tpu.dot_dimension_numbers<[1], [0], [0], [1], [0, 0, 1, 1], [], []>} : vector<5x32xf32>, vector<32x5xf32>, vector<5x5xf32> -> vector<5x5xf32>
    %cst_65 = arith.constant 0.176776692 : f32
    %178 = vector.broadcast %cst_65 : f32 to vector<5x5xf32>
    %179 = arith.mulf %177, %178 : vector<5x5xf32>
    %cst_66 = arith.constant dense<0xFF800000> : vector<5xf32>
    %180 = vector.multi_reduction <maximumf>, %179, %cst_66 [1] : vector<5x5xf32> to vector<5xf32>
    %181 = vector.shape_cast %180 : vector<5xf32> to vector<5x1xf32>
    %182 = vector.broadcast %181 : vector<5x1xf32> to vector<5x5xf32>
    %183 = arith.subf %179, %182 : vector<5x5xf32>
    %184 = math.exp %183 : vector<5x5xf32>
    %cst_67 = arith.constant dense<0.000000e+00> : vector<5xf32>
    %185 = vector.multi_reduction <add>, %184, %cst_67 [1] : vector<5x5xf32> to vector<5xf32>
    %186 = vector.shape_cast %185 : vector<5xf32> to vector<5x1xf32>
    %187 = tpu.reciprocal %186 {approx = true} : vector<5x1xf32> -> vector<5x1xf32>
    %188 = vector.broadcast %187 : vector<5x1xf32> to vector<5x5xf32>
    %189 = arith.mulf %184, %188 : vector<5x5xf32>
    %cst_68 = arith.constant dense<0.000000e+00> : vector<5x32xf32>
    %190 = tpu.matmul %189, %175, %cst_68 {dimension_numbers = #tpu.dot_dimension_numbers<[1], [0], [0], [1], [0, 0, 1, 1], [], []>} : vector<5x5xf32>, vector<5x32xf32>, vector<5x32xf32> -> vector<5x32xf32>
    %c5_69 = arith.constant 5 : index
    %c96_70 = arith.constant 96 : index
    %191 = vector.load %arg24[%c5_69, %c96_70] : memref<10x128xf32, #tpu.memory_space<vmem>>, vector<5x32xf32>
    tpu.vector_store %arg24[%c5_69, %c96_70], %190 {strides = array<i32>} : memref<10x128xf32, #tpu.memory_space<vmem>>, vector<5x32xf32>,
    %c0_71 = arith.constant 0 : index
    %c0_72 = arith.constant 0 : index
    %192 = vector.load %arg24[%c0_71, %c0_72] : memref<10x128xf32, #tpu.memory_space<vmem>>, vector<10x128xf32>
    %c0_73 = arith.constant 0 : index
    %c0_74 = arith.constant 0 : index
    %c0_75 = arith.constant 0 : index
    %193 = vector.load %arg14[%c0_73, %c0_74, %c0_75] : memref<1x128x128xf32, #tpu.memory_space<vmem>>, vector<1x128x128xf32>
    %194 = vector.shape_cast %193 : vector<1x128x128xf32> to vector<128x128xf32>
    %cst_76 = arith.constant dense<0.000000e+00> : vector<10x128xf32>
    %195 = tpu.matmul %192, %194, %cst_76 {dimension_numbers = #tpu.dot_dimension_numbers<[1], [0], [0], [1], [0, 0, 1, 1], [], []>} : vector<10x128xf32>, vector<128x128xf32>, vector<10x128xf32> -> vector<10x128xf32>
    %c0_77 = arith.constant 0 : index
    %c0_78 = arith.constant 0 : index
    %c0_79 = arith.constant 0 : index
    %196 = vector.load %arg15[%c0_77, %c0_78, %c0_79] : memref<1x1x128xf32, #tpu.memory_space<vmem>>, vector<1x1x128xf32>
    %197 = vector.shape_cast %196 : vector<1x1x128xf32> to vector<1x128xf32>
    %198 = vector.broadcast %197 : vector<1x128xf32> to vector<10x128xf32>
    %199 = arith.addf %195, %198 : vector<10x128xf32>
    %200 = arith.addf %3, %199 : vector<10x128xf32>
    %c0_80 = arith.constant 0 : index
    %c0_81 = arith.constant 0 : index
    %c0_82 = arith.constant 0 : index
    %201 = vector.load %arg16[%c0_80, %c0_81, %c0_82] : memref<1x1x128xf32, #tpu.memory_space<vmem>>, vector<1x1x128xf32>
    %202 = vector.shape_cast %201 : vector<1x1x128xf32> to vector<1x128xf32>
    %c0_83 = arith.constant 0 : index
    %c0_84 = arith.constant 0 : index
    %c0_85 = arith.constant 0 : index
    %203 = vector.load %arg17[%c0_83, %c0_84, %c0_85] : memref<1x1x128xf32, #tpu.memory_space<vmem>>, vector<1x1x128xf32>
    %204 = vector.shape_cast %203 : vector<1x1x128xf32> to vector<1x128xf32>
    %cst_86 = arith.constant dense<0.000000e+00> : vector<10xf32>
    %205 = vector.multi_reduction <add>, %200, %cst_86 [1] : vector<10x128xf32> to vector<10xf32>
    %206 = vector.shape_cast %205 : vector<10xf32> to vector<10x1xf32>
    %cst_87 = arith.constant 1.280000e+02 : f32
    %207 = vector.broadcast %cst_87 : f32 to vector<10x1xf32>
    %208 = arith.divf %206, %207 : vector<10x1xf32>
    %209 = vector.broadcast %208 : vector<10x1xf32> to vector<10x128xf32>
    %210 = arith.subf %200, %209 : vector<10x128xf32>
    %211 = arith.mulf %210, %210 : vector<10x128xf32>
    %cst_88 = arith.constant dense<0.000000e+00> : vector<10xf32>
    %212 = vector.multi_reduction <add>, %211, %cst_88 [1] : vector<10x128xf32> to vector<10xf32>
    %213 = vector.shape_cast %212 : vector<10xf32> to vector<10x1xf32>
    %cst_89 = arith.constant 1.280000e+02 : f32
    %214 = vector.broadcast %cst_89 : f32 to vector<10x1xf32>
    %215 = arith.divf %213, %214 : vector<10x1xf32>
    %216 = vector.broadcast %208 : vector<10x1xf32> to vector<10x128xf32>
    %217 = arith.subf %200, %216 : vector<10x128xf32>
    %cst_90 = arith.constant 9.99999996E-13 : f32
    %218 = vector.broadcast %cst_90 : f32 to vector<10x1xf32>
    %219 = arith.addf %215, %218 : vector<10x1xf32>
    %220 = math.rsqrt %219 : vector<10x1xf32>
    %221 = vector.broadcast %220 : vector<10x1xf32> to vector<10x128xf32>
    %222 = arith.mulf %217, %221 : vector<10x128xf32>
    %223 = vector.broadcast %202 : vector<1x128xf32> to vector<10x128xf32>
    %224 = arith.mulf %222, %223 : vector<10x128xf32>
    %225 = vector.broadcast %204 : vector<1x128xf32> to vector<10x128xf32>
    %226 = arith.addf %224, %225 : vector<10x128xf32>
    %c0_91 = arith.constant 0 : index
    %c0_92 = arith.constant 0 : index
    %c0_93 = arith.constant 0 : index
    %227 = vector.load %arg18[%c0_91, %c0_92, %c0_93] : memref<1x128x512xf32, #tpu.memory_space<vmem>>, vector<1x128x512xf32>
    %228 = vector.shape_cast %227 : vector<1x128x512xf32> to vector<128x512xf32>
    %cst_94 = arith.constant dense<0.000000e+00> : vector<10x512xf32>
    %229 = tpu.matmul %226, %228, %cst_94 {dimension_numbers = #tpu.dot_dimension_numbers<[1], [0], [0], [1], [0, 0, 1, 1], [], []>} : vector<10x128xf32>, vector<128x512xf32>, vector<10x512xf32> -> vector<10x512xf32>
    %c0_95 = arith.constant 0 : index
    %c0_96 = arith.constant 0 : index
    %c0_97 = arith.constant 0 : index
    %230 = vector.load %arg19[%c0_95, %c0_96, %c0_97] : memref<1x1x512xf32, #tpu.memory_space<vmem>>, vector<1x1x512xf32>
    %231 = vector.shape_cast %230 : vector<1x1x512xf32> to vector<1x512xf32>
    %232 = vector.broadcast %231 : vector<1x512xf32> to vector<10x512xf32>
    %233 = arith.addf %229, %232 : vector<10x512xf32>
    %cst_98 = arith.constant 5.000000e-01 : f32
    %234 = vector.broadcast %cst_98 : f32 to vector<10x512xf32>
    %235 = arith.mulf %234, %233 : vector<10x512xf32>
    %cst_99 = arith.constant 0.707106769 : f32
    %236 = vector.broadcast %cst_99 : f32 to vector<10x512xf32>
    %237 = arith.mulf %233, %236 : vector<10x512xf32>
    %238 = math.erf %237 : vector<10x512xf32>
    %cst_100 = arith.constant 1.000000e+00 : f32
    %239 = vector.broadcast %cst_100 : f32 to vector<10x512xf32>
    %240 = arith.addf %239, %238 : vector<10x512xf32>
    %241 = arith.mulf %235, %240 : vector<10x512xf32>
    %c0_101 = arith.constant 0 : index
    %c0_102 = arith.constant 0 : index
    %c0_103 = arith.constant 0 : index
    %242 = vector.load %arg20[%c0_101, %c0_102, %c0_103] : memref<1x512x128xf32, #tpu.memory_space<vmem>>, vector<1x512x128xf32>
    %243 = vector.shape_cast %242 : vector<1x512x128xf32> to vector<512x128xf32>
    %cst_104 = arith.constant dense<0.000000e+00> : vector<10x128xf32>
    %244 = tpu.matmul %241, %243, %cst_104 {dimension_numbers = #tpu.dot_dimension_numbers<[1], [0], [0], [1], [0, 0, 1, 1], [], []>} : vector<10x512xf32>, vector<512x128xf32>, vector<10x128xf32> -> vector<10x128xf32>
    %c0_105 = arith.constant 0 : index
    %c0_106 = arith.constant 0 : index
    %c0_107 = arith.constant 0 : index
    %245 = vector.load %arg21[%c0_105, %c0_106, %c0_107] : memref<1x1x128xf32, #tpu.memory_space<vmem>>, vector<1x1x128xf32>
    %246 = vector.shape_cast %245 : vector<1x1x128xf32> to vector<1x128xf32>
    %247 = vector.broadcast %246 : vector<1x128xf32> to vector<10x128xf32>
    %248 = arith.addf %244, %247 : vector<10x128xf32>
    %249 = arith.addf %200, %248 : vector<10x128xf32>
    %c0_108 = arith.constant 0 : index
    %c0_109 = arith.constant 0 : index
    %250 = vector.load %arg23[%c0_108, %c0_109] : memref<10x128xf32, #tpu.memory_space<vmem>>, vector<10x128xf32>
    tpu.vector_store %arg23[%c0_108, %c0_109], %249 {strides = array<i32>} : memref<10x128xf32, #tpu.memory_space<vmem>>, vector<10x128xf32>,
    %c1_i32 = arith.constant 1 : i32
    %251 = arith.cmpi eq, %arg0, %c1_i32 : i32
    %252 = arith.extui %251 : i1 to i32
    %c0_i32_110 = arith.constant 0 : i32
    %253 = arith.cmpi ne, %252, %c0_i32_110 : i32
    scf.if %253 {
      %c0_111 = arith.constant 0 : index
      %c0_112 = arith.constant 0 : index
      %254 = vector.load %arg6[%c0_111, %c0_112] : memref<1x128xf32, #tpu.memory_space<vmem>>, vector<1x128xf32>
      %c0_113 = arith.constant 0 : index
      %c0_114 = arith.constant 0 : index
      %255 = vector.load %arg7[%c0_113, %c0_114] : memref<1x128xf32, #tpu.memory_space<vmem>>, vector<1x128xf32>
      %cst_115 = arith.constant dense<0.000000e+00> : vector<10xf32>
      %256 = vector.multi_reduction <add>, %249, %cst_115 [1] : vector<10x128xf32> to vector<10xf32>
      %257 = vector.shape_cast %256 : vector<10xf32> to vector<10x1xf32>
      %cst_116 = arith.constant 1.280000e+02 : f32
      %258 = vector.broadcast %cst_116 : f32 to vector<10x1xf32>
      %259 = arith.divf %257, %258 : vector<10x1xf32>
      %260 = vector.broadcast %259 : vector<10x1xf32> to vector<10x128xf32>
      %261 = arith.subf %249, %260 : vector<10x128xf32>
      %262 = arith.mulf %261, %261 : vector<10x128xf32>
      %cst_117 = arith.constant dense<0.000000e+00> : vector<10xf32>
      %263 = vector.multi_reduction <add>, %262, %cst_117 [1] : vector<10x128xf32> to vector<10xf32>
      %264 = vector.shape_cast %263 : vector<10xf32> to vector<10x1xf32>
      %cst_118 = arith.constant 1.280000e+02 : f32
      %265 = vector.broadcast %cst_118 : f32 to vector<10x1xf32>
      %266 = arith.divf %264, %265 : vector<10x1xf32>
      %267 = vector.broadcast %259 : vector<10x1xf32> to vector<10x128xf32>
      %268 = arith.subf %249, %267 : vector<10x128xf32>
      %cst_119 = arith.constant 9.99999996E-13 : f32
      %269 = vector.broadcast %cst_119 : f32 to vector<10x1xf32>
      %270 = arith.addf %266, %269 : vector<10x1xf32>
      %271 = math.rsqrt %270 : vector<10x1xf32>
      %272 = vector.broadcast %271 : vector<10x1xf32> to vector<10x128xf32>
      %273 = arith.mulf %268, %272 : vector<10x128xf32>
      %274 = vector.broadcast %254 : vector<1x128xf32> to vector<10x128xf32>
      %275 = arith.mulf %273, %274 : vector<10x128xf32>
      %276 = vector.broadcast %255 : vector<1x128xf32> to vector<10x128xf32>
      %277 = arith.addf %275, %276 : vector<10x128xf32>
      %278 = vector.extract_strided_slice %277 {offsets = [0, 0], sizes = [1, 128], strides = [1, 1]} : vector<10x128xf32> to vector<1x128xf32>
      %c0_120 = arith.constant 0 : index
      %c0_121 = arith.constant 0 : index
      %279 = vector.load %arg8[%c0_120, %c0_121] : memref<128x128xf32, #tpu.memory_space<vmem>>, vector<128x128xf32>
      %cst_122 = arith.constant dense<0.000000e+00> : vector<1x128xf32>
      %280 = tpu.matmul %278, %279, %cst_122 {dimension_numbers = #tpu.dot_dimension_numbers<[1], [0], [0], [1], [0, 0, 1, 1], [], []>} : vector<1x128xf32>, vector<128x128xf32>, vector<1x128xf32> -> vector<1x128xf32>
      %c0_123 = arith.constant 0 : index
      %c0_124 = arith.constant 0 : index
      %281 = vector.load %arg9[%c0_123, %c0_124] : memref<1x128xf32, #tpu.memory_space<vmem>>, vector<1x128xf32>
      %282 = arith.addf %280, %281 : vector<1x128xf32>
      %c0_125 = arith.constant 0 : index
      %c0_126 = arith.constant 0 : index
      %283 = vector.load %arg22[%c0_125, %c0_126] : memref<2x128xf32, #tpu.memory_space<vmem>>, vector<1x128xf32>
      tpu.vector_store %arg22[%c0_125, %c0_126], %282 {strides = array<i32>} : memref<2x128xf32, #tpu.memory_space<vmem>>, vector<1x128xf32>,
      %284 = vector.extract_strided_slice %277 {offsets = [5, 0], sizes = [1, 128], strides = [1, 1]} : vector<10x128xf32> to vector<1x128xf32>
      %c0_127 = arith.constant 0 : index
      %c0_128 = arith.constant 0 : index
      %285 = vector.load %arg8[%c0_127, %c0_128] : memref<128x128xf32, #tpu.memory_space<vmem>>, vector<128x128xf32>
      %cst_129 = arith.constant dense<0.000000e+00> : vector<1x128xf32>
      %286 = tpu.matmul %284, %285, %cst_129 {dimension_numbers = #tpu.dot_dimension_numbers<[1], [0], [0], [1], [0, 0, 1, 1], [], []>} : vector<1x128xf32>, vector<128x128xf32>, vector<1x128xf32> -> vector<1x128xf32>
      %c0_130 = arith.constant 0 : index
      %c0_131 = arith.constant 0 : index
      %287 = vector.load %arg9[%c0_130, %c0_131] : memref<1x128xf32, #tpu.memory_space<vmem>>, vector<1x128xf32>
      %288 = arith.addf %286, %287 : vector<1x128xf32>
      %c1 = arith.constant 1 : index
      %c0_132 = arith.constant 0 : index
      %289 = vector.load %arg22[%c1, %c0_132] : memref<2x128xf32, #tpu.memory_space<vmem>>, vector<1x128xf32>
      tpu.vector_store %arg22[%c1, %c0_132], %288 {strides = array<i32>} : memref<2x128xf32, #tpu.memory_space<vmem>>, vector<1x128xf32>,
    } else {
    }
    return
  }
  func.func @transform_0(%arg0: i32) -> (i32, i32) {
    %c0_i32 = arith.constant 0 : i32
    %c0_i32_0 = arith.constant 0 : i32
    %c0_i32_1 = arith.constant 0 : i32
    return %c0_i32, %c0_i32_0 : i32, i32
  }
  func.func @transform_1(%arg0: i32) -> (i32, i32) {
    %c0_i32 = arith.constant 0 : i32
    %c0_i32_0 = arith.constant 0 : i32
    %c0_i32_1 = arith.constant 0 : i32
    return %c0_i32, %c0_i32_0 : i32, i32
  }
  func.func @transform_2(%arg0: i32) -> (i32, i32) {
    %c0_i32 = arith.constant 0 : i32
    %c0_i32_0 = arith.constant 0 : i32
    %c0_i32_1 = arith.constant 0 : i32
    return %c0_i32, %c0_i32_0 : i32, i32
  }
  func.func @transform_3(%arg0: i32) -> (i32, i32) {
    %c0_i32 = arith.constant 0 : i32
    %c0_i32_0 = arith.constant 0 : i32
    %c0_i32_1 = arith.constant 0 : i32
    return %c0_i32, %c0_i32_0 : i32, i32
  }
  func.func @transform_4(%arg0: i32) -> (i32, i32) {
    %c0_i32 = arith.constant 0 : i32
    %c0_i32_0 = arith.constant 0 : i32
    %c0_i32_1 = arith.constant 0 : i32
    return %c0_i32, %c0_i32_0 : i32, i32
  }
  func.func @transform_5(%arg0: i32) -> (i32, i32) {
    %c0_i32 = arith.constant 0 : i32
    %c0_i32_0 = arith.constant 0 : i32
    %c0_i32_1 = arith.constant 0 : i32
    return %c0_i32, %c0_i32_0 : i32, i32
  }
  func.func @transform_6(%arg0: i32) -> (i32, i32) {
    %c0_i32 = arith.constant 0 : i32
    %c0_i32_0 = arith.constant 0 : i32
    %c0_i32_1 = arith.constant 0 : i32
    return %c0_i32, %c0_i32_0 : i32, i32
  }
  func.func @transform_7(%arg0: i32) -> (i32, i32) {
    %c0_i32 = arith.constant 0 : i32
    %c0_i32_0 = arith.constant 0 : i32
    %c0_i32_1 = arith.constant 0 : i32
    return %c0_i32, %c0_i32_0 : i32, i32
  }
  func.func @transform_8(%arg0: i32) -> (i32, i32) {
    %c0_i32 = arith.constant 0 : i32
    %c0_i32_0 = arith.constant 0 : i32
    %c0_i32_1 = arith.constant 0 : i32
    return %c0_i32, %c0_i32_0 : i32, i32
  }
  func.func @transform_9(%arg0: i32) -> (i32, i32, i32) {
    %c0_i32 = arith.constant 0 : i32
    %c0_i32_0 = arith.constant 0 : i32
    %c0_i32_1 = arith.constant 0 : i32
    return %arg0, %c0_i32, %c0_i32_0 : i32, i32, i32
  }
  func.func @transform_10(%arg0: i32) -> (i32, i32, i32) {
    %c0_i32 = arith.constant 0 : i32
    %c0_i32_0 = arith.constant 0 : i32
    %c0_i32_1 = arith.constant 0 : i32
    return %arg0, %c0_i32, %c0_i32_0 : i32, i32, i32
  }
  func.func @transform_11(%arg0: i32) -> (i32, i32, i32) {
    %c0_i32 = arith.constant 0 : i32
    %c0_i32_0 = arith.constant 0 : i32
    %c0_i32_1 = arith.constant 0 : i32
    return %arg0, %c0_i32, %c0_i32_0 : i32, i32, i32
  }
  func.func @transform_12(%arg0: i32) -> (i32, i32, i32) {
    %c0_i32 = arith.constant 0 : i32
    %c0_i32_0 = arith.constant 0 : i32
    %c0_i32_1 = arith.constant 0 : i32
    return %arg0, %c0_i32, %c0_i32_0 : i32, i32, i32
  }
  func.func @transform_13(%arg0: i32) -> (i32, i32, i32) {
    %c0_i32 = arith.constant 0 : i32
    %c0_i32_0 = arith.constant 0 : i32
    %c0_i32_1 = arith.constant 0 : i32
    return %arg0, %c0_i32, %c0_i32_0 : i32, i32, i32
  }
  func.func @transform_14(%arg0: i32) -> (i32, i32, i32) {
    %c0_i32 = arith.constant 0 : i32
    %c0_i32_0 = arith.constant 0 : i32
    %c0_i32_1 = arith.constant 0 : i32
    return %arg0, %c0_i32, %c0_i32_0 : i32, i32, i32
  }
  func.func @transform_15(%arg0: i32) -> (i32, i32, i32) {
    %c0_i32 = arith.constant 0 : i32
    %c0_i32_0 = arith.constant 0 : i32
    %c0_i32_1 = arith.constant 0 : i32
    return %arg0, %c0_i32, %c0_i32_0 : i32, i32, i32
  }
  func.func @transform_16(%arg0: i32) -> (i32, i32, i32) {
    %c0_i32 = arith.constant 0 : i32
    %c0_i32_0 = arith.constant 0 : i32
    %c0_i32_1 = arith.constant 0 : i32
    return %arg0, %c0_i32, %c0_i32_0 : i32, i32, i32
  }
  func.func @transform_17(%arg0: i32) -> (i32, i32, i32) {
    %c0_i32 = arith.constant 0 : i32
    %c0_i32_0 = arith.constant 0 : i32
    %c0_i32_1 = arith.constant 0 : i32
    return %arg0, %c0_i32, %c0_i32_0 : i32, i32, i32
  }
  func.func @transform_18(%arg0: i32) -> (i32, i32, i32) {
    %c0_i32 = arith.constant 0 : i32
    %c0_i32_0 = arith.constant 0 : i32
    %c0_i32_1 = arith.constant 0 : i32
    return %arg0, %c0_i32, %c0_i32_0 : i32, i32, i32
  }
  func.func @transform_19(%arg0: i32) -> (i32, i32, i32) {
    %c0_i32 = arith.constant 0 : i32
    %c0_i32_0 = arith.constant 0 : i32
    %c0_i32_1 = arith.constant 0 : i32
    return %arg0, %c0_i32, %c0_i32_0 : i32, i32, i32
  }
  func.func @transform_20(%arg0: i32) -> (i32, i32, i32) {
    %c0_i32 = arith.constant 0 : i32
    %c0_i32_0 = arith.constant 0 : i32
    %c0_i32_1 = arith.constant 0 : i32
    return %arg0, %c0_i32, %c0_i32_0 : i32, i32, i32
  }
  func.func @transform_21(%arg0: i32) -> (i32, i32) {
    %c0_i32 = arith.constant 0 : i32
    %c0_i32_0 = arith.constant 0 : i32
    %c0_i32_1 = arith.constant 0 : i32
    return %c0_i32, %c0_i32_0 : i32, i32
  }
}

</mosaic_0001>

<bundles_post_ra>
// kernel: vit_forward.1
= control target key start
LH: loop header
LB: loop body
LE: loop exit
PB: predicated region body
PF: predicated region fallthrough
CT: control target
= control target key end

     0   :  { %s4691_s0 = inlined_call_operand.vmem [shape: f32[8,768], index: 0, kind: input, shape index: {}]   ;;  %s4692_s1 = inlined_call_operand.vmem [shape: f32[768,128], index: 1, kind: input, shape index: {}]   ;;  %s4693_s2 = inlined_call_operand.vmem [shape: f32[1,128], index: 2, kind: input, shape index: {}]   ;;  %s4694_s3 = inlined_call_operand.vmem [shape: f32[1,128], index: 3, kind: input, shape index: {}]   ;;  %s4695_s4 = inlined_call_operand.vmem [shape: f32[5,128], index: 4, kind: input, shape index: {}]   ;;  %s4696_s5 = inlined_call_operand.vmem [shape: f32[1,128], index: 5, kind: input, shape index: {}]   ;;  %s4697_s6 = inlined_call_operand.vmem [shape: f32[1,128], index: 6, kind: input, shape index: {}]   ;;  %s4698_s7 = inlined_call_operand.vmem [shape: f32[128,128], index: 7, kind: input, shape index: {}]   ;;  %s4699_s8 = inlined_call_operand.vmem [shape: f32[1,128], index: 8, kind: input, shape index: {}]   ;;  %s4700_s9 = inlined_call_operand.vmem [shape: f32[2,1,128], index: 9, kind: input, shape index: {}]   ;;  %s4701_s10 = inlined_call_operand.vmem [shape: f32[2,1,128], index: 10, kind: input, shape index: {}]   ;;  %s4702_s11 = inlined_call_operand.hbm [shape: f32[2,128,384], index: 11, kind: input, shape index: {}]   ;;  %s4703_s12 = inlined_call_operand.vmem [shape: f32[2,1,384], index: 12, kind: input, shape index: {}]   ;;  %s4704_s13 = inlined_call_operand.vmem [shape: f32[2,128,128], index: 13, kind: input, shape index: {}]   ;;  %s4705_s14 = inlined_call_operand.vmem [shape: f32[2,1,128], index: 14, kind: input, shape index: {}]   ;;  %s4706_s15 = inlined_call_operand.vmem [shape: f32[2,1,128], index: 15, kind: input, shape index: {}]   ;;  %s4707_s16 = inlined_call_operand.vmem [shape: f32[2,1,128], index: 16, kind: input, shape index: {}]   ;;  %s4708_s17 = inlined_call_operand.vmem [shape: f32[2,128,512], index: 17, kind: input, shape index: {}]   ;;  %s4709_s18 = inlined_call_operand.vmem [shape: f32[2,1,512], index: 18, kind: input, shape index: {}]   ;;  %s4710_s19 = inlined_call_operand.hbm [shape: f32[2,512,128], index: 19, kind: input, shape index: {}]   ;;  %s4711_s20 = inlined_call_operand.vmem [shape: f32[2,1,128], index: 20, kind: input, shape index: {}]   ;;  %s4712_s21 = inlined_call_operand.hbm [shape: f32[2,128], index: 21, kind: output, shape index: {}]  }
   0x1   :  { %4720 = sst [smem:[#allocation16_spill]] %s4691_s0 }
   0x2   :  { %4721 = sst [smem:[#allocation17_spill]] %s4692_s1 }
   0x3   :  { %4722 = sst [smem:[#allocation18_spill]] %s4693_s2 }
   0x4   :  { %4723 = sst [smem:[#allocation19_spill]] %s4694_s3 }
   0x5   :  { %4724 = sst [smem:[#allocation20_spill]] %s4695_s4 }
   0x6   :  { %4725 = sst [smem:[#allocation21_spill]] %s4696_s5 }
   0x7   :  { %4726 = sst [smem:[#allocation22_spill]] %s4697_s6 }
   0x8   :  { %4727 = sst [smem:[#allocation23_spill]] %s4698_s7 }
   0x9   :  { %4728 = sst [smem:[#allocation24_spill]] %s4699_s8 }
   0xa   :  { %4729 = sst [smem:[#allocation25_spill]] %s4702_s11 }
   0xb   :  { %4730 = sst [smem:[#allocation26_spill]] %s4704_s13 }
   0xc   :  { %4731 = sst [smem:[#allocation27_spill]] %s4710_s19 }
   0xd   :  { %4732 = sst [smem:[#allocation28_spill]] %s4711_s20 }
   0xe   :  { %4733 = sst [smem:[#allocation29_spill]] %s4712_s21 }
   0xf   :  { %26 = vsyncpa [#allocation5], 0 }
  0x10   :  { %28 = vsyncpa [#allocation5 + $0x1], 0 }
  0x11   :  { %29 = vsyncpa [#allocation8], 0 }
  0x12   :  { %31 = vsyncpa [#allocation8 + $0x1], 0 }
  0x13   :  { %32 = vsyncpa [#allocation6], 0  ;;  %s3404_s2 = smov 0   ;;  %s3406_s25 = smov 0  }
  0x14   :  { %s3408_s26 = smov 0   ;;  %s3410_s27 = smov 0  }
  0x15 LB: > { %4734 = sst [smem:[#allocation13_spill]] %s3279_s26  ;;  %s3423_s3 = sadd.s32 4294967295, %s3283_s27   ;;  %s3283_s27 = sphi %s3410_s27, %s4773_s27   ;;  %s3279_s26 = sphi %s3408_s26, %s4775_s26   ;;  %s3275_s25 = sphi %s3406_s25, %s4777_s25   ;;  %s3271_s2 = sphi %s3404_s2, %s4776_s2  }
  0x16   : > { %s3426_s28 = sadd.s32 1, %s3283_s27   ;;  %s286_s0 = sadd.s32 1, %s3279_s26 }
  0x17   : > { %4735 = sst [smem:[#allocation14_spill]] %s3426_s28  ;;  %s283_s29 = ssub.s32 %s3283_s27, %s3426_s28 }
  0x18   : > { %p284_p0 = scmp.eq.s32.totalorder %s283_s29, 0  ;;  %p293_p1 = scmp.ne.s32.totalorder %s3279_s26, %s3275_s25 }
  0x19   : > { %p294_p2 = scmp.eq.s32.totalorder %s3283_s27, 0  ;;  %p299_p3 = scmp.ne.s32.totalorder %s3275_s25, %s3271_s2 }
  0x1a   : > { %s3436_s4 = scalar_select %p284_p0, %s3279_s26, %s286_s0  }
  0x1b   : > { %p295_p4 = por %p294_p2, %p293_p1  ;;  %p300_p5 = scmp.eq.s32.totalorder %s3423_s3, 0 }
  0x1c   : > { %4736 = sst [smem:[#allocation15_spill]] %s3436_s4  ;;  %p3040_p6 = scmp.lt.s32.totalorder %s3283_s27, 2 }
  0x1d   : > { %p3440_p7 = por %p300_p5, %p299_p3  ;;  %s3445_s5 = sand.u32 1, %s3279_s26  }
  0x1e   : > { %s3021_s22 = smul.u32 384, %s3445_s5  ;;  %p3449_p8 = pnand %p3040_p6, %p295_p4 }
  0x1f   : > { %s3022_s23 = smul.u32 384, %s3283_s27  ;;  %s4739_s11 = sld [smem:[#allocation25_spill]] }
  0x20   : > { %s621_s0 = scalar_lea.vmem [#allocation4], %s3021_s22  ;;  %p2965_p9 = scmp.ge.s32.totalorder %s3283_s27, 1 }
  0x21   : > { %s629_s4 = sshll.u32 %s621_s0, 4  ;;  %s618_s26 = scalar_lea.sflag [#allocation5], %s3445_s5  ;;  %s630_s4 = int_to_ptr.vmem [resolvable:$true] %s629_s4 }
  0x22   : > { %p3157_p11 = pneg %p3449_p8 }
  0x25   : > { %s626_s29 = scalar_lea.hbm %s4739_s11, %s3022_s23  ;;  %s3160_s22 = scalar_lea.hbm %s4739_s11, 768 }
  0x26   : > { %s627_s28 = sshll.u32 %s626_s29, 4  ;;  %s628_s28 = int_to_ptr.hbm [resolvable:$true] %s627_s28 }
  0x27   : > { %s3153_s21 = sshra.s32 %s628_s28, 4  ;;  %s3154_s21 = int_to_ptr.hbm [resolvable:$true] %s3153_s21 }
  0x28   : > { %s3155_s8 = scalar_lea.hbm %s3154_s21, 384  ;;  %p3161_p0 = scmp.lt.s32.totalorder %s3154_s21, %s4739_s11 }
  0x29   : > { %p3156_p10 = scmp.ne.s32.totalorder %s3154_s21, %s3155_s8  ;;  %p3162_p1 = scmp.lt.s32.totalorder %s3160_s22, %s3155_s8 }
  0x2b   : > { %p3158_p12 = pnand %p3157_p11, %p3156_p10  ;;  %p3163_p2 = por %p3162_p1, %p3161_p0 }
  0x2d   : > { %p3159_p13 = pneg %p3158_p12 }
  0x2f   : > { %p3164_p3 = pnand %p3163_p2, %p3159_p13 }
  0x31   : > { %3167 = shalt.err (!%p3164_p3)
}
  0x32   : > { %s3285_s0 = smov 384   ;;  %s3286_s6 = smov 24  }
  0x33   : > { %3036 = dma.hbm_to_vmem [thread:$0]  (!%p3449_p8), %s628_s28, 6144, %s630_s4, %s618_s26, %s3285_s0, %s3285_s0, %s3286_s6  }
  0x34   : > { %p713_p4 = scmp.lt.s32.totalorder %s3283_s27, 3  ;;  %s2962_s24 = sshll.u32 %s3445_s5, 9 }
  0x35   : > { %s3018_s2 = sshll.u32 %s3283_s27, 9  ;;  %s4741_s19 = sld [smem:[#allocation27_spill]] }
  0x36   : > { %p3476_p5 = pnand %p2965_p9, %p713_p4  ;;  %s691_s29 = scalar_lea.vmem [#allocation7], %s2962_s24 }
  0x37   : > { %s699_s11 = sshll.u32 %s691_s29, 4  ;;  %s688_s20 = scalar_lea.sflag [#allocation8], %s3445_s5  ;;  %s700_s11 = int_to_ptr.vmem [resolvable:$true] %s699_s11 }
  0x3b   : > { %s696_s23 = scalar_lea.hbm %s4741_s19, %s3018_s2  ;;  %s3190_s4 = scalar_lea.hbm %s4741_s19, 1024 }
  0x3c   : > { %s697_s7 = sshll.u32 %s696_s23, 4  ;;  %s698_s7 = int_to_ptr.hbm [resolvable:$true] %s697_s7 }
  0x3d   : > { %s3183_s6 = sshra.s32 %s698_s7, 4  ;;  %s3184_s6 = int_to_ptr.hbm [resolvable:$true] %s3183_s6 }
  0x3e   : > { %s3185_s26 = scalar_lea.hbm %s3184_s6, 512  ;;  %p3191_p12 = scmp.lt.s32.totalorder %s3184_s6, %s4741_s19 }
  0x3f   : > { %p3186_p6 = scmp.ne.s32.totalorder %s3184_s6, %s3185_s26  ;;  %p3192_p13 = scmp.lt.s32.totalorder %s3190_s4, %s3185_s26 }
  0x41   : > { %p3188_p9 = pnand %p3186_p6, %p3157_p11  ;;  %p3193_p0 = por %p3192_p13, %p3191_p12 }
  0x43   : > { %p3189_p10 = pneg %p3188_p9 }
  0x45   : > { %p3194_p1 = pnand %p3193_p0, %p3189_p10 }
  0x47   : > { %3197 = shalt.err (!%p3194_p1)
}
  0x48   : > { %s3287_s5 = smov 128   ;;  %s3288_s24 = smov 8  }
  0x49   : > { %3039 = dma.hbm_to_vmem [thread:$0]  (!%p3449_p8), %s698_s7, 8192, %s700_s11, %s688_s20, %s3287_s5, %s3287_s5, %s3288_s24  }
  0x4a   : > { %717 = sbr.rel (%p3476_p5) target bundleno = 3786 (0xeca), region = 104  ;;  %s719_s21 = sand.u32 (!%p3476_p5), 1, %s3275_s25  }
  0x4b   : > { %s3023_s22 = smul.u32 (!%p3476_p5), 384, %s719_s21  ;;  %s720_s23 = scalar_lea.sflag (!%p3476_p5), [#allocation5], %s719_s21 }
  0x4d   : > { %s3498_s29 = scalar_lea.vmem (!%p3476_p5), [#allocation4], %s3023_s22 }
  0x4f   : > { %3258 = dma.done.wait (%p3440_p7), %s720_s23, 6144  }
  0x50   : > { %3260 = vsyncadd (%p3440_p7), %s720_s23, 4294961152  ;;  %s2966_s6 = sshll.u32 %s719_s21, 9  ;;  %s730_s26 = scalar_lea.sflag [#allocation8], %s719_s21 }
  0x51   : > { %s3504_s1 = scalar_lea.vmem [#allocation7], %s2966_s6 }
  0x52   : > { %3262 = dma.done.wait (%p3440_p7), %s730_s26, 8192  }
  0x53   : > { %3264 = vsyncadd (%p3440_p7), %s730_s26, 4294959104  ;;  %p829_p8 = scmp.lt.s32.totalorder %s3423_s3, 1  ;;  %s4742_s13 = sld [smem:[#allocation26_spill]] }
  0x54   : > { %s4743_s30 = sld [smem:[#allocation28_spill]]  ;;  %p2972_p7 = scmp.ne.s32.totalorder %s3423_s3, 0 }
  0x55   : > { %s3512_s7 = scalar_select %p829_p8, %s3423_s3, 1 }
  0x56   : > { %s4744_s19 = sld [smem:[#allocation17_spill]] (!%p2972_p7) }
  0x57   : > { %s3024_s4 = smul.u32 3, %s3512_s7  ;;  %s3019_s0 = sshll.u32 %s3512_s7, 7 }
  0x58   : > { %s3020_s2 = sshll.u32 %s3512_s7, 9  ;;  %s2971_s21 = sshll.u32 %s3512_s7, 2 }
  0x59   : > { %s3527_s24 = scalar_lea.vmem %s4742_s13, %s3019_s0  ;;  %s3536_s11 = scalar_lea.vmem %s4703_s12, %s3024_s4 }
  0x5a   : > { %s3550_s13 = scalar_lea.vmem %s4708_s17, %s3020_s2  ;;  %s3556_s4 = scalar_lea.vmem %s4709_s18, %s2971_s21 }
  0x5b   : > { %s864_s20 = scalar_lea.vmem %s4743_s30, %s3512_s7  ;;  %868 = sbr.rel (%p2972_p7) target bundleno = 294 (0x126), region = 116 }
  0x5c   : > { %s4745_s2 = sld [smem:[#allocation16_spill]] (!%p2972_p7) }
  0x5d   : > { %s4747_s6 = sld [smem:[#allocation19_spill]] (!%p2972_p7) }
  0x5e   : > { %s4748_s28 = sld [smem:[#allocation20_spill]] (!%p2972_p7) }
  0x5f   : > { %s4749_s0 = sld [smem:[#allocation18_spill]] (!%p2972_p7) }
  0x60   : > { %v890_v0 = vld [vmem:[%s4744_s19 + $0x78] sm:$0xff]  ;;  %v889_v1 = vld [vmem:[%s4744_s19 + $0x70] sm:$0xff]  ;;  %v888_v4 = vld [vmem:[%s4744_s19 + $0x68] sm:$0xff] }
  0x61   : > { %v906_v2 = vld [vmem:[%s4744_s19 + $0xf8] sm:$0xff]  ;;  %975 = vmatpush.msra.mxu0 %v890_v0  ;;  %v905_v3 = vld [vmem:[%s4744_s19 + $0xf0] sm:$0xff]  ;;  %v904_v5 = vld [vmem:[%s4744_s19 + $0xe8] sm:$0xff] }
  0x62   : > { %995 = vmatpush.msra.mxu1 %v906_v2  ;;  %v887_v6 = vld [vmem:[%s4744_s19 + $0x60] sm:$0xff]  ;;  %v886_v8 = vld [vmem:[%s4744_s19 + $0x58] sm:$0xff]  ;;  %v885_v10 = vld [vmem:[%s4744_s19 + $0x50] sm:$0xff]  ;;  %s4746_s5 = smov %s4745_s2 }
  0x63   : > { %976 = vmatpush.msra.mxu0 %v889_v1  ;;  %v903_v7 = vld [vmem:[%s4744_s19 + $0xe0] sm:$0xff]  ;;  %v902_v9 = vld [vmem:[%s4744_s19 + $0xd8] sm:$0xff]  ;;  %v901_v12 = vld [vmem:[%s4744_s19 + $0xd0] sm:$0xff] }
  0x64   : > { %996 = vmatpush.msra.mxu1 %v905_v3  ;;  %v922_v11 = vld [vmem:[%s4744_s19 + $0x178] sm:$0xff]  ;;  %v921_v13 = vld [vmem:[%s4744_s19 + $0x170] sm:$0xff]  ;;  %v920_v15 = vld [vmem:[%s4744_s19 + $0x168] sm:$0xff] }
  0x65   : > { %977 = vmatpush.msra.mxu0 %v888_v4  ;;  %1015 = vmatpush.msra.mxu2 %v922_v11  ;;  %v938_v14 = vld [vmem:[%s4744_s19 + $0x1f8] sm:$0xff]  ;;  %v937_v16 = vld [vmem:[%s4744_s19 + $0x1f0] sm:$0xff]  ;;  %v884_v17 = vld [vmem:[%s4744_s19 + $0x48] sm:$0xff] }
  0x66   : > { %997 = vmatpush.msra.mxu1 %v904_v5  ;;  %v900_v18 = vld [vmem:[%s4744_s19 + $0xc8] sm:$0xff]  ;;  %1035 = vmatpush.msra.mxu3 %v938_v14  ;;  %v919_v19 = vld [vmem:[%s4744_s19 + $0x160] sm:$0xff]  ;;  %v918_v23 = vld [vmem:[%s4744_s19 + $0x158] sm:$0xff] }
  0x67   : > { %978 = vmatpush.msra.mxu0 %v887_v6  ;;  %1016 = vmatpush.msra.mxu2 %v921_v13  ;;  %v936_v20 = vld [vmem:[%s4744_s19 + $0x1e8] sm:$0xff]  ;;  %v883_v21 = vld [vmem:[%s4744_s19 + $0x40] sm:$0xff]  ;;  %v882_v25 = vld [vmem:[%s4744_s19 + $0x38] sm:$0xff] }
  0x68   : > { %998 = vmatpush.msra.mxu1 %v903_v7  ;;  %v899_v22 = vld [vmem:[%s4744_s19 + $0xc0] sm:$0xff]  ;;  %1036 = vmatpush.msra.mxu3 %v937_v16  ;;  %v898_v26 = vld [vmem:[%s4744_s19 + $0xb8] sm:$0xff]  ;;  %v917_v27 = vld [vmem:[%s4744_s19 + $0x150] sm:$0xff] }
  0x69   : > { %979 = vmatpush.msra.mxu0 %v886_v8  ;;  %1017 = vmatpush.msra.mxu2 %v920_v15  ;;  %v935_v24 = vld [vmem:[%s4744_s19 + $0x1e0] sm:$0xff]  ;;  %v934_v28 = vld [vmem:[%s4744_s19 + $0x1d8] sm:$0xff]  ;;  %v881_v29 = vld [vmem:[%s4744_s19 + $0x30] sm:$0xff] }
  0x6a   : > { %999 = vmatpush.msra.mxu1 %v902_v9  ;;  %1037 = vmatpush.msra.mxu3 %v936_v20  ;;  %v897_v30 = vld [vmem:[%s4744_s19 + $0xb0] sm:$0xff]  ;;  %v916_v31 = vld [vmem:[%s4744_s19 + $0x148] sm:$0xff]  ;;  %v915_v35 = vld [vmem:[%s4744_s19 + $0x140] sm:$0xff] }
  0x6b   : > { %980 = vmatpush.msra.mxu0 %v885_v10  ;;  %1018 = vmatpush.msra.mxu2 %v919_v19  ;;  %v933_v32 = vld [vmem:[%s4744_s19 + $0x1d0] sm:$0xff]  ;;  %v880_v33 = vld [vmem:[%s4744_s19 + $0x28] sm:$0xff]  ;;  %v879_v37 = vld [vmem:[%s4744_s19 + $0x20] sm:$0xff] }
  0x6c   : > { %1000 = vmatpush.msra.mxu1 %v901_v12  ;;  %1038 = vmatpush.msra.mxu3 %v935_v24  ;;  %v896_v34 = vld [vmem:[%s4744_s19 + $0xa8] sm:$0xff]  ;;  %v895_v38 = vld [vmem:[%s4744_s19 + $0xa0] sm:$0xff]  ;;  %v914_v39 = vld [vmem:[%s4744_s19 + $0x138] sm:$0xff] }
  0x6d   : > { %981 = vmatpush.msra.mxu0 %v884_v17  ;;  %1019 = vmatpush.msra.mxu2 %v918_v23  ;;  %v932_v36 = vld [vmem:[%s4744_s19 + $0x1c8] sm:$0xff]  ;;  %v931_v40 = vld [vmem:[%s4744_s19 + $0x1c0] sm:$0xff]  ;;  %v878_v41 = vld [vmem:[%s4744_s19 + $0x18] sm:$0xff] }
  0x6e   : > { %1001 = vmatpush.msra.mxu1 %v900_v18  ;;  %1039 = vmatpush.msra.mxu3 %v934_v28  ;;  %v894_v42 = vld [vmem:[%s4744_s19 + $0x98] sm:$0xff]  ;;  %v913_v43 = vld [vmem:[%s4744_s19 + $0x130] sm:$0xff]  ;;  %v912_v47 = vld [vmem:[%s4744_s19 + $0x128] sm:$0xff] }
  0x6f   : > { %982 = vmatpush.msra.mxu0 %v883_v21  ;;  %1020 = vmatpush.msra.mxu2 %v917_v27  ;;  %v930_v44 = vld [vmem:[%s4744_s19 + $0x1b8] sm:$0xff]  ;;  %v877_v45 = vld [vmem:[%s4744_s19 + $0x10] sm:$0xff]  ;;  %v876_v49 = vld [vmem:[%s4744_s19 + $0x8] sm:$0xff] }
  0x70   : > { %1002 = vmatpush.msra.mxu1 %v899_v22  ;;  %1040 = vmatpush.msra.mxu3 %v933_v32  ;;  %v893_v46 = vld [vmem:[%s4744_s19 + $0x90] sm:$0xff]  ;;  %v892_v50 = vld [vmem:[%s4744_s19 + $0x88] sm:$0xff]  ;;  %v911_v51 = vld [vmem:[%s4744_s19 + $0x120] sm:$0xff] }
  0x71   : > { %983 = vmatpush.msra.mxu0 %v882_v25  ;;  %1021 = vmatpush.msra.mxu2 %v916_v31  ;;  %v929_v48 = vld [vmem:[%s4744_s19 + $0x1b0] sm:$0xff]  ;;  %v928_v52 = vld [vmem:[%s4744_s19 + $0x1a8] sm:$0xff]  ;;  %v875_v53 = vld [vmem:[%s4744_s19] sm:$0xff] }
  0x72   : > { %1003 = vmatpush.msra.mxu1 %v898_v26  ;;  %1041 = vmatpush.msra.mxu3 %v932_v36  ;;  %v891_v54 = vld [vmem:[%s4744_s19 + $0x80] sm:$0xff]  ;;  %v954_v55 = vld [vmem:[%s4744_s19 + $0x278] sm:$0xff]  ;;  %v953_v59 = vld [vmem:[%s4744_s19 + $0x270] sm:$0xff] }
  0x73   : > { %984 = vmatpush.msra.mxu0 %v881_v29  ;;  %1022 = vmatpush.msra.mxu2 %v915_v35  ;;  %v970_v56 = vld [vmem:[%s4744_s19 + $0x2f8] sm:$0xff]  ;;  %v927_v58 = vld [vmem:[%s4744_s19 + $0x1a0] sm:$0xff]  ;;  %v969_v60 = vld [vmem:[%s4744_s19 + $0x2f0] sm:$0xff] }
  0x74   : > { %1004 = vmatpush.msra.mxu1 %v897_v30  ;;  %1042 = vmatpush.msra.mxu3 %v931_v40  ;;  %v910_v57 = vld [vmem:[%s4744_s19 + $0x118] sm:$0xff]  ;;  %v909_v61 = vld [vmem:[%s4744_s19 + $0x110] sm:$0xff]  ;;  %v952_v63 = vld [vmem:[%s4744_s19 + $0x268] sm:$0xff] }
  0x75   : > { %985 = vmatpush.msra.mxu0 %v880_v33  ;;  %1023 = vmatpush.msra.mxu2 %v914_v39  ;;  %v926_v62 = vld [vmem:[%s4744_s19 + $0x198] sm:$0xff]  ;;  %v968_v0 = vld [vmem:[%s4744_s19 + $0x2e8] sm:$0xff]  ;;  %v925_v2 = vld [vmem:[%s4744_s19 + $0x190] sm:$0xff] }
  0x76   : > { %1005 = vmatpush.msra.mxu1 %v896_v34  ;;  %1043 = vmatpush.msra.mxu3 %v930_v44  ;;  %v908_v1 = vld [vmem:[%s4744_s19 + $0x108] sm:$0xff]  ;;  %v951_v3 = vld [vmem:[%s4744_s19 + $0x260] sm:$0xff]  ;;  %v950_v7 = vld [vmem:[%s4744_s19 + $0x258] sm:$0xff] }
  0x77   : > { %986 = vmatpush.msra.mxu0 %v879_v37  ;;  %1024 = vmatpush.msra.mxu2 %v913_v43  ;;  %v967_v4 = vld [vmem:[%s4744_s19 + $0x2e0] sm:$0xff]  ;;  %v924_v6 = vld [vmem:[%s4744_s19 + $0x188] sm:$0xff]  ;;  %v966_v8 = vld [vmem:[%s4744_s19 + $0x2d8] sm:$0xff] }
  0x78   : > { %1006 = vmatpush.msra.mxu1 %v895_v38  ;;  %1044 = vmatpush.msra.mxu3 %v929_v48  ;;  %v907_v5 = vld [vmem:[%s4744_s19 + $0x100] sm:$0xff]  ;;  %v871_v9 = vld [vmem:[%s4745_s2 + $0x10] sm:$0xff]  ;;  %v872_v14 = vld [vmem:[%s4746_s5 + $0x18] sm:$0xff] }
  0x79   : > { %987 = vmatpush.msra.mxu0 %v878_v41  ;;  %1025 = vmatpush.msra.mxu2 %v912_v47  ;;  %v923_v10 = vld [vmem:[%s4744_s19 + $0x180] sm:$0xff]  ;;  %v949_v11 = vld [vmem:[%s4744_s19 + $0x250] sm:$0xff]  ;;  %v948_v15 = vld [vmem:[%s4744_s19 + $0x248] sm:$0xff] }
  0x7a   : > { %1007 = vmatpush.msra.mxu1 %v894_v42  ;;  %1045 = vmatpush.msra.mxu3 %v928_v52  ;;  %v965_v12 = vld [vmem:[%s4744_s19 + $0x2d0] sm:$0xff]  ;;  %v869_v13 = vld [vmem:[%s4746_s5] sm:$0xff]  ;;  %v964_v16 = vld [vmem:[%s4744_s19 + $0x2c8] sm:$0xff] }
  0x7b   : > { %988 = vmatpush.msra.mxu0 %v877_v45  ;;  %1026 = vmatpush.msra.mxu2 %v911_v51  ;;  %v870_v17 = vld [vmem:[%s4746_s5 + $0x8] sm:$0xff]  ;;  %v947_v18 = vld [vmem:[%s4744_s19 + $0x240] sm:$0xff]  ;;  %v946_v20 = vld [vmem:[%s4744_s19 + $0x238] sm:$0xff] }
  0x7c   : > { %1008 = vmatpush.msra.mxu1 %v893_v46  ;;  %1046 = vmatpush.msra.mxu3 %v927_v58  ;;  %v963_v19 = vld [vmem:[%s4744_s19 + $0x2c0] sm:$0xff]  ;;  %v962_v21 = vld [vmem:[%s4744_s19 + $0x2b8] sm:$0xff]  ;;  %v945_v22 = vld [vmem:[%s4744_s19 + $0x230] sm:$0xff] }
  0x7d   : > { %989 = vmatpush.msra.mxu0 %v876_v49  ;;  %1027 = vmatpush.msra.mxu2 %v910_v57  ;;  %v961_v23 = vld [vmem:[%s4744_s19 + $0x2b0] sm:$0xff]  ;;  %v944_v24 = vld [vmem:[%s4744_s19 + $0x228] sm:$0xff]  ;;  %v943_v26 = vld [vmem:[%s4744_s19 + $0x220] sm:$0xff] }
  0x7e   : > { %1009 = vmatpush.msra.mxu1 %v892_v50  ;;  %1047 = vmatpush.msra.mxu3 %v926_v62  ;;  %v960_v25 = vld [vmem:[%s4744_s19 + $0x2a8] sm:$0xff]  ;;  %v959_v27 = vld [vmem:[%s4744_s19 + $0x2a0] sm:$0xff]  ;;  %v942_v28 = vld [vmem:[%s4744_s19 + $0x218] sm:$0xff] }
  0x7f   : > { %990 = vmatpush.msra.mxu0 %v875_v53  ;;  %1028 = vmatpush.msra.mxu2 %v909_v61  ;;  %v958_v29 = vld [vmem:[%s4744_s19 + $0x298] sm:$0xff]  ;;  %v941_v30 = vld [vmem:[%s4744_s19 + $0x210] sm:$0xff]  ;;  %v940_v32 = vld [vmem:[%s4744_s19 + $0x208] sm:$0xff] }
  0x80   : > { %1010 = vmatpush.msra.mxu1 %v891_v54  ;;  %1048 = vmatpush.msra.mxu3 %v925_v2  ;;  %v957_v31 = vld [vmem:[%s4744_s19 + $0x290] sm:$0xff]  ;;  %v956_v33 = vld [vmem:[%s4744_s19 + $0x288] sm:$0xff]  ;;  %v939_v34 = vld [vmem:[%s4744_s19 + $0x200] sm:$0xff] }
  0x81   : > { %1055 = vmatpush.msrb.mxu0 %v954_v55  ;;  %1029 = vmatpush.msra.mxu2 %v908_v1  ;;  %v955_v35 = vld [vmem:[%s4744_s19 + $0x280] sm:$0xff]  ;;  %v874_v37 = vld [vmem:[%s4746_s5 + $0x28] sm:$0xff] }
  0x82   : > { %1075 = vmatpush.msrb.mxu1 %v970_v56  ;;  %1049 = vmatpush.msra.mxu3 %v924_v6  ;;  %v873_v36 = vld [vmem:[%s4746_s5 + $0x20] sm:$0xff] }
  0x83   : > { %1056 = vmatpush.msrb.mxu0 %v953_v59  ;;  %1030 = vmatpush.msra.mxu2 %v907_v5  ;;  %v1095_v38 = vld [vmem:[%s4747_s6] sm:$0x1] }
  0x84   : > { %1076 = vmatpush.msrb.mxu1 %v969_v60  ;;  %1031 = vmatmul.f32.vlgmr.msra.gmra.mxu2 %v871_v9  ;;  %v1096_v39 = vld [vmem:[%s4748_s28] sm:$0x1f] }
  0x85   : > { %1057 = vmatpush.msrb.mxu0 %v952_v63  ;;  %1050 = vmatpush.msra.mxu3 %v923_v10  ;;  %v1097_v40 = vadd.f32 %v1096_v39, %v1095_v38  ;;  %v3084_v41 = vld [vmem:[%s4749_s0] ss:$0 sm:$0xff]  ;;  %v1100_v53 = vrot.slane %v1096_v39, 1  ;;  %v1105_v54 = vrot.slane %v1096_v39, 5 }
  0x86   : > { %1077 = vmatpush.msrb.mxu1 %v968_v0  ;;  %991 = vmatmul.f32.vlgmr.msra.gmra.mxu0 %v869_v13 }
  0x87   : > { %1058 = vmatpush.msrb.mxu0 %v951_v3  ;;  %1051 = vmatmul.f32.vlgmr.msra.gmra.mxu3 %v872_v14  ;;  %1098 = vst [vmem:[#allocation2] sm:$0x1] %v1097_v40 }
  0x88   : > { %1078 = vmatpush.msrb.mxu1 %v967_v4  ;;  %1104 = vst [vmem:[#allocation2 + $0x5] sm:$0x1] %v1097_v40 }
  0x89   : > { %1059 = vmatpush.msrb.mxu0 %v950_v7  ;;  %1011 = vmatmul.f32.vlgmr.msra.gmra.mxu1 %v870_v17 }
  0x8a   : > { %1079 = vmatpush.msrb.mxu1 %v966_v8 }
  0x8b   : > { %1060 = vmatpush.msrb.mxu0 %v949_v11 }
  0x8c   : > { %1080 = vmatpush.msrb.mxu1 %v965_v12 }
  0x8d   : > { %1061 = vmatpush.msrb.mxu0 %v948_v15 }
  0x8e   : > { %1081 = vmatpush.msrb.mxu1 %v964_v16 }
  0x8f   : > { %1062 = vmatpush.msrb.mxu0 %v947_v18 }
  0x90   : > { %1082 = vmatpush.msrb.mxu1 %v963_v19 }
  0x91   : > { %1063 = vmatpush.msrb.mxu0 %v946_v20 }
  0x92   : > { %1083 = vmatpush.msrb.mxu1 %v962_v21 }
  0x93   : > { %1064 = vmatpush.msrb.mxu0 %v945_v22 }
  0x94   : > { %1084 = vmatpush.msrb.mxu1 %v961_v23 }
  0x95   : > { %1065 = vmatpush.msrb.mxu0 %v944_v24 }
  0x96   : > { %1085 = vmatpush.msrb.mxu1 %v960_v25 }
  0x97   : > { %1066 = vmatpush.msrb.mxu0 %v943_v26 }
  0x98   : > { %1086 = vmatpush.msrb.mxu1 %v959_v27 }
  0x99   : > { %1067 = vmatpush.msrb.mxu0 %v942_v28 }
  0x9a   : > { %1087 = vmatpush.msrb.mxu1 %v958_v29 }
  0x9b   : > { %1068 = vmatpush.msrb.mxu0 %v941_v30 }
  0x9c   : > { %1088 = vmatpush.msrb.mxu1 %v957_v31 }
  0x9d   : > { %1069 = vmatpush.msrb.mxu0 %v940_v32 }
  0x9e   : > { %1089 = vmatpush.msrb.mxu1 %v956_v33 }
  0x9f   : > { %1070 = vmatpush.msrb.mxu0 %v939_v34 }
  0xa0   : > { %1090 = vmatpush.msrb.mxu1 %v955_v35  ;;  %1071 = vmatmul.f32.vlgmr.msrb.gmra.mxu0 %v873_v36 }
  0xa1   : > { %1091 = vmatmul.f32.vlgmr.msrb.gmra.mxu1 %v874_v37 }
 0x103   : > { %v992_v42 = vpop.f32.mrf.mxu0 }
 0x104   : > { %v993_v43 = vadd.f32 %v3084_v41, %v992_v42 }
 0x106   : > { %v1012_v44 = vpop.f32.mrf.mxu1 }
 0x107   : > { %v1013_v45 = vadd.f32 %v1012_v44, %v993_v43  ;;  %v1032_v46 = vpop.f32.mrf.mxu2 }
 0x109   : > { %v1033_v47 = vadd.f32 %v1032_v46, %v1013_v45 }
 0x10a   : > { %v1052_v48 = vpop.f32.mrf.mxu3 }
 0x10b   : > { %v1053_v49 = vadd.f32 %v1052_v48, %v1033_v47 }
 0x11d   : > { %v1072_v50 = vpop.f32.mrf.mxu0 }
 0x11e   : > { %v1092_v51 = vpop.f32.mrf.mxu1  ;;  %v1073_v52 = vadd.f32 %v1072_v50, %v1053_v49 }
 0x120   : > { %v1093_v55 = vadd.f32 %v1092_v51, %v1073_v52 }
 0x122   : > { %v1102_v56 = vadd.f32 %v1100_v53, %v1093_v55  ;;  %v1107_v57 = vadd.f32 %v1105_v54, %v1093_v55 }
 0x124   : > { %1103 = vst [vmem:[#allocation2 + $0x1] sm:$0xf] %v1102_v56 }
 0x125   : > { %1108 = vst [vmem:[#allocation2 + $0x2] sm:$0xf0] %v1107_v57 }
 0x126 PF: > { %v3289_v59 = vmov 128.0   ;;  %v1218_v60 = vld [vmem:[%s3498_s29 + $0x168] sm:$0xff]  ;;  %v1219_v61 = vld [vmem:[%s3498_s29 + $0x170] sm:$0xff]  ;;  %v1220_v62 = vld [vmem:[%s3498_s29 + $0x178] sm:$0xff]  ;;  %s4750_s23 = scalar_lea.vmem %s4700_s9, %s3512_s7  ;;  %s4751_s6 = scalar_lea.vmem %s4701_s10, %s3512_s7  ;;  %vm1298_vm4 = vcmask 261120   ;;  %vm1342_vm5 = vcmask 1044480  }
 0x127   : > { %3091 = vrcp.f32 %v3289_v59  ;;  %1229 = vmatpush.msra.mxu0 %v1218_v60  ;;  %1252 = vmatpush.msra.mxu1 %v1219_v61  ;;  %v1215_v63 = vld [vmem:[%s3498_s29 + $0x150] sm:$0xff]  ;;  %v1216_v0 = vld [vmem:[%s3498_s29 + $0x158] sm:$0xff]  ;;  %v1217_v1 = vld [vmem:[%s3498_s29 + $0x160] sm:$0xff]  ;;  %s3290_s26 = smov 96   ;;  %vm1326_vm6 = vcmask 36864   ;;  %vm1338_vm7 = vcmask 39936   ;;  %s4753_s0 = scalar_lea.vmem %s4706_s15, %s3512_s7 }
 0x128   : > { %1275 = vmatpush.msra.mxu2 %v1220_v62  ;;  %v1212_v12 = vld [vmem:[%s3498_s29 + $0x138] sm:$0xff]  ;;  %v1213_v13 = vld [vmem:[%s3498_s29 + $0x140] sm:$0xff]  ;;  %v1214_v14 = vld [vmem:[%s3498_s29 + $0x148] sm:$0xff]  ;;  %vm1366_vm8 = vcmask 258048   ;;  %s3292_s30 = smov 32   ;;  %vm1115_vm9 = vcmask 1041408  }
 0x129   : > { %1230 = vmatpush.msra.mxu0 %v1215_v63  ;;  %1253 = vmatpush.msra.mxu1 %v1216_v0  ;;  %v1209_v15 = vld [vmem:[%s3498_s29 + $0x120] sm:$0xff]  ;;  %v1210_v16 = vld [vmem:[%s3498_s29 + $0x128] sm:$0xff]  ;;  %v1211_v17 = vld [vmem:[%s3498_s29 + $0x130] sm:$0xff]  ;;  %vm1588_vm13 = vcmask 1042432   ;;  %vm1439_vm14 = vcmask 520448   ;;  %vm1512_vm15 = vcmask 782848  }
 0x12a   : > { %1276 = vmatpush.msra.mxu2 %v1217_v1  ;;  %v1206_v18 = vld [vmem:[%s3498_s29 + $0x108] sm:$0xff]  ;;  %v1207_v19 = vld [vmem:[%s3498_s29 + $0x110] sm:$0xff]  ;;  %v1208_v20 = vld [vmem:[%s3498_s29 + $0x118] sm:$0xff]  ;;  %p3013_p11 = scmp.ne.s32.totalorder %s3423_s3, 1 }
 0x12b   : > { %1231 = vmatpush.msra.mxu0 %v1212_v12  ;;  %1254 = vmatpush.msra.mxu1 %v1213_v13  ;;  %v1203_v21 = vld [vmem:[%s3498_s29 + $0xf0] sm:$0xff]  ;;  %v1204_v22 = vld [vmem:[%s3498_s29 + $0xf8] sm:$0xff]  ;;  %v1205_v23 = vld [vmem:[%s3498_s29 + $0x100] sm:$0xff]  ;;  %s4768_s22 = sld [smem:[#allocation23_spill]] (!%p3013_p11) }
 0x12c   : > { %v3878_v58 = vld [vmem:[#allocation2] sm:$0xff]  ;;  %1277 = vmatpush.msra.mxu2 %v1214_v14  ;;  %v1200_v24 = vld [vmem:[%s3498_s29 + $0xd8] sm:$0xff]  ;;  %v1202_v26 = vld [vmem:[%s3498_s29 + $0xe8] sm:$0xff] }
 0x12d   : > { %1113 = vadd.xlane.f32.xlu0 %v3878_v58  ;;  %v3092_v2 = vpop.eup %3091  ;;  %1232 = vmatpush.msra.mxu0 %v1209_v15  ;;  %v1201_v25 = vld [vmem:[%s3498_s29 + $0xe0] sm:$0xff]  ;;  %v1198_v28 = vld [vmem:[%s3498_s29 + $0xc8] sm:$0xff]  ;;  %v1199_v29 = vld [vmem:[%s3498_s29 + $0xd0] sm:$0xff] }
 0x12e   : > { %v1120_v3 = vmul.f32 128.0, %v3092_v2  ;;  %vm1124_vm0 = vweird.f32 %v3092_v2  ;;  %1255 = vmatpush.msra.mxu1 %v1210_v16  ;;  %1278 = vmatpush.msra.mxu2 %v1211_v17  ;;  %v1197_v27 = vld [vmem:[%s3498_s29 + $0xc0] sm:$0xff]  ;;  %v1194_v30 = vld [vmem:[%s3498_s29 + $0xa8] sm:$0xff]  ;;  %v1195_v31 = vld [vmem:[%s3498_s29 + $0xb0] sm:$0xff] }
 0x12f   : > { %1233 = vmatpush.msra.mxu0 %v1206_v18  ;;  %v1196_v32 = vld [vmem:[%s3498_s29 + $0xb8] sm:$0xff]  ;;  %v1191_v33 = vld [vmem:[%s3498_s29 + $0x90] sm:$0xff]  ;;  %v1193_v35 = vld [vmem:[%s3498_s29 + $0xa0] sm:$0xff] }
 0x130   : > { %v1121_v4 = vsub.f32 1.0, %v1120_v3  ;;  %1256 = vmatpush.msra.mxu1 %v1207_v19  ;;  %1279 = vmatpush.msra.mxu2 %v1208_v20  ;;  %v1192_v34 = vld [vmem:[%s3498_s29 + $0x98] sm:$0xff]  ;;  %v1189_v37 = vld [vmem:[%s3498_s29 + $0x80] sm:$0xff]  ;;  %v1190_v38 = vld [vmem:[%s3498_s29 + $0x88] sm:$0xff] }
 0x131   : > { %1234 = vmatpush.msra.mxu0 %v1203_v21  ;;  %v1188_v36 = vld [vmem:[%s3498_s29 + $0x78] sm:$0xff]  ;;  %v1185_v39 = vld [vmem:[%s3498_s29 + $0x60] sm:$0xff]  ;;  %v1186_v40 = vld [vmem:[%s3498_s29 + $0x68] sm:$0xff] }
 0x132   : > { %v1122_v5 = vmul.f32 %v3092_v2, %v1121_v4  ;;  %1257 = vmatpush.msra.mxu1 %v1204_v22  ;;  %1280 = vmatpush.msra.mxu2 %v1205_v23  ;;  %v1187_v41 = vld [vmem:[%s3498_s29 + $0x70] sm:$0xff]  ;;  %v1182_v42 = vld [vmem:[%s3498_s29 + $0x48] sm:$0xff]  ;;  %v1184_v44 = vld [vmem:[%s3498_s29 + $0x58] sm:$0xff] }
 0x133   : > { %1235 = vmatpush.msra.mxu0 %v1200_v24  ;;  %v1183_v43 = vld [vmem:[%s3498_s29 + $0x50] sm:$0xff]  ;;  %v1180_v46 = vld [vmem:[%s3498_s29 + $0x38] sm:$0xff]  ;;  %v1181_v47 = vld [vmem:[%s3498_s29 + $0x40] sm:$0xff] }
 0x134   : > { %v1123_v6 = vadd.f32 %v3092_v2, %v1122_v5  ;;  %1258 = vmatpush.msra.mxu1 %v1201_v25  ;;  %1281 = vmatpush.msra.mxu2 %v1202_v26  ;;  %v1179_v45 = vld [vmem:[%s3498_s29 + $0x30] sm:$0xff]  ;;  %v1176_v48 = vld [vmem:[%s3498_s29 + $0x18] sm:$0xff]  ;;  %v1177_v49 = vld [vmem:[%s3498_s29 + $0x20] sm:$0xff] }
 0x135   : > { %1236 = vmatpush.msra.mxu0 %v1197_v27  ;;  %v1178_v50 = vld [vmem:[%s3498_s29 + $0x28] sm:$0xff]  ;;  %v1173_v51 = vld [vmem:[%s3498_s29] sm:$0xff]  ;;  %v1175_v53 = vld [vmem:[%s3498_s29 + $0x10] sm:$0xff] }
 0x136   : > { %v3887_v7 = vsel %vm1124_vm0, %v3092_v2, %v1123_v6  ;;  %1259 = vmatpush.msra.mxu1 %v1198_v28  ;;  %1282 = vmatpush.msra.mxu2 %v1199_v29  ;;  %v1174_v52 = vld [vmem:[%s3498_s29 + $0x8] sm:$0xff]  ;;  %v3943_v0 = vld [vmem:[%s4750_s23] ss:$0 sm:$0xff]  ;;  %vm1585_vm0 = vcmask 1045248   ;;  %s4754_s23 = scalar_lea.vmem %s4707_s16, %s3512_s7 }
 0x137   : > { %1237 = vmatpush.msra.mxu0 %v1194_v30  ;;  %v3951_v3 = vld [vmem:[%s4751_s6] ss:$0 sm:$0xff] }
 0x138   : > { %1260 = vmatpush.msra.mxu1 %v1195_v31  ;;  %1283 = vmatpush.msra.mxu2 %v1196_v32  ;;  %v3956_v6 = vld [vmem:[%s3536_s11] sm:$0x7]  ;;  %s3291_s11 = smov 64  }
 0x139   : > { %1238 = vmatpush.msra.mxu0 %v1191_v33  ;;  %v1225_v14 = vperm.slane %v3956_v6, 2 }
 0x13a   : > { %1261 = vmatpush.msra.mxu1 %v1192_v34  ;;  %1284 = vmatpush.msra.mxu2 %v1193_v35 }
 0x13b   : > { %1239 = vmatpush.msra.mxu0 %v1188_v36 }
 0x13c   : > { %1262 = vmatpush.msra.mxu1 %v1189_v37  ;;  %1285 = vmatpush.msra.mxu2 %v1190_v38 }
 0x13d   : > { %1240 = vmatpush.msra.mxu0 %v1185_v39 }
 0x13e   : > { %1263 = vmatpush.msra.mxu1 %v1186_v40  ;;  %1286 = vmatpush.msra.mxu2 %v1187_v41  ;;  %v4002_v40 = vld [vmem:[#allocation2 + $0x8] sm:$0x3] }
 0x13f   : > { %1241 = vmatpush.msra.mxu0 %v1182_v42  ;;  %v1116_v41 = vsel %vm1115_vm9, %v4002_v40, 0.0 }
 0x140   : > { %1264 = vmatpush.msra.mxu1 %v1183_v43  ;;  %1287 = vmatpush.msra.mxu2 %v1184_v44 }
 0x141   : > { %1242 = vmatpush.msra.mxu0 %v1179_v45 }
 0x142   : > { %1265 = vmatpush.msra.mxu1 %v1180_v46  ;;  %1288 = vmatpush.msra.mxu2 %v1181_v47 }
 0x143   : > { %1243 = vmatpush.msra.mxu0 %v1176_v48 }
 0x144   : > { %1266 = vmatpush.msra.mxu1 %v1177_v49  ;;  %1289 = vmatpush.msra.mxu2 %v1178_v50 }
 0x145   : > { %1244 = vmatpush.msra.mxu0 %v1173_v51 }
 0x146   : > { %1267 = vmatpush.msra.mxu1 %v1174_v52  ;;  %1290 = vmatpush.msra.mxu2 %v1175_v53 }
 0x1a0   : > { %v1114_v8 = vpop.xlane.xlu0 %1113 }
 0x1a1   : > { %v1126_v9 = vmul.f32 %v3887_v7, %v1114_v8  ;;  %v1224_v8 = vperm.slane %v3956_v6, 1 }
 0x1a3   : > { %v3891_v10 = vsub.f32 %v3878_v58, %v1126_v9  ;;  %v1223_v9 = vperm.slane %v3956_v6, 0 }
 0x1a5   : > { %v1130_v11 = vmul.f32 %v3891_v10, %v3891_v10 }
 0x1a7   : > { %1132 = vadd.xlane.f32.xlu0 %v1130_v11 }
 0x21a   : > { %v1133_v54 = vpop.xlane.xlu0 %1132 }
 0x21b   : > { %v1137_v55 = vmul.f32 %v1133_v54, %v3887_v7 }
 0x21d   : > { %v1139_v56 = vadd.f32 1e-12, %v1137_v55 }
 0x21f   : > { %3093 = vrsqrt.f32 %v1139_v56  ;;  %vm1147_vm2 = vweird.f32 %v1139_v56 }
 0x225   : > { %v3094_v57 = vpop.eup %3093 }
 0x226   : > { %v1142_v59 = vmul.f32 %v3094_v57, %v1139_v56  ;;  %vm1148_vm1 = vweird.f32 %v3094_v57 }
 0x227   : > { %vm1149_vm3 = vmor %vm1147_vm2, %vm1148_vm1 }
 0x228   : > { %v1143_v60 = vmul.f32 %v3094_v57, %v1142_v59 }
 0x22a   : > { %v1144_v61 = vmul.f32 0.5, %v1143_v60 }
 0x22c   : > { %v1145_v62 = vsub.f32 1.5, %v1144_v61 }
 0x22e   : > { %v1146_v63 = vmul.f32 %v3094_v57, %v1145_v62 }
 0x230   : > { %v1150_v1 = vsel %vm1149_vm3, %v3094_v57, %v1146_v63 }
 0x231   : > { %v1161_v2 = vmul.f32 %v1150_v1, %v3891_v10 }
 0x233   : > { %v1166_v4 = vmul.f32 %v3943_v0, %v1161_v2 }
 0x235   : > { %v1171_v5 = vadd.f32 %v3951_v3, %v1166_v4 }
 0x237   : > { %1245 = vmatmul.f32.vlgmr.msra.gmra.mxu0 %v1171_v5  ;;  %1268 = vmatmul.f32.vlgmr.msra.gmra.mxu1 %v1171_v5 }
 0x238   : > { %1291 = vmatmul.f32.vlgmr.msra.gmra.mxu2 %v1171_v5 }
 0x2b4   : > { %v1269_v10 = vpop.f32.mrf.mxu1  ;;  %v1246_v11 = vpop.f32.mrf.mxu0 }
 0x2b5   : > { %v3962_v12 = vadd.f32 %v1269_v10, %v1224_v8  ;;  %v3970_v13 = vadd.f32 %v1246_v11, %v1223_v9 }
 0x2b7   : > { %1370 = vrot.lane.b32.xlu2 %v3962_v12, %s3290_s26  ;;  %2973 = vmatpush.xpose.msk.msra.mxu3 %vm1298_vm4, %v3962_v12 }
 0x2ba   : > { %2974 = vmatmul.msk.f32.vlgmr.msra.gmra.mxu3 %vm1298_vm4, %v3970_v13 }
 0x2bb   : > { %v1292_v15 = vpop.f32.mrf.mxu2 }
 0x2bc   : > { %v3977_v16 = vadd.f32 %v1292_v15, %v1225_v14 }
 0x2be   : > { %2975 = vmatpush.msk.msrb.mxu3 %vm1342_vm5, %v3977_v16 }
 0x2bf   : > { %1368 = vrot.lane.b32.xlu2 %v3970_v13, %s3290_s26 }
 0x2c7   : > { %1408 = vrot.lane.b32.xlu2 %v3977_v16, %s3290_s26 }
 0x2cf   : > { %1441 = vrot.lane.b32.xlu2 %v3970_v13, %s3291_s11 }
 0x311   : > { %v1371_v17 = vpop.permute.xlu2 %1370 }
 0x312   : > { %2977 = vmatpush.xpose.msk.msra.mxu3 %vm1298_vm4, %v1371_v17 }
 0x319   : > { %v1369_v26 = vpop.permute.xlu2 %1368 }
 0x321   : > { %v1409_v30 = vpop.permute.xlu2 %1408 }
 0x329   : > { %v1442_v52 = vpop.permute.xlu2 %1441 }
 0x33d   : > { %v1322_v18 = vpop.f32.mrf.mxu3 }
 0x33e   : > { %v1325_v19 = vmul.f32 0.17677669, %v1322_v18 }
 0x340   : > { %v1327_v20 = vsel %vm1326_vm6, %v1325_v19, -inf }
 0x341   : > { %1328 = vmax.xlane.f32.xlu1 %v1327_v20 }
 0x3b4   : > { %v1329_v21 = vpop.xlane.xlu1 %1328 }
 0x3b5   : > { %v1330_v22 = vsub.f32 %v1325_v19, %v1329_v21 }
 0x3b7   : > { %v1331_v23 = vmul.f32 1.442695, %v1330_v22 }
 0x3b9   : > { %3095 = vpow2.f32 %v1331_v23 }
 0x3bf   : > { %v3096_v24 = vpop.eup %3095 }
 0x3c0   : > { %v1333_v25 = vsel %vm1326_vm6, %v3096_v24, 0.0 }
 0x3c1   : > { %1334 = vadd.xlane.f32.xlu1 %v1333_v25 }
 0x434   : > { %v1335_v27 = vpop.xlane.xlu1 %1334 }
 0x435   : > { %3097 = vrcp.f32 %v1335_v27 }
 0x43b   : > { %v3098_v28 = vpop.eup %3097 }
 0x43c   : > { %v1337_v29 = vmul.f32 %v3098_v28, %v3096_v24 }
 0x43e   : > { %2976 = vmatmul.msk.f32.vlgmr.msrb.gmra.mxu3 %vm1338_vm7, %v1337_v29 }
 0x43f   : > { %2979 = vmatpush.msk.msrb.mxu3 %vm1342_vm5, %v1409_v30 }
 0x446   : > { %2978 = vmatmul.msk.f32.vlgmr.msra.gmra.mxu3 %vm1298_vm4, %v1369_v26 }
 0x4c1   : > { %v1363_v31 = vpop.f32.mrf.mxu3 }
 0x4c2   : > { %1367 = vst.msk [vmem:[#allocation3] sm:$0x1f] %vm1366_vm8, %v1363_v31 }
 0x4c9   : > { %v1393_v32 = vpop.f32.mrf.mxu3 }
 0x4ca   : > { %v1396_v33 = vmul.f32 0.17677669, %v1393_v32 }
 0x4cc   : > { %v1397_v34 = vsel %vm1326_vm6, %v1396_v33, -inf }
 0x4cd   : > { %1398 = vmax.xlane.f32.xlu0 %v1397_v34 }
 0x4e1   : > { %1443 = vrot.lane.b32.xlu0 %v3962_v12, %s3291_s11 }
 0x4e9   : > { %1481 = vrot.lane.b32.xlu0 %v3977_v16, %s3291_s11 }
 0x4f1   : > { %1514 = vrot.lane.b32.xlu0 %v3970_v13, %s3292_s30 }
 0x540   : > { %v1399_v35 = vpop.xlane.xlu0 %1398 }
 0x541   : > { %v1400_v36 = vsub.f32 %v1396_v33, %v1399_v35 }
 0x543   : > { %v1401_v37 = vmul.f32 1.442695, %v1400_v36 }
 0x545   : > { %3099 = vpow2.f32 %v1401_v37 }
 0x54b   : > { %v3100_v38 = vpop.eup %3099 }
 0x54c   : > { %v1403_v39 = vsel %vm1326_vm6, %v3100_v38, 0.0 }
 0x54d   : > { %1404 = vadd.xlane.f32.xlu1 %v1403_v39 }
 0x553   : > { %v1444_v42 = vpop.permute.xlu0 %1443 }
 0x554   : > { %2981 = vmatpush.xpose.msk.msra.mxu3 %vm1298_vm4, %v1444_v42  ;;  %v1633_v42 = vrot.slane %v3977_v16, 5 }
 0x555   : > { %1117 = vadd.xlane.f32.xlu1 %v1116_v41 }
 0x55b   : > { %v1482_v48 = vpop.permute.xlu0 %1481 }
 0x563   : > { %v1515_v18 = vpop.permute.xlu0 %1514 }
 0x5c0   : > { %v1405_v43 = vpop.xlane.xlu1 %1404 }
 0x5c1   : > { %3101 = vrcp.f32 %v1405_v43 }
 0x5c7   : > { %v3102_v44 = vpop.eup %3101 }
 0x5c8   : > { %v1407_v45 = vmul.f32 %v3102_v44, %v3100_v38  ;;  %v1118_v46 = vpop.xlane.xlu1 %1117 }
 0x5c9   : > { %v1127_v47 = vmul.f32 %v3887_v7, %v1118_v46 }
 0x5ca   : > { %2980 = vmatmul.msk.f32.vlgmr.msrb.gmra.mxu3 %vm1338_vm7, %v1407_v45 }
 0x5cb   : > { %v1129_v49 = vsub.f32 %v4002_v40, %v1127_v47  ;;  %2983 = vmatpush.msk.msrb.mxu3 %vm1342_vm5, %v1482_v48 }
 0x5cd   : > { %v1131_v50 = vmul.f32 %v1129_v49, %v1129_v49 }
 0x5cf   : > { %v1134_v51 = vsel %vm1115_vm9, %v1131_v50, 0.0 }
 0x5d0   : > { %1135 = vadd.xlane.f32.xlu1 %v1134_v51 }
 0x5d2   : > { %2982 = vmatmul.msk.f32.vlgmr.msra.gmra.mxu3 %vm1298_vm4, %v1442_v52 }
 0x5e9   : > { %1516 = vrot.lane.b32.xlu1 %v3962_v12, %s3292_s30 }
 0x643   : > { %v1136_v53 = vpop.xlane.xlu1 %1135 }
 0x644   : > { %v1138_v54 = vmul.f32 %v1136_v53, %v3887_v7 }
 0x646   : > { %v1140_v55 = vadd.f32 1e-12, %v1138_v54 }
 0x648   : > { %3103 = vrsqrt.f32 %v1140_v55  ;;  %vm1157_vm11 = vweird.f32 %v1140_v55 }
 0x64d   : > { %v4016_v56 = vpop.f32.mrf.mxu3 }
 0x64e   : > { %v3104_v57 = vpop.eup %3103 }
 0x64f   : > { %v1152_v59 = vmul.f32 %v3104_v57, %v1140_v55  ;;  %vm1158_vm10 = vweird.f32 %v3104_v57 }
 0x650   : > { %vm1159_vm12 = vmor %vm1157_vm11, %vm1158_vm10 }
 0x651   : > { %v1153_v60 = vmul.f32 %v3104_v57, %v1152_v59 }
 0x653   : > { %v1154_v61 = vmul.f32 0.5, %v1153_v60 }
 0x655   : > { %v1155_v62 = vsub.f32 1.5, %v1154_v61  ;;  %v1466_v63 = vpop.f32.mrf.mxu3 }
 0x656   : > { %v1469_v1 = vmul.f32 0.17677669, %v1466_v63 }
 0x657   : > { %v1156_v2 = vmul.f32 %v3104_v57, %v1155_v62 }
 0x658   : > { %v1470_v4 = vsel %vm1326_vm6, %v1469_v1, -inf }
 0x659   : > { %v1160_v5 = vsel %vm1159_vm12, %v3104_v57, %v1156_v2  ;;  %1471 = vmax.xlane.f32.xlu2 %v1470_v4 }
 0x65a   : > { %v1162_v10 = vmul.f32 %v1160_v5, %v1129_v49 }
 0x65b   : > { %v1517_v11 = vpop.permute.xlu1 %1516 }
 0x65c   : > { %2985 = vmatpush.xpose.msk.msrb.mxu0 %vm1298_vm4, %v1517_v11  ;;  %v1167_v15 = vmul.f32 %v3943_v0, %v1162_v10  ;;  %v1593_v0 = vrot.slane %v3962_v12, 5 }
 0x65e   : > { %v1172_v17 = vadd.f32 %v3951_v3, %v1167_v15  ;;  %v1589_v3 = vrot.slane %v3970_v13, 5 }
 0x660   : > { %1248 = vmatmul.f32.gmra.mxu0 %v1172_v17  ;;  %1271 = vmatmul.f32.gmra.mxu1 %v1172_v17 }
 0x661   : > { %1294 = vmatmul.f32.gmra.mxu2 %v1172_v17 }
 0x668   : > { %2986 = vmatmul.msk.f32.vlgmr.msrb.gmra.mxu0 %vm1298_vm4, %v1515_v18 }
 0x6dd   : > { %v1249_v19 = vpop.f32.mrf.mxu0  ;;  %v1272_v20 = vpop.f32.mrf.mxu1 }
 0x6de   : > { %v1250_v21 = vadd.f32 %v1249_v19, %v1223_v9  ;;  %v1273_v22 = vadd.f32 %v1272_v20, %v1224_v8  ;;  %v1472_v8 = vpop.xlane.xlu2 %1471 }
 0x6df   : > { %v1473_v9 = vsub.f32 %v1469_v1, %v1472_v8 }
 0x6e0   : > { %v1590_v23 = vrot.slane %v1250_v21, 5  ;;  %v1594_v24 = vrot.slane %v1273_v22, 5 }
 0x6e1   : > { %v1474_v12 = vmul.f32 1.442695, %v1473_v9 }
 0x6e2   : > { %v1595_v25 = vsel %vm1588_vm13, %v1593_v0, %v1594_v24  ;;  %v1591_v26 = vsel %vm1588_vm13, %v1589_v3, %v1590_v23 }
 0x6e3   : > { %1736 = vrot.lane.b32.xlu1 %v1595_v25, %s3291_s11  ;;  %1664 = vrot.lane.b32.xlu0 %v1595_v25, %s3290_s26  ;;  %3105 = vpow2.f32 %v1474_v12 }
 0x6e4   : > { %1734 = vrot.lane.b32.xlu2 %v1591_v26, %s3291_s11  ;;  %2989 = vmatpush.xpose.msk.msra.mxu3 %vm1298_vm4, %v1595_v25  ;;  %v1295_v36 = vpop.f32.mrf.mxu2 }
 0x6e5   : > { %v1539_v28 = vpop.f32.mrf.mxu0  ;;  %v1296_v38 = vadd.f32 %v1295_v36, %v1225_v14 }
 0x6e6   : > { %v1542_v29 = vmul.f32 0.17677669, %v1539_v28 }
 0x6e7   : > { %v1634_v39 = vrot.slane %v1296_v38, 5 }
 0x6e8   : > { %v1543_v30 = vsel %vm1326_vm6, %v1542_v29, -inf }
 0x6e9   : > { %v3106_v13 = vpop.eup %3105  ;;  %v4049_v44 = vsel %vm1588_vm13, %v1633_v42, %v1634_v39 }
 0x6ea   : > { %v1476_v27 = vsel %vm1326_vm6, %v3106_v13, 0.0 }
 0x6eb   : > { %1662 = vrot.lane.b32.xlu0 %v1591_v26, %s3290_s26 }
 0x6f3   : > { %1808 = vrot.lane.b32.xlu0 %v1595_v25, %s3292_s30 }
 0x70d   : > { %1477 = vadd.xlane.f32.xlu1 %v1476_v27 }
 0x71d   : > { %1544 = vmax.xlane.f32.xlu0 %v1543_v30 }
 0x726   : > { %1806 = vrot.lane.b32.xlu1 %v1591_v26, %s3292_s30 }
 0x73e   : > { %v1735_v34 = vpop.permute.xlu2 %1734 }
 0x755   : > { %v1737_v31 = vpop.permute.xlu1 %1736  ;;  %v1665_v32 = vpop.permute.xlu0 %1664 }
 0x756   : > { %2993 = vmatpush.xpose.msk.msra.mxu0 %vm1298_vm4, %v1665_v32 }
 0x75a   : > { %2997 = vmatpush.xpose.msk.msrb.mxu0 %vm1298_vm4, %v1737_v31 }
 0x75d   : > { %v1663_v33 = vpop.permute.xlu0 %1662 }
 0x75e   : > { %2994 = vmatmul.msk.f32.vlgmr.msra.gmra.mxu0 %vm1298_vm4, %v1663_v33 }
 0x765   : > { %v1809_v35 = vpop.permute.xlu0 %1808 }
 0x766   : > { %2998 = vmatmul.msk.f32.vlgmr.msrb.gmra.mxu0 %vm1298_vm4, %v1735_v34 }
 0x767   : > { %3001 = vmatpush.xpose.msk.msra.mxu0 %vm1298_vm4, %v1809_v35 }
 0x780   : > { %v1478_v37 = vpop.xlane.xlu1 %1477 }
 0x781   : > { %3107 = vrcp.f32 %v1478_v37 }
 0x787   : > { %v3108_v41 = vpop.eup %3107 }
 0x788   : > { %v1480_v43 = vmul.f32 %v3108_v41, %v3106_v13 }
 0x78a   : > { %2984 = vmatmul.msk.f32.vlgmr.msrb.gmra.mxu3 %vm1338_vm7, %v1480_v43 }
 0x78b   : > { %2991 = vmatpush.msk.msrb.mxu3 %vm1342_vm5, %v4049_v44 }
 0x790   : > { %v1545_v6 = vpop.xlane.xlu0 %1544 }
 0x791   : > { %v1546_v47 = vsub.f32 %v1542_v29, %v1545_v6 }
 0x792   : > { %2990 = vmatmul.msk.f32.vlgmr.msra.gmra.mxu3 %vm1298_vm4, %v1591_v26 }
 0x793   : > { %v1547_v49 = vmul.f32 1.442695, %v1546_v47  ;;  %v1895_v47 = vld [vmem:[%s3527_s24 + $0x78] sm:$0xff] }
 0x794   : > { %1900 = vmatpush.msrb.mxu2 %v1895_v47  ;;  %v2015_v47 = vld [vmem:[%s3550_s13 + $0x120] sm:$0xff] }
 0x795   : > { %3109 = vpow2.f32 %v1547_v49  ;;  %v1893_v49 = vld [vmem:[%s3527_s24 + $0x68] sm:$0xff] }
 0x798   : > { %v1807_v45 = vpop.permute.xlu1 %1806 }
 0x799   : > { %3002 = vmatmul.msk.f32.vlgmr.msra.gmra.mxu0 %vm1298_vm4, %v1807_v45 }
 0x79b   : > { %v3110_v53 = vpop.eup %3109 }
 0x79c   : > { %v1549_v54 = vsel %vm1326_vm6, %v3110_v53, 0.0 }
 0x7db   : > { %v1687_v14 = vpop.f32.mrf.mxu0 }
 0x7dc   : > { %v1690_v46 = vmul.f32 0.17677669, %v1687_v14 }
 0x7de   : > { %v1691_v48 = vsel %vm1326_vm6, %v1690_v46, -inf }
 0x7df   : > { %1692 = vmax.xlane.f32.xlu2 %v1691_v48  ;;  %v1894_v48 = vld [vmem:[%s3527_s24 + $0x70] sm:$0xff] }
 0x7e0   : > { %1901 = vmatpush.msrb.mxu2 %v1894_v48  ;;  %v2016_v48 = vld [vmem:[%s3550_s13 + $0x128] sm:$0xff] }
 0x7e2   : > { %1902 = vmatpush.msrb.mxu2 %v1893_v49  ;;  %v2017_v49 = vld [vmem:[%s3550_s13 + $0x130] sm:$0xff] }
 0x7e3   : > { %v1759_v50 = vpop.f32.mrf.mxu0 }
 0x7e4   : > { %v1762_v51 = vmul.f32 0.17677669, %v1759_v50  ;;  %v1892_v50 = vld [vmem:[%s3527_s24 + $0x60] sm:$0xff] }
 0x7e5   : > { %1903 = vmatpush.msrb.mxu2 %v1892_v50  ;;  %v2018_v50 = vld [vmem:[%s3550_s13 + $0x138] sm:$0xff] }
 0x7e6   : > { %v1763_v52 = vsel %vm1326_vm6, %v1762_v51, -inf }
 0x7e7   : > { %1764 = vmax.xlane.f32.xlu0 %v1763_v52  ;;  %v1890_v52 = vld [vmem:[%s3527_s24 + $0x50] sm:$0xff] }
 0x7ef   : > { %1550 = vadd.xlane.f32.xlu0 %v1549_v54  ;;  %v1888_v54 = vld [vmem:[%s3527_s24 + $0x40] sm:$0xff] }
 0x803   : > { %1554 = vrot.lane.b32.xlu0 %v3977_v16, %s3292_s30 }
 0x80b   : > { %1846 = vrot.lane.b32.xlu0 %v4049_v44, %s3292_s30 }
 0x80d   : > { %v1505_v55 = vpop.f32.mrf.mxu3 }
 0x813   : > { %1436 = vrot.lane.b32.xlu0 %v4016_v56, %s3292_s30 }
 0x815   : > { %v1617_v57 = vpop.f32.mrf.mxu3 }
 0x816   : > { %v1620_v59 = vmul.f32 0.17677669, %v1617_v57  ;;  %v1831_v61 = vpop.f32.mrf.mxu0  ;;  %v1886_v57 = vld [vmem:[%s3527_s24 + $0x30] sm:$0xff] }
 0x817   : > { %v1834_v62 = vmul.f32 0.17677669, %v1831_v61 }
 0x818   : > { %v1621_v60 = vsel %vm1326_vm6, %v1620_v59, -inf }
 0x819   : > { %1622 = vmax.xlane.f32.xlu1 %v1621_v60  ;;  %v1835_v63 = vsel %vm1326_vm6, %v1834_v62, -inf  ;;  %v1884_v60 = vld [vmem:[%s3527_s24 + $0x20] sm:$0xff] }
 0x821   : > { %1836 = vmax.xlane.f32.xlu1 %v1835_v63  ;;  %v1882_v63 = vld [vmem:[%s3527_s24 + $0x10] sm:$0xff] }
 0x852   : > { %v1693_v1 = vpop.xlane.xlu2 %1692 }
 0x853   : > { %v1694_v2 = vsub.f32 %v1690_v46, %v1693_v1  ;;  %v1881_v1 = vld [vmem:[%s3527_s24 + $0x8] sm:$0xff] }
 0x855   : > { %v1695_v16 = vmul.f32 1.442695, %v1694_v2  ;;  %v1880_v2 = vld [vmem:[%s3527_s24] sm:$0xff] }
 0x857   : > { %3111 = vpow2.f32 %v1695_v16 }
 0x85a   : > { %v1765_v4 = vpop.xlane.xlu0 %1764 }
 0x85b   : > { %v1766_v5 = vsub.f32 %v1762_v51, %v1765_v4  ;;  %v1891_v51 = vld [vmem:[%s3527_s24 + $0x58] sm:$0xff] }
 0x85c   : > { %1904 = vmatpush.msrb.mxu2 %v1891_v51  ;;  %v2011_v51 = vld [vmem:[%s3550_s13 + $0x100] sm:$0xff] }
 0x85d   : > { %v3112_v10 = vpop.eup %3111  ;;  %v1767_v11 = vmul.f32 1.442695, %v1766_v5 }
 0x85e   : > { %v1697_v56 = vsel %vm1326_vm6, %v3112_v10, 0.0  ;;  %1905 = vmatpush.msrb.mxu2 %v1890_v52  ;;  %v2012_v52 = vld [vmem:[%s3550_s13 + $0x108] sm:$0xff] }
 0x85f   : > { %3113 = vpow2.f32 %v1767_v11  ;;  %1698 = vadd.xlane.f32.xlu1 %v1697_v56 }
 0x862   : > { %v1551_v18 = vpop.xlane.xlu0 %1550 }
 0x863   : > { %3115 = vrcp.f32 %v1551_v18 }
 0x865   : > { %v3114_v15 = vpop.eup %3113 }
 0x866   : > { %v1769_v17 = vsel %vm1326_vm6, %v3114_v15, 0.0 }
 0x867   : > { %1770 = vadd.xlane.f32.xlu2 %v1769_v17 }
 0x869   : > { %v3116_v19 = vpop.eup %3115 }
 0x86a   : > { %v1553_v21 = vmul.f32 %v3116_v19, %v3110_v53  ;;  %v1889_v53 = vld [vmem:[%s3527_s24 + $0x48] sm:$0xff] }
 0x86b   : > { %1906 = vmatpush.msrb.mxu2 %v1889_v53  ;;  %v2013_v53 = vld [vmem:[%s3550_s13 + $0x110] sm:$0xff] }
 0x86d   : > { %1907 = vmatpush.msrb.mxu2 %v1888_v54  ;;  %v2014_v54 = vld [vmem:[%s3550_s13 + $0x118] sm:$0xff] }
 0x875   : > { %v1555_v20 = vpop.permute.xlu0 %1554 }
 0x876   : > { %2987 = vmatpush.msk.msrb.mxu1 %vm1342_vm5, %v1555_v20 }
 0x877   : > { %2988 = vmatmul.msk.f32.vlgmr.msrb.gmra.mxu1 %vm1338_vm7, %v1553_v21 }
 0x87d   : > { %v1847_v22 = vpop.permute.xlu0 %1846 }
 0x885   : > { %v1437_v23 = vpop.permute.xlu0 %1436 }
 0x886   : > { %1440 = vst.msk [vmem:[#allocation3] sm:$0x1f] %vm1439_vm14, %v1437_v23  ;;  %v2039_v23 = vld [vmem:[%s3550_s13 + $0x1e0] sm:$0xff] }
 0x88c   : > { %v1623_v24 = vpop.xlane.xlu1 %1622 }
 0x88d   : > { %v1624_v0 = vsub.f32 %v1620_v59, %v1623_v24  ;;  %v1885_v59 = vld [vmem:[%s3527_s24 + $0x28] sm:$0xff] }
 0x88e   : > { %v2040_v24 = vld [vmem:[%s3550_s13 + $0x1e8] sm:$0xff] }
 0x88f   : > { %v1625_v3 = vmul.f32 1.442695, %v1624_v0  ;;  %v2041_v0 = vld [vmem:[%s3550_s13 + $0x1f0] sm:$0xff]  ;;  %2076 = vmatpush.msrb.mxu0 %v2040_v24  ;;  %v1988_v24 = vld [vmem:[%s3550_s13 + $0x48] sm:$0xff] }
 0x891   : > { %3117 = vpow2.f32 %v1625_v3  ;;  %v2035_v3 = vld [vmem:[%s3550_s13 + $0x1c0] sm:$0xff] }
 0x894   : > { %v1837_v25 = vpop.xlane.xlu1 %1836 }
 0x895   : > { %v1838_v26 = vsub.f32 %v1834_v62, %v1837_v25  ;;  %v1883_v62 = vld [vmem:[%s3527_s24 + $0x18] sm:$0xff]  ;;  %v2036_v25 = vld [vmem:[%s3550_s13 + $0x1c8] sm:$0xff] }
 0x896   : > { %2077 = vmatpush.msrb.mxu0 %v2036_v25  ;;  %v1984_v25 = vld [vmem:[%s3550_s13 + $0x28] sm:$0xff] }
 0x897   : > { %v3118_v8 = vpop.eup %3117  ;;  %v1839_v9 = vmul.f32 1.442695, %v1838_v26  ;;  %v2037_v26 = vld [vmem:[%s3550_s13 + $0x1d0] sm:$0xff] }
 0x898   : > { %v1627_v12 = vsel %vm1326_vm6, %v3118_v8, 0.0 }
 0x899   : > { %3119 = vpow2.f32 %v1839_v9  ;;  %1628 = vadd.xlane.f32.xlu2 %v1627_v12 }
 0x89f   : > { %v3120_v13 = vpop.eup %3119 }
 0x8a0   : > { %v1841_v27 = vsel %vm1326_vm6, %v3120_v13, 0.0 }
 0x8a1   : > { %1842 = vadd.xlane.f32.xlu1 %v1841_v27 }
 0x8b1   : > { %1702 = vrot.lane.b32.xlu2 %v4049_v44, %s3290_s26 }
 0x8b9   : > { %1509 = vrot.lane.b32.xlu2 %v1505_v55, %s3291_s11  ;;  %v1887_v55 = vld [vmem:[%s3527_s24 + $0x38] sm:$0xff]  ;;  %s4752_s24 = scalar_lea.vmem %s4705_s14, %s3512_s7 }
 0x8ba   : > { %1774 = vrot.lane.b32.xlu1 %v4049_v44, %s3291_s11  ;;  %1908 = vmatpush.msrb.mxu2 %v1887_v55  ;;  %v3087_v56 = vld [vmem:[%s4752_s24] ss:$0 sm:$0xff] }
 0x8bb   : > { %v2007_v55 = vld [vmem:[%s3550_s13 + $0xe0] sm:$0xff] }
 0x8bc   : > { %1909 = vmatpush.msrb.mxu2 %v1886_v57  ;;  %v2008_v57 = vld [vmem:[%s3550_s13 + $0xe8] sm:$0xff] }
 0x8be   : > { %1910 = vmatpush.msrb.mxu2 %v1885_v59  ;;  %v2009_v59 = vld [vmem:[%s3550_s13 + $0xf0] sm:$0xff] }
 0x8c0   : > { %1911 = vmatpush.msrb.mxu2 %v1884_v60  ;;  %v2010_v60 = vld [vmem:[%s3550_s13 + $0xf8] sm:$0xff] }
 0x8c2   : > { %1912 = vmatpush.msrb.mxu2 %v1883_v62  ;;  %v2004_v62 = vld [vmem:[%s3550_s13 + $0xc8] sm:$0xff] }
 0x8c4   : > { %1913 = vmatpush.msrb.mxu2 %v1882_v63  ;;  %v2005_v63 = vld [vmem:[%s3550_s13 + $0xd0] sm:$0xff] }
 0x8c6   : > { %1914 = vmatpush.msrb.mxu2 %v1881_v1  ;;  %v2006_v1 = vld [vmem:[%s3550_s13 + $0xd8] sm:$0xff] }
 0x8c8   : > { %1915 = vmatpush.msrb.mxu2 %v1880_v2  ;;  %v1999_v2 = vld [vmem:[%s3550_s13 + $0xa0] sm:$0xff] }
 0x8d2   : > { %v1699_v29 = vpop.xlane.xlu1 %1698 }
 0x8d3   : > { %3121 = vrcp.f32 %v1699_v29 }
 0x8d9   : > { %v3122_v31 = vpop.eup %3121 }
 0x8da   : > { %v1771_v28 = vpop.xlane.xlu2 %1770  ;;  %v1701_v33 = vmul.f32 %v3122_v31, %v3112_v10 }
 0x8f4   : > { %v1578_v44 = vpop.f32.mrf.mxu1 }
 0x90c   : > { %v1629_v30 = vpop.xlane.xlu2 %1628 }
 0x90d   : > { %3123 = vrcp.f32 %v1629_v30 }
 0x913   : > { %v3124_v32 = vpop.eup %3123 }
 0x914   : > { %v1631_v34 = vmul.f32 %v3124_v32, %v3118_v8  ;;  %v1843_v35 = vpop.xlane.xlu1 %1842  ;;  %v1703_v36 = vpop.permute.xlu2 %1702  ;;  %v2038_v8 = vld [vmem:[%s3550_s13 + $0x1d8] sm:$0xff]  ;;  %v2031_v32 = vld [vmem:[%s3550_s13 + $0x1a0] sm:$0xff] }
 0x915   : > { %3125 = vrcp.f32 %v1843_v35  ;;  %2995 = vmatpush.msk.msra.mxu1 %vm1342_vm5, %v1703_v36  ;;  %v2034_v35 = vld [vmem:[%s3550_s13 + $0x1b8] sm:$0xff]  ;;  %v2027_v36 = vld [vmem:[%s3550_s13 + $0x180] sm:$0xff] }
 0x916   : > { %2992 = vmatmul.msk.f32.vlgmr.msrb.gmra.mxu3 %vm1338_vm7, %v1631_v34  ;;  %2996 = vmatmul.msk.f32.vlgmr.msra.gmra.mxu1 %vm1338_vm7, %v1701_v33  ;;  %3127 = vrcp.f32 %v1771_v28  ;;  %v2032_v33 = vld [vmem:[%s3550_s13 + $0x1a8] sm:$0xff]  ;;  %v2033_v34 = vld [vmem:[%s3550_s13 + $0x1b0] sm:$0xff] }
 0x917   : > { %3003 = vmatpush.msk.msrb.mxu1 %vm1342_vm5, %v1847_v22  ;;  %2078 = vmatpush.msrb.mxu0 %v2032_v33 }
 0x919   : > { %2099 = vmatpush.msra.mxu1 %v2041_v0  ;;  %v1989_v0 = vld [vmem:[%s3550_s13 + $0x50] sm:$0xff] }
 0x91b   : > { %v3126_v37 = vpop.eup %3125  ;;  %2100 = vmatpush.msra.mxu1 %v2037_v26  ;;  %v1985_v26 = vld [vmem:[%s3550_s13 + $0x30] sm:$0xff] }
 0x91c   : > { %v1845_v38 = vmul.f32 %v3126_v37, %v3120_v13  ;;  %v1510_v39 = vpop.permute.xlu2 %1509  ;;  %v3128_v41 = vpop.eup %3127  ;;  %v2028_v37 = vld [vmem:[%s3550_s13 + $0x188] sm:$0xff] }
 0x91d   : > { %1513 = vst.msk [vmem:[#allocation3] sm:$0x1f] %vm1512_vm15, %v1510_v39  ;;  %v1773_v42 = vmul.f32 %v3128_v41, %v3114_v15  ;;  %2101 = vmatpush.msra.mxu1 %v2033_v34  ;;  %2079 = vmatpush.msrb.mxu0 %v2028_v37  ;;  %v2030_v39 = vld [vmem:[%s3550_s13 + $0x198] sm:$0xff]  ;;  %v2023_v41 = vld [vmem:[%s3550_s13 + $0x160] sm:$0xff] }
 0x91e   : > { %3004 = vmatmul.msk.f32.vlgmr.msrb.gmra.mxu1 %vm1338_vm7, %v1845_v38  ;;  %v2029_v38 = vld [vmem:[%s3550_s13 + $0x190] sm:$0xff] }
 0x91f   : > { %2102 = vmatpush.msra.mxu1 %v2029_v38 }
 0x92c   : > { %v1775_v43 = vpop.permute.xlu1 %1774 }
 0x92d   : > { %2999 = vmatpush.msk.msra.mxu3 %vm1342_vm5, %v1775_v43  ;;  %v2025_v43 = vld [vmem:[%s3550_s13 + $0x170] sm:$0xff] }
 0x92e   : > { %3000 = vmatmul.msk.f32.vlgmr.msra.gmra.mxu3 %vm1338_vm7, %v1773_v42  ;;  %v2024_v42 = vld [vmem:[%s3550_s13 + $0x168] sm:$0xff]  ;;  %2103 = vmatpush.msra.mxu1 %v2025_v43  ;;  %v3088_v43 = vld [vmem:[%s4753_s0] ss:$0 sm:$0xff] }
 0x92f   : > { %2053 = vmatpush.msrb.mxu3 %v2039_v23  ;;  %2080 = vmatpush.msrb.mxu0 %v2024_v42  ;;  %v1987_v23 = vld [vmem:[%s3550_s13 + $0x40] sm:$0xff] }
 0x931   : > { %2054 = vmatpush.msrb.mxu3 %v2035_v3  ;;  %v1983_v3 = vld [vmem:[%s3550_s13 + $0x20] sm:$0xff] }
 0x933   : > { %2055 = vmatpush.msrb.mxu3 %v2031_v32 }
 0x935   : > { %2056 = vmatpush.msrb.mxu3 %v2027_v36 }
 0x937   : > { %2057 = vmatpush.msrb.mxu3 %v2023_v41 }
 0x993   : > { %v1726_v45 = vpop.f32.mrf.mxu1 }
 0x994   : > { %1730 = vrot.lane.b32.xlu0 %v1726_v45, %s3292_s30  ;;  %v2019_v45 = vld [vmem:[%s3550_s13 + $0x140] sm:$0xff] }
 0x995   : > { %2058 = vmatpush.msrb.mxu3 %v2019_v45 }
 0x997   : > { %2059 = vmatpush.msrb.mxu3 %v2015_v47 }
 0x999   : > { %v1658_v6 = vpop.f32.mrf.mxu3  ;;  %2060 = vmatpush.msrb.mxu3 %v2011_v51 }
 0x99a   : > { %1661 = vst.msk [vmem:[#allocation3 + $0x5] sm:$0x1f] %vm1366_vm8, %v1658_v6  ;;  %v2020_v6 = vld [vmem:[%s3550_s13 + $0x148] sm:$0xff] }
 0x99b   : > { %v1870_v14 = vpop.f32.mrf.mxu1  ;;  %2081 = vmatpush.msrb.mxu0 %v2020_v6  ;;  %2061 = vmatpush.msrb.mxu3 %v2007_v55  ;;  %v4216_v55 = vld [vmem:[%s3556_s4] sm:$0xf]  ;;  %s4769_s4 = sld [smem:[#allocation21_spill]] (!%p3013_p11) }
 0x99c   : > { %1582 = vrot.lane.b32.xlu0 %v1578_v44, %s3290_s26  ;;  %1874 = vrot.lane.b32.xlu2 %v1870_v14, %s3290_s26  ;;  %v2026_v44 = vld [vmem:[%s3550_s13 + $0x178] sm:$0xff]  ;;  %v2021_v14 = vld [vmem:[%s3550_s13 + $0x150] sm:$0xff] }
 0x99d   : > { %2104 = vmatpush.msra.mxu1 %v2021_v14  ;;  %2082 = vmatpush.msrb.mxu0 %v2016_v48  ;;  %v3089_v14 = vld [vmem:[%s4754_s23] ss:$0 sm:$0xff] }
 0x99f   : > { %2105 = vmatpush.msra.mxu1 %v2017_v49  ;;  %2083 = vmatpush.msrb.mxu0 %v2012_v52 }
 0x9a1   : > { %2106 = vmatpush.msra.mxu1 %v2013_v53  ;;  %2084 = vmatpush.msrb.mxu0 %v2008_v57  ;;  %v2046_v57 = vperm.slane %v4216_v55, 1 }
 0x9a3   : > { %2107 = vmatpush.msra.mxu1 %v2009_v59  ;;  %2085 = vmatpush.msrb.mxu0 %v2004_v62  ;;  %v2047_v59 = vperm.slane %v4216_v55, 2 }
 0x9a5   : > { %2108 = vmatpush.msra.mxu1 %v2005_v63 }
 0x9b1   : > { %v1798_v46 = vpop.f32.mrf.mxu3 }
 0x9b2   : > { %1802 = vrot.lane.b32.xlu1 %v1798_v46, %s3291_s11  ;;  %v2022_v46 = vld [vmem:[%s3550_s13 + $0x158] sm:$0xff]  ;;  %s4771_s11 = sld [smem:[#allocation24_spill]] (!%p3013_p11) }
 0x9f6   : > { %v1875_v5 = vpop.permute.xlu2 %1874 }
 0xa06   : > { %v1731_v61 = vpop.permute.xlu0 %1730 }
 0xa07   : > { %1733 = vst.msk [vmem:[#allocation3 + $0x5] sm:$0x1f] %vm1439_vm14, %v1731_v61  ;;  %v2003_v61 = vld [vmem:[%s3550_s13 + $0xc0] sm:$0xff] }
 0xa08   : > { %2062 = vmatpush.msrb.mxu3 %v2003_v61 }
 0xa0a   : > { %2063 = vmatpush.msrb.mxu3 %v1999_v2 }
 0xa0e   : > { %v1583_v16 = vpop.permute.xlu0 %1582 }
 0xa0f   : > { %1586 = vst.msk [vmem:[#allocation3] sm:$0x1f] %vm1585_vm0, %v1583_v16  ;;  %v2000_v16 = vld [vmem:[%s3550_s13 + $0xa8] sm:$0xff] }
 0xa10   : > { %2086 = vmatpush.msrb.mxu0 %v2000_v16  ;;  %v2048_v16 = vperm.slane %v4216_v55, 3 }
 0xa24   : > { %v1803_v4 = vpop.permute.xlu1 %1802 }
 0xa25   : > { %1805 = vst.msk [vmem:[#allocation3 + $0x5] sm:$0x1f] %vm1512_vm15, %v1803_v4  ;;  %v2001_v4 = vld [vmem:[%s3550_s13 + $0xb0] sm:$0xff] }
 0xa26   : > { %1877 = vst.msk [vmem:[#allocation3 + $0x5] sm:$0x1f] %vm1585_vm0, %v1875_v5  ;;  %v2002_v5 = vld [vmem:[%s3550_s13 + $0xb8] sm:$0xff]  ;;  %2109 = vmatpush.msra.mxu1 %v2001_v4 }
 0xa2d   : > { %v1878_v10 = vld [vmem:[#allocation3] sm:$0xff]  ;;  %v1879_v11 = vld [vmem:[#allocation3 + $0x8] sm:$0x3] }
 0xa2e   : > { %1916 = vmatmul.f32.vlgmr.msrb.gmra.mxu2 %v1878_v10  ;;  %v1995_v10 = vld [vmem:[%s3550_s13 + $0x80] sm:$0xff] }
 0xa2f   : > { %2064 = vmatpush.msrb.mxu3 %v1995_v10 }
 0xa36   : > { %1919 = vmatmul.f32.gmra.mxu2 %v1879_v11  ;;  %v1996_v11 = vld [vmem:[%s3550_s13 + $0x88] sm:$0xff] }
 0xa37   : > { %2087 = vmatpush.msrb.mxu0 %v1996_v11 }
 0xab1   : > { %v1917_v15 = vpop.f32.mrf.mxu2 }
 0xab2   : > { %v1918_v17 = vadd.f32 %v3087_v56, %v1917_v15  ;;  %v1998_v15 = vld [vmem:[%s3550_s13 + $0x98] sm:$0xff] }
 0xab4   : > { %v4116_v18 = vadd.f32 %v1918_v17, %v3878_v58  ;;  %v2042_v58 = vld [vmem:[%s3550_s13 + $0x1f8] sm:$0xff]  ;;  %v1991_v17 = vld [vmem:[%s3550_s13 + $0x60] sm:$0xff] }
 0xab5   : > { %2122 = vmatpush.msra.mxu2 %v2042_v58  ;;  %2065 = vmatpush.msrb.mxu3 %v1991_v17  ;;  %v1990_v58 = vld [vmem:[%s3550_s13 + $0x58] sm:$0xff] }
 0xab6   : > { %1927 = vadd.xlane.f32.xlu1 %v4116_v18 }
 0xab7   : > { %2123 = vmatpush.msra.mxu2 %v2038_v8  ;;  %2066 = vmatpush.msrb.mxu3 %v1987_v23  ;;  %v1986_v8 = vld [vmem:[%s3550_s13 + $0x38] sm:$0xff] }
 0xab9   : > { %v1920_v19 = vpop.f32.mrf.mxu2  ;;  %2124 = vmatpush.msra.mxu2 %v2034_v35  ;;  %2067 = vmatpush.msrb.mxu3 %v1983_v3 }
 0xaba   : > { %v1921_v20 = vadd.f32 %v3087_v56, %v1920_v19  ;;  %v1997_v56 = vld [vmem:[%s3550_s13 + $0x90] sm:$0xff]  ;;  %v1992_v19 = vld [vmem:[%s3550_s13 + $0x68] sm:$0xff] }
 0xabb   : > { %2125 = vmatpush.msra.mxu2 %v2030_v39  ;;  %2110 = vmatpush.msra.mxu1 %v1997_v56 }
 0xabc   : > { %v4120_v21 = vadd.f32 %v1921_v20, %v4002_v40  ;;  %v1993_v20 = vld [vmem:[%s3550_s13 + $0x70] sm:$0xff]  ;;  %2088 = vmatpush.msrb.mxu0 %v1992_v19 }
 0xabd   : > { %2126 = vmatpush.msra.mxu2 %v2026_v44  ;;  %2111 = vmatpush.msra.mxu1 %v1993_v20 }
 0xabe   : > { %v1929_v22 = vsel %vm1115_vm9, %v4120_v21, 0.0  ;;  %2089 = vmatpush.msrb.mxu0 %v1988_v24 }
 0xabf   : > { %1930 = vadd.xlane.f32.xlu0 %v1929_v22  ;;  %2127 = vmatpush.msra.mxu2 %v2022_v46  ;;  %v1994_v22 = vld [vmem:[%s3550_s13 + $0x78] sm:$0xff] }
 0xac0   : > { %2112 = vmatpush.msra.mxu1 %v1989_v0  ;;  %2090 = vmatpush.msrb.mxu0 %v1984_v25 }
 0xac1   : > { %2128 = vmatpush.msra.mxu2 %v2018_v50 }
 0xac2   : > { %2113 = vmatpush.msra.mxu1 %v1985_v26 }
 0xac3   : > { %2129 = vmatpush.msra.mxu2 %v2014_v54 }
 0xac5   : > { %2130 = vmatpush.msra.mxu2 %v2010_v60 }
 0xac7   : > { %2131 = vmatpush.msra.mxu2 %v2006_v1  ;;  %v2045_v1 = vperm.slane %v4216_v55, 0 }
 0xac9   : > { %2132 = vmatpush.msra.mxu2 %v2002_v5 }
 0xacb   : > { %2133 = vmatpush.msra.mxu2 %v1998_v15 }
 0xacd   : > { %2134 = vmatpush.msra.mxu2 %v1994_v22 }
 0xacf   : > { %2135 = vmatpush.msra.mxu2 %v1990_v58 }
 0xad1   : > { %2136 = vmatpush.msra.mxu2 %v1986_v8 }
 0xb29   : > { %v1928_v40 = vpop.xlane.xlu1 %1927 }
 0xb2a   : > { %v1932_v9 = vmul.f32 %v1928_v40, %v3887_v7  ;;  %v1979_v40 = vld [vmem:[%s3550_s13] sm:$0xff] }
 0xb2b   : > { %2068 = vmatpush.msrb.mxu3 %v1979_v40 }
 0xb2c   : > { %v4134_v12 = vsub.f32 %v4116_v18, %v1932_v9  ;;  %v1980_v9 = vld [vmem:[%s3550_s13 + $0x8] sm:$0xff] }
 0xb2d   : > { %2091 = vmatpush.msrb.mxu0 %v1980_v9 }
 0xb2e   : > { %v1936_v13 = vmul.f32 %v4134_v12, %v4134_v12 }
 0xb30   : > { %1938 = vadd.xlane.f32.xlu2 %v1936_v13  ;;  %v1981_v13 = vld [vmem:[%s3550_s13 + $0x10] sm:$0xff] }
 0xb31   : > { %2114 = vmatpush.msra.mxu1 %v1981_v13 }
 0xb32   : > { %v1931_v27 = vpop.xlane.xlu0 %1930 }
 0xb33   : > { %v1933_v28 = vmul.f32 %v1931_v27, %v3887_v7  ;;  %v1982_v27 = vld [vmem:[%s3550_s13 + $0x18] sm:$0xff] }
 0xb34   : > { %2137 = vmatpush.msra.mxu2 %v1982_v27 }
 0xb35   : > { %v4140_v29 = vsub.f32 %v4120_v21, %v1933_v28 }
 0xb37   : > { %v1937_v30 = vmul.f32 %v4140_v29, %v4140_v29 }
 0xb39   : > { %v1940_v31 = vsel %vm1115_vm9, %v1937_v30, 0.0 }
 0xb3a   : > { %1941 = vadd.xlane.f32.xlu1 %v1940_v31 }
 0xba3   : > { %v1939_v28 = vpop.xlane.xlu2 %1938 }
 0xba4   : > { %v1943_v30 = vmul.f32 %v1939_v28, %v3887_v7 }
 0xba6   : > { %v1945_v31 = vadd.f32 1e-12, %v1943_v30 }
 0xba8   : > { %3129 = vrsqrt.f32 %v1945_v31  ;;  %vm1953_vm2 = vweird.f32 %v1945_v31 }
 0xbad   : > { %v1942_v32 = vpop.xlane.xlu1 %1941 }
 0xbae   : > { %v3130_v33 = vpop.eup %3129  ;;  %v1944_v34 = vmul.f32 %v1942_v32, %v3887_v7 }
 0xbaf   : > { %v1948_v35 = vmul.f32 %v3130_v33, %v1945_v31  ;;  %vm1954_vm1 = vweird.f32 %v3130_v33 }
 0xbb0   : > { %v1946_v36 = vadd.f32 1e-12, %v1944_v34  ;;  %vm1955_vm3 = vmor %vm1953_vm2, %vm1954_vm1 }
 0xbb1   : > { %v1949_v37 = vmul.f32 %v3130_v33, %v1948_v35 }
 0xbb2   : > { %3131 = vrsqrt.f32 %v1946_v36  ;;  %vm1963_vm5 = vweird.f32 %v1946_v36 }
 0xbb3   : > { %v1950_v38 = vmul.f32 0.5, %v1949_v37 }
 0xbb5   : > { %v1951_v39 = vsub.f32 1.5, %v1950_v38 }
 0xbb7   : > { %v1952_v41 = vmul.f32 %v3130_v33, %v1951_v39 }
 0xbb8   : > { %v3132_v42 = vpop.eup %3131 }
 0xbb9   : > { %v1956_v44 = vsel %vm1955_vm3, %v3130_v33, %v1952_v41  ;;  %v1958_v45 = vmul.f32 %v3132_v42, %v1946_v36  ;;  %vm1964_vm4 = vweird.f32 %v3132_v42 }
 0xbba   : > { %v1967_v6 = vmul.f32 %v1956_v44, %v4134_v12  ;;  %vm1965_vm6 = vmor %vm1963_vm5, %vm1964_vm4 }
 0xbbb   : > { %v1959_v46 = vmul.f32 %v3132_v42, %v1958_v45 }
 0xbbc   : > { %v1972_v47 = vmul.f32 %v3088_v43, %v1967_v6 }
 0xbbd   : > { %v1960_v48 = vmul.f32 0.5, %v1959_v46 }
 0xbbe   : > { %v1977_v49 = vadd.f32 %v3089_v14, %v1972_v47 }
 0xbbf   : > { %v1961_v50 = vsub.f32 1.5, %v1960_v48 }
 0xbc0   : > { %2069 = vmatmul.f32.vlgmr.msrb.gmra.mxu3 %v1977_v49  ;;  %2092 = vmatmul.f32.vlgmr.msrb.gmra.mxu0 %v1977_v49 }
 0xbc1   : > { %v1962_v51 = vmul.f32 %v3132_v42, %v1961_v50  ;;  %2115 = vmatmul.f32.vlgmr.msra.gmra.mxu1 %v1977_v49  ;;  %2138 = vmatmul.f32.vlgmr.msra.gmra.mxu2 %v1977_v49 }
 0xbc3   : > { %v1966_v12 = vsel %vm1965_vm6, %v3132_v42, %v1962_v51 }
 0xbc4   : > { %v1968_v52 = vmul.f32 %v1966_v12, %v4140_v29 }
 0xbc6   : > { %v1973_v53 = vmul.f32 %v3088_v43, %v1968_v52 }
 0xbc8   : > { %v1978_v54 = vadd.f32 %v3089_v14, %v1973_v53 }
 0xbca   : > { %2072 = vmatmul.f32.gmra.mxu3 %v1978_v54  ;;  %2095 = vmatmul.f32.gmra.mxu0 %v1978_v54 }
 0xbcb   : > { %2118 = vmatmul.f32.gmra.mxu1 %v1978_v54  ;;  %2141 = vmatmul.f32.gmra.mxu2 %v1978_v54 }
 0xc3d   : > { %v2093_v60 = vpop.f32.mrf.mxu0 }
 0xc3e   : > { %v4220_v61 = vadd.f32 %v2093_v60, %v2046_v57  ;;  %v2116_v62 = vpop.f32.mrf.mxu1 }
 0xc3f   : > { %v4224_v63 = vadd.f32 %v2116_v62, %v2047_v59 }
 0xc40   : > { %v4227_v29 = vmul.f32 0.70710677, %v4220_v61 }
 0xc41   : > { %v4231_v2 = vmul.f32 0.70710677, %v4224_v63 }
 0xc42   : > { %v2201_v4 = vmul.f32 %v4227_v29, %v4227_v29 }
 0xc43   : > { %v2241_v5 = vmul.f32 %v4231_v2, %v4231_v2  ;;  %v2070_v10 = vpop.f32.mrf.mxu3 }
 0xc44   : > { %v4238_v11 = vmin.f32 %v2201_v4, 16.0  ;;  %v4242_v56 = vadd.f32 %v2070_v10, %v2045_v1  ;;  %v2139_v15 = vpop.f32.mrf.mxu2 }
 0xc45   : > { %v4244_v17 = vmin.f32 %v2241_v5, 16.0  ;;  %v4248_v19 = vadd.f32 %v2139_v15, %v2048_v16 }
 0xc46   : > { %v2203_v20 = vmul.f32 2.1237322e-06, %v4238_v11  ;;  %v2214_v22 = vmul.f32 3.8918573e-05, %v4238_v11  ;;  %v4255_v0 = vmul.f32 0.70710677, %v4242_v56 }
 0xc47   : > { %v2243_v23 = vmul.f32 2.1237322e-06, %v4244_v17  ;;  %v2254_v24 = vmul.f32 3.8918573e-05, %v4244_v17  ;;  %v4260_v40 = vmul.f32 0.70710677, %v4248_v19  ;;  %v2096_v37 = vpop.f32.mrf.mxu0 }
 0xc48   : > { %v2204_v58 = vadd.f32 0.00028619796, %v2203_v20  ;;  %v2215_v3 = vadd.f32 0.001143296, %v2214_v22  ;;  %v2161_v8 = vmul.f32 %v4255_v0, %v4255_v0  ;;  %v4278_v47 = vadd.f32 %v2096_v37, %v2046_v57 }
 0xc49   : > { %v2244_v25 = vadd.f32 0.00028619796, %v2243_v23  ;;  %v2255_v26 = vadd.f32 0.001143296, %v2254_v24  ;;  %v2281_v31 = vmul.f32 %v4260_v40, %v4260_v40  ;;  %v2528_v23 = vld [vmem:[%s3504_s1 + $0xf8] sm:$0xff] }
 0xc4a   : > { %v2205_v9 = vmul.f32 %v2204_v58, %v4238_v11  ;;  %v2216_v13 = vmul.f32 %v2215_v3, %v4238_v11  ;;  %v4266_v30 = vmin.f32 %v2161_v8, 16.0  ;;  %v2544_v24 = vld [vmem:[%s3504_s1 + $0x178] sm:$0xff]  ;;  %2588 = vmatpush.msra.mxu0 %v2528_v23  ;;  %v2527_v8 = vld [vmem:[%s3504_s1 + $0xf0] sm:$0xff] }
 0xc4b   : > { %v2245_v27 = vmul.f32 %v2244_v25, %v4244_v17  ;;  %v2256_v28 = vmul.f32 %v2255_v26, %v4244_v17  ;;  %v4274_v42 = vmin.f32 %v2281_v31, 16.0  ;;  %2611 = vmatpush.msrb.mxu1 %v2544_v24 }
 0xc4c   : > { %v2206_v32 = vadd.f32 0.0036580483, %v2205_v9  ;;  %v2217_v33 = vadd.f32 0.014752088, %v2216_v13  ;;  %v2163_v36 = vmul.f32 2.1237322e-06, %v4266_v30  ;;  %2589 = vmatpush.msra.mxu0 %v2527_v8 }
 0xc4d   : > { %v2246_v34 = vadd.f32 0.0036580483, %v2245_v27  ;;  %v2257_v35 = vadd.f32 0.014752088, %v2256_v28  ;;  %v2174_v41 = vmul.f32 3.8918573e-05, %v4266_v30 }
 0xc4e   : > { %v2207_v38 = vmul.f32 %v2206_v32, %v4238_v11  ;;  %v2218_v39 = vmul.f32 %v2217_v33, %v4238_v11  ;;  %v2164_v45 = vadd.f32 0.00028619796, %v2163_v36  ;;  %v2283_v51 = vmul.f32 2.1237322e-06, %v4274_v42  ;;  %v2543_v9 = vld [vmem:[%s3504_s1 + $0x170] sm:$0xff]  ;;  %v2558_v8 = vld [vmem:[%s3504_s1 + $0x1e8] sm:$0xff] }
 0xc4f   : > { %v2247_v43 = vmul.f32 %v2246_v34, %v4244_v17  ;;  %v2258_v44 = vmul.f32 %v2257_v35, %v4244_v17  ;;  %v2175_v46 = vadd.f32 0.001143296, %v2174_v41  ;;  %v2294_v54 = vmul.f32 3.8918573e-05, %v4274_v42  ;;  %2612 = vmatpush.msrb.mxu1 %v2543_v9  ;;  %v2526_v34 = vld [vmem:[%s3504_s1 + $0xe8] sm:$0xff]  ;;  %v2525_v41 = vld [vmem:[%s3504_s1 + $0xe0] sm:$0xff] }
 0xc50   : > { %v2208_v6 = vadd.f32 0.05243302, %v2207_v38  ;;  %v2219_v14 = vadd.f32 0.112945676, %v2218_v39  ;;  %v2165_v50 = vmul.f32 %v2164_v45, %v4266_v30  ;;  %v2284_v4 = vadd.f32 0.00028619796, %v2283_v51  ;;  %2590 = vmatpush.msra.mxu0 %v2526_v34  ;;  %v2119_v45 = vpop.f32.mrf.mxu1 }
 0xc51   : > { %v2248_v48 = vadd.f32 0.05243302, %v2247_v43  ;;  %v2259_v49 = vadd.f32 0.112945676, %v2258_v44  ;;  %v2176_v53 = vmul.f32 %v2175_v46, %v4266_v30  ;;  %v2295_v26 = vadd.f32 0.001143296, %v2294_v54 }
 0xc52   : > { %v2209_v12 = vmul.f32 %v2208_v6, %v4238_v11  ;;  %v2220_v52 = vmul.f32 %v2219_v14, %v4238_v11  ;;  %v2166_v62 = vadd.f32 0.0036580483, %v2165_v50  ;;  %v2285_v22 = vmul.f32 %v2284_v4, %v4274_v42  ;;  %v2542_v38 = vld [vmem:[%s3504_s1 + $0x168] sm:$0xff]  ;;  %v2512_v39 = vld [vmem:[%s3504_s1 + $0x78] sm:$0xff]  ;;  %v2541_v43 = vld [vmem:[%s3504_s1 + $0x160] sm:$0xff]  ;;  %2591 = vmatpush.msra.mxu0 %v2525_v41  ;;  %v2073_v50 = vpop.f32.mrf.mxu3 }
 0xc53   : > { %v2249_v60 = vmul.f32 %v2248_v48, %v4244_v17  ;;  %v2260_v57 = vmul.f32 %v2259_v49, %v4244_v17  ;;  %v2177_v15 = vadd.f32 0.014752088, %v2176_v53  ;;  %v4297_v27 = vmul.f32 0.70710677, %v4278_v47  ;;  %2613 = vmatpush.msrb.mxu1 %v2542_v38  ;;  %2565 = vmatpush.msra.mxu3 %v2512_v39  ;;  %v2560_v6 = vld [vmem:[%s3504_s1 + $0x1f8] sm:$0xff]  ;;  %v2511_v51 = vld [vmem:[%s3504_s1 + $0x70] sm:$0xff] }
 0xc54   : > { %v2210_v5 = vadd.f32 0.18741608, %v2209_v12  ;;  %v2221_v10 = vadd.f32 0.4994258, %v2220_v52  ;;  %v2167_v32 = vmul.f32 %v2166_v62, %v4266_v30  ;;  %v2286_v33 = vadd.f32 0.0036580483, %v2285_v22  ;;  %2634 = vmatpush.msrb.mxu2 %v2560_v6 }
 0xc55   : > { %v2261_v20 = vadd.f32 0.4994258, %v2260_v57  ;;  %v2250_v3 = vadd.f32 0.18741608, %v2249_v60  ;;  %v2178_v25 = vmul.f32 %v2177_v15, %v4266_v30  ;;  %v2296_v37 = vmul.f32 %v2295_v26, %v4274_v42  ;;  %2614 = vmatpush.msrb.mxu1 %v2541_v43  ;;  %2566 = vmatpush.msra.mxu3 %v2511_v51  ;;  %v2524_v60 = vld [vmem:[%s3504_s1 + $0xd8] sm:$0xff]  ;;  %v2539_v26 = vld [vmem:[%s3504_s1 + $0x150] sm:$0xff] }
 0xc56   : > { %v2222_v58 = vmul.f32 %v2221_v10, %v4238_v11  ;;  %v2211_v28 = vmul.f32 %v2210_v5, %v4238_v11  ;;  %v2361_v44 = vmul.f32 %v4297_v27, %v4297_v27  ;;  %v2168_v46 = vadd.f32 0.05243302, %v2167_v32  ;;  %v2540_v57 = vld [vmem:[%s3504_s1 + $0x158] sm:$0xff]  ;;  %2592 = vmatpush.msra.mxu0 %v2524_v60  ;;  %v2510_v10 = vld [vmem:[%s3504_s1 + $0x68] sm:$0xff] }
 0xc57   : > { %v2262_v13 = vmul.f32 %v2261_v20, %v4244_v17  ;;  %v2179_v36 = vadd.f32 0.112945676, %v2178_v25  ;;  %v2251_v11 = vmul.f32 %v2250_v3, %v4244_v17  ;;  %v2287_v17 = vmul.f32 %v2286_v33, %v4274_v42  ;;  %2615 = vmatpush.msrb.mxu1 %v2540_v57  ;;  %2567 = vmatpush.msra.mxu3 %v2510_v10  ;;  %v2522_v32 = vld [vmem:[%s3504_s1 + $0xc8] sm:$0xff]  ;;  %v2508_v39 = vld [vmem:[%s3504_s1 + $0x58] sm:$0xff]  ;;  %v2555_v57 = vld [vmem:[%s3504_s1 + $0x1d0] sm:$0xff] }
 0xc58   : > { %v4300_v31 = vadd.f32 1.0, %v2222_v58  ;;  %v2212_v14 = vadd.f32 1.1283791, %v2211_v28  ;;  %v2297_v49 = vadd.f32 0.014752088, %v2296_v37  ;;  %v4321_v12 = vmul.f32 0.5, %v4220_v61 }
 0xc59   : > { %v4304_v35 = vadd.f32 1.0, %v2262_v13  ;;  %v2180_v48 = vmul.f32 %v2179_v36, %v4266_v30  ;;  %v4324_v52 = vmul.f32 0.5, %v4224_v63  ;;  %v2252_v53 = vadd.f32 1.1283791, %v2251_v11  ;;  %v2559_v61 = vld [vmem:[%s3504_s1 + $0x1f0] sm:$0xff]  ;;  %2616 = vmatpush.msrb.mxu1 %v2539_v26  ;;  %v2538_v33 = vld [vmem:[%s3504_s1 + $0x148] sm:$0xff] }
 0xc5a   : > { %3133 = vrcp.f32 %v4300_v31  ;;  %v4328_v54 = vadd.f32 %v2119_v45, %v2047_v59  ;;  %v2298_v4 = vmul.f32 %v2297_v49, %v4274_v42  ;;  %v4333_v5 = vmin.f32 %v2361_v44, 16.0  ;;  %v2523_v63 = vld [vmem:[%s3504_s1 + $0xd0] sm:$0xff]  ;;  %2635 = vmatpush.msrb.mxu2 %v2559_v61  ;;  %v2557_v11 = vld [vmem:[%s3504_s1 + $0x1e0] sm:$0xff]  ;;  %v2556_v6 = vld [vmem:[%s3504_s1 + $0x1d8] sm:$0xff] }
 0xc5b   : > { %3135 = vrcp.f32 %v4304_v35  ;;  %v2181_v62 = vadd.f32 0.4994258, %v2180_v48  ;;  %v4341_v59 = vmul.f32 %v2212_v14, %v4227_v29  ;;  %v2169_v20 = vmul.f32 %v2168_v46, %v4266_v30  ;;  %2593 = vmatpush.msra.mxu0 %v2523_v63  ;;  %2617 = vmatpush.msrb.mxu1 %v2538_v33  ;;  %v2537_v45 = vld [vmem:[%s3504_s1 + $0x140] sm:$0xff]  ;;  %v2507_v48 = vld [vmem:[%s3504_s1 + $0x50] sm:$0xff]  ;;  %v2520_v49 = vld [vmem:[%s3504_s1 + $0xb8] sm:$0xff] }
 0xc5c   : > { %v2288_v22 = vadd.f32 0.05243302, %v2287_v17  ;;  %v4346_v23 = vadd.f32 %v2073_v50, %v2045_v1  ;;  %v2233_v3 = vand.u32 2147483647, %v4300_v31  ;;  %v2235_v29 = vand.u32 2147483648, %v4300_v31  ;;  %v2509_v1 = vld [vmem:[%s3504_s1 + $0x60] sm:$0xff]  ;;  %2636 = vmatpush.msrb.mxu2 %v2558_v8 }
 0xc5d   : > { %v2182_v25 = vmul.f32 %v2181_v62, %v4266_v30  ;;  %vm2229_vm7 = vweird.f32 %v4300_v31  ;;  %v2299_v13 = vadd.f32 0.112945676, %v2298_v4  ;;  %v4362_v28 = vmul.f32 0.70710677, %v4328_v54  ;;  %2568 = vmatpush.msra.mxu3 %v2509_v1  ;;  %2594 = vmatpush.msra.mxu0 %v2522_v32  ;;  %v2536_v50 = vld [vmem:[%s3504_s1 + $0x138] sm:$0xff]  ;;  %v2506_v63 = vld [vmem:[%s3504_s1 + $0x48] sm:$0xff] }
 0xc5e   : > { %v4367_v36 = vmul.f32 %v2252_v53, %v4231_v2  ;;  %v2273_v37 = vand.u32 2147483647, %v4304_v35  ;;  %v2289_v43 = vmul.f32 %v2288_v22, %v4274_v42  ;;  %2637 = vmatpush.msrb.mxu2 %v2557_v11  ;;  %v2521_v2 = vld [vmem:[%s3504_s1 + $0xc0] sm:$0xff]  ;;  %v2275_v46 = vand.u32 2147483648, %v4304_v35  ;;  %2618 = vmatpush.msrb.mxu1 %v2537_v45  ;;  %v2554_v26 = vld [vmem:[%s3504_s1 + $0x1c8] sm:$0xff] }
 0xc5f   : > { %v4370_v38 = vadd.f32 1.0, %v2182_v25  ;;  %v2300_v44 = vmul.f32 %v2299_v13, %v4274_v42  ;;  %v2170_v17 = vadd.f32 0.18741608, %v2169_v20  ;;  %2569 = vmatpush.msra.mxu3 %v2508_v39  ;;  %2595 = vmatpush.msra.mxu0 %v2521_v2  ;;  %v2401_v60 = vmul.f32 %v4362_v28, %v4362_v28  ;;  %v2519_v20 = vld [vmem:[%s3504_s1 + $0xb0] sm:$0xff]  ;;  %v2505_v8 = vld [vmem:[%s3504_s1 + $0x40] sm:$0xff]  ;;  %v2534_v33 = vld [vmem:[%s3504_s1 + $0x128] sm:$0xff]  ;;  %v2142_v39 = vpop.f32.mrf.mxu2 }
 0xc60   : > { %v4338_v15 = vpop.eup %3133  ;;  %2638 = vmatpush.msrb.mxu2 %v2556_v6  ;;  %vm4400_vm11 = vcmp.eq.f32.partialorder %v2233_v3, 8.507059e+37  ;;  %vm2269_vm12 = vweird.f32 %v4304_v35  ;;  %v2363_v10 = vmul.f32 2.1237322e-06, %v4333_v5  ;;  %v2236_v22 = vor.u32 1.1754944e-38, %v2235_v29  ;;  %2619 = vmatpush.msrb.mxu1 %v2536_v50  ;;  %v2535_v3 = vld [vmem:[%s3504_s1 + $0x130] sm:$0xff]  ;;  %v2516_v50 = vld [vmem:[%s3504_s1 + $0x98] sm:$0xff] }
 0xc61   : > { %v4348_v24 = vpop.eup %3135  ;;  %v2225_v58 = vmul.f32 %v4338_v15, %v4300_v31  ;;  %vm2230_vm8 = vweird.f32 %v4338_v15  ;;  %3137 = vrcp.f32 %v4370_v38  ;;  %v2301_v53 = vadd.f32 0.4994258, %v2300_v44  ;;  %2570 = vmatpush.msra.mxu3 %v2507_v48  ;;  %2596 = vmatpush.msra.mxu0 %v2520_v49  ;;  %v2503_v49 = vld [vmem:[%s3504_s1 + $0x30] sm:$0xff] }
 0xc62   : > { %v2265_v9 = vmul.f32 %v4348_v24, %v4304_v35  ;;  %vm2270_vm9 = vweird.f32 %v4348_v24  ;;  %vm4396_vm10 = vmor %vm2229_vm7, %vm2230_vm8  ;;  %2639 = vmatpush.msrb.mxu2 %v2555_v57  ;;  %vm4424_vm14 = vcmp.eq.f32.partialorder %v2273_v37, 8.507059e+37  ;;  %v2276_v13 = vor.u32 1.1754944e-38, %v2275_v46  ;;  %2620 = vmatpush.msrb.mxu1 %v2535_v3  ;;  %v2552_v46 = vld [vmem:[%s3504_s1 + $0x1b8] sm:$0xff]  ;;  %v2551_v57 = vld [vmem:[%s3504_s1 + $0x1b0] sm:$0xff] }
 0xc63   : > { %v2226_v34 = vsub.f32 1.0, %v2225_v58  ;;  %v2290_v58 = vadd.f32 0.18741608, %v2289_v43  ;;  %v2302_v25 = vmul.f32 %v2301_v53, %v4274_v42  ;;  %vm4420_vm13 = vmor %vm2269_vm12, %vm2270_vm9  ;;  %v2171_v32 = vmul.f32 %v2170_v17, %v4266_v30  ;;  %2571 = vmatpush.msra.mxu3 %v2506_v63  ;;  %2597 = vmatpush.msra.mxu0 %v2519_v20  ;;  %v2553_v30 = vld [vmem:[%s3504_s1 + $0x1c0] sm:$0xff]  ;;  %v2515_v63 = vld [vmem:[%s3504_s1 + $0x90] sm:$0xff] }
 0xc64   : > { %v2266_v41 = vsub.f32 1.0, %v2265_v9  ;;  %v4438_v11 = vmin.f32 %v2401_v60, 16.0  ;;  %2640 = vmatpush.msrb.mxu2 %v2554_v26  ;;  %v2517_v43 = vld [vmem:[%s3504_s1 + $0xa0] sm:$0xff]  ;;  %v2364_v45 = vadd.f32 0.00028619796, %v2363_v10  ;;  %2621 = vmatpush.msrb.mxu1 %v2534_v33  ;;  %v2195_v60 = vand.u32 2147483648, %v4370_v38 }
 0xc65   : > { %v2227_v14 = vmul.f32 %v4338_v15, %v2226_v34  ;;  %v4436_v37 = vadd.f32 1.0, %v2302_v25  ;;  %v4449_v6 = vmul.f32 0.70710677, %v4346_v23  ;;  %2572 = vmatpush.msra.mxu3 %v2505_v8  ;;  %v2172_v53 = vadd.f32 1.1283791, %v2171_v32  ;;  %v2502_v10 = vld [vmem:[%s3504_s1 + $0x28] sm:$0xff] }
 0xc66   : > { %v2267_v51 = vmul.f32 %v4348_v24, %v2266_v41  ;;  %v2504_v41 = vld [vmem:[%s3504_s1 + $0x38] sm:$0xff]  ;;  %2641 = vmatpush.msrb.mxu2 %v2553_v30  ;;  %v2403_v61 = vmul.f32 2.1237322e-06, %v4438_v11  ;;  %v2193_v55 = vand.u32 2147483647, %v4370_v38  ;;  %v2550_v26 = vld [vmem:[%s3504_s1 + $0x1a8] sm:$0xff]  ;;  %vm2189_vm0 = vweird.f32 %v4370_v38 }
 0xc67   : > { %v2228_v62 = vadd.f32 %v4338_v15, %v2227_v14  ;;  %v4443_v44 = vpop.eup %3137  ;;  %v2533_v14 = vld [vmem:[%s3504_s1 + $0x120] sm:$0xff]  ;;  %3139 = vrcp.f32 %v4436_v37  ;;  %2573 = vmatpush.msra.mxu3 %v2504_v41  ;;  %v2173_v29 = vmul.f32 %v2172_v53, %v4255_v0  ;;  %v2514_v32 = vld [vmem:[%s3504_s1 + $0x88] sm:$0xff]  ;;  %v2315_v53 = vand.u32 2147483648, %v4436_v37 }
 0xc68   : > { %v2268_v31 = vadd.f32 %v4348_v24, %v2267_v51  ;;  %v2185_v48 = vmul.f32 %v4443_v44, %v4370_v38  ;;  %2622 = vmatpush.msrb.mxu1 %v2533_v14  ;;  %2642 = vmatpush.msrb.mxu2 %v2552_v46  ;;  %vm2190_vm15 = vweird.f32 %v4443_v44  ;;  %v2501_v8 = vld [vmem:[%s3504_s1 + $0x20] sm:$0xff]  ;;  %vm2194_vm2 = vcmp.eq.f32.partialorder %v2193_v55, 8.507059e+37 }
 0xc69   : > { %v2232_v1 = vsel %vm4396_vm10, %v4338_v15, %v2228_v62  ;;  %v2518_v15 = vld [vmem:[%s3504_s1 + $0xa8] sm:$0xff]  ;;  %2574 = vmatpush.msra.mxu3 %v2503_v49  ;;  %v2549_v0 = vld [vmem:[%s3504_s1 + $0x1a0] sm:$0xff]  ;;  %vm4499_vm1 = vmor %vm2189_vm0, %vm2190_vm15  ;;  %v2313_v49 = vand.u32 2147483647, %v4436_v37  ;;  %vm2309_vm4 = vweird.f32 %v4436_v37 }
 0xc6a   : > { %v2237_v35 = vsel %vm4400_vm11, %v2236_v22, %v2232_v1  ;;  %v2272_v34 = vsel %vm4420_vm13, %v4348_v24, %v2268_v31  ;;  %2598 = vmatpush.msra.mxu0 %v2518_v15  ;;  %v2186_v4 = vsub.f32 1.0, %v2185_v48  ;;  %v2321_v22 = vmul.f32 %v4449_v6, %v4449_v6  ;;  %v2531_v31 = vld [vmem:[%s3504_s1 + $0x110] sm:$0xff]  ;;  %2643 = vmatpush.msrb.mxu2 %v2551_v57  ;;  %v2530_v15 = vld [vmem:[%s3504_s1 + $0x108] sm:$0xff] }
 0xc6b   : > { %v2238_v2 = vmul.f32 %v2237_v35, %v4341_v59  ;;  %v2277_v24 = vsel %vm4424_vm14, %v2276_v13, %v2272_v34  ;;  %v2291_v59 = vmul.f32 %v2290_v58, %v4274_v42  ;;  %v2532_v42 = vld [vmem:[%s3504_s1 + $0x118] sm:$0xff]  ;;  %v4480_v1 = vmul.f32 0.5, %v4242_v56  ;;  %2575 = vmatpush.msra.mxu3 %v2502_v10 }
 0xc6c   : > { %v2278_v17 = vmul.f32 %v2277_v24, %v4367_v36  ;;  %v4463_v36 = vadd.f32 %v2142_v39, %v2048_v16  ;;  %2599 = vmatpush.msra.mxu0 %v2517_v43  ;;  %v2365_v16 = vmul.f32 %v2364_v45, %v4333_v5  ;;  %v2187_v25 = vmul.f32 %v4443_v44, %v2186_v4  ;;  %v2500_v39 = vld [vmem:[%s3504_s1 + $0x18] sm:$0xff]  ;;  %v2513_v24 = vld [vmem:[%s3504_s1 + $0x80] sm:$0xff]  ;;  %v2498_v4 = vld [vmem:[%s3504_s1 + $0x8] sm:$0xff] }
 0xc6d   : > { %v3006_v51 = vclamps-f32 %v2238_v2, 1.0  ;;  %v2292_v3 = vadd.f32 1.1283791, %v2291_v59  ;;  %2623 = vmatpush.msrb.mxu1 %v2532_v42  ;;  %v4483_v9 = vmin.f32 %v2321_v22, 16.0  ;;  %v4490_v33 = vpop.eup %3139  ;;  %v2196_v56 = vor.u32 1.1754944e-38, %v2195_v60  ;;  %2644 = vmatpush.msrb.mxu2 %v2550_v26  ;;  %v2529_v45 = vld [vmem:[%s3504_s1 + $0x100] sm:$0xff] }
 0xc6e   : > { %v3007_v62 = vclamps-f32 %v2278_v17, 1.0  ;;  %2600 = vmatpush.msra.mxu0 %v2516_v50  ;;  %v4486_v13 = vmul.f32 0.70710677, %v4463_v36  ;;  %v2188_v35 = vadd.f32 %v4443_v44, %v2187_v25  ;;  %v2404_v34 = vadd.f32 0.00028619796, %v2403_v61  ;;  %2576 = vmatpush.msra.mxu3 %v2501_v8  ;;  %v2548_v17 = vld [vmem:[%s3504_s1 + $0x198] sm:$0xff] }
 0xc6f   : > { %v2482_v20 = vadd.f32 1.0, %v3006_v51  ;;  %2624 = vmatpush.msrb.mxu1 %v2531_v31  ;;  %v2305_v43 = vmul.f32 %v4490_v33, %v4436_v37  ;;  %v2323_v2 = vmul.f32 2.1237322e-06, %v4483_v9  ;;  %v2366_v46 = vadd.f32 0.0036580483, %v2365_v16  ;;  %2645 = vmatpush.msrb.mxu2 %v2549_v0  ;;  %v2547_v60 = vld [vmem:[%s3504_s1 + $0x190] sm:$0xff] }
 0xc70   : > { %v2483_v58 = vadd.f32 1.0, %v3007_v62  ;;  %2601 = vmatpush.msra.mxu0 %v2515_v63  ;;  %v2441_v38 = vmul.f32 %v4486_v13, %v4486_v13  ;;  %v2192_v14 = vsel %vm4499_vm1, %v4443_v44, %v2188_v35  ;;  %2577 = vmatpush.msra.mxu3 %v2500_v39  ;;  %v2405_v44 = vmul.f32 %v2404_v34, %v4438_v11  ;;  %v2545_v37 = vld [vmem:[%s3504_s1 + $0x180] sm:$0xff] }
 0xc71   : > { %v2490_v30 = vmul.f32 %v2482_v20, %v4321_v12  ;;  %2625 = vmatpush.msrb.mxu1 %v2530_v15  ;;  %v2197_v48 = vsel %vm2194_vm2, %v2196_v56, %v2192_v14  ;;  %v2306_v59 = vsub.f32 1.0, %v2305_v43  ;;  %v2374_v42 = vmul.f32 3.8918573e-05, %v4333_v5  ;;  %2646 = vmatpush.msrb.mxu2 %v2548_v17  ;;  %v2546_v20 = vld [vmem:[%s3504_s1 + $0x188] sm:$0xff] }
 0xc72   : > { %v2491_v12 = vmul.f32 %v2483_v58, %v4324_v52  ;;  %2602 = vmatpush.msra.mxu0 %v2514_v32  ;;  %v4516_v50 = vmin.f32 %v2441_v38, 16.0  ;;  %v2499_v52 = vld [vmem:[%s3504_s1 + $0x10] sm:$0xff]  ;;  %v2198_v51 = vmul.f32 %v2197_v48, %v2173_v29  ;;  %vm2310_vm3 = vweird.f32 %v4490_v33  ;;  %v2497_v58 = vld [vmem:[%s3504_s1] sm:$0xff] }
 0xc73   : > { %2626 = vmatpush.msrb.mxu1 %v2529_v45  ;;  %v2307_v57 = vmul.f32 %v4490_v33, %v2306_v59  ;;  %v2324_v62 = vadd.f32 0.00028619796, %v2323_v2  ;;  %v2414_v61 = vmul.f32 3.8918573e-05, %v4438_v11  ;;  %v2293_v63 = vmul.f32 %v2292_v3, %v4260_v40  ;;  %2578 = vmatpush.msra.mxu3 %v2499_v52  ;;  %vm2311_vm6 = vmor %vm2309_vm4, %vm2310_vm3 }
 0xc74   : > { %2603 = vmatpush.msra.mxu0 %v2513_v24  ;;  %v3005_v10 = vclamps-f32 %v2198_v51, 1.0  ;;  %2627 = vmatmul.f32.vlgmr.msrb.gmra.mxu1 %v2491_v12  ;;  %v2375_v55 = vadd.f32 0.001143296, %v2374_v42  ;;  %vm4531_vm5 = vcmp.eq.f32.partialorder %v2313_v49, 8.507059e+37  ;;  %v2443_v31 = vmul.f32 2.1237322e-06, %v4516_v50 }
 0xc75   : > { %2604 = vmatmul.f32.vlgmr.msra.gmra.mxu0 %v2490_v30  ;;  %v2308_v16 = vadd.f32 %v4490_v33, %v2307_v57  ;;  %2647 = vmatpush.msrb.mxu2 %v2547_v60  ;;  %v2415_v25 = vadd.f32 0.001143296, %v2414_v61  ;;  %v2316_v40 = vor.u32 1.1754944e-38, %v2315_v53  ;;  %v2334_v8 = vmul.f32 3.8918573e-05, %v4483_v9 }
 0xc76   : > { %v2481_v26 = vadd.f32 1.0, %v3005_v10  ;;  %2579 = vmatpush.msra.mxu3 %v2498_v4  ;;  %v2376_v3 = vmul.f32 %v2375_v55, %v4333_v5  ;;  %v2406_v32 = vadd.f32 0.0036580483, %v2405_v44  ;;  %v2325_v15 = vmul.f32 %v2324_v62, %v4483_v9 }
 0xc77   : > { %v2312_v29 = vsel %vm2311_vm6, %v4490_v33, %v2308_v16  ;;  %2648 = vmatpush.msrb.mxu2 %v2546_v20  ;;  %v2416_v35 = vmul.f32 %v2415_v25, %v4438_v11  ;;  %v2367_v30 = vmul.f32 %v2366_v46, %v4333_v5  ;;  %v2444_v41 = vadd.f32 0.00028619796, %v2443_v31 }
 0xc78   : > { %v2489_v56 = vmul.f32 %v2481_v26, %v4480_v1  ;;  %v2317_v34 = vsel %vm4531_vm5, %v2316_v40, %v2312_v29  ;;  %2580 = vmatpush.msra.mxu3 %v2497_v58  ;;  %v2377_v0 = vadd.f32 0.014752088, %v2376_v3  ;;  %v2335_v2 = vadd.f32 0.001143296, %v2334_v8 }
 0xc79   : > { %v2318_v39 = vmul.f32 %v2317_v34, %v2293_v63  ;;  %2649 = vmatpush.msrb.mxu2 %v2545_v37  ;;  %v2417_v43 = vadd.f32 0.014752088, %v2416_v35  ;;  %v2454_v38 = vmul.f32 3.8918573e-05, %v4516_v50  ;;  %v2407_v1 = vmul.f32 %v2406_v32, %v4438_v11 }
 0xc7a   : > { %2581 = vmatmul.f32.vlgmr.msra.gmra.mxu3 %v2489_v56  ;;  %v2378_v33 = vmul.f32 %v2377_v0, %v4333_v5  ;;  %v2326_v45 = vadd.f32 0.0036580483, %v2325_v15  ;;  %v2336_v17 = vmul.f32 %v2335_v2, %v4483_v9  ;;  %v2148_v46 = vmul.f32 0.5, %v4248_v19 }
 0xc7b   : > { %v3008_v24 = vclamps-f32 %v2318_v39, 1.0  ;;  %v2418_v12 = vmul.f32 %v2417_v43, %v4438_v11  ;;  %v2455_v48 = vadd.f32 0.001143296, %v2454_v38  ;;  %v2368_v49 = vadd.f32 0.05243302, %v2367_v30 }
 0xc7c   : > { %v2379_v14 = vadd.f32 0.112945676, %v2378_v33  ;;  %v2445_v52 = vmul.f32 %v2444_v41, %v4516_v50  ;;  %v2337_v44 = vadd.f32 0.014752088, %v2336_v17  ;;  %v2408_v57 = vadd.f32 0.05243302, %v2407_v1 }
 0xc7d   : > { %v2484_v59 = vadd.f32 1.0, %v3008_v24  ;;  %v2419_v53 = vadd.f32 0.112945676, %v2418_v12  ;;  %v2456_v60 = vmul.f32 %v2455_v48, %v4516_v50  ;;  %v2327_v62 = vmul.f32 %v2326_v45, %v4483_v9 }
 0xc7e   : > { %v2380_v51 = vmul.f32 %v2379_v14, %v4333_v5  ;;  %v2338_v10 = vmul.f32 %v2337_v44, %v4483_v9  ;;  %v2369_v63 = vmul.f32 %v2368_v49, %v4333_v5  ;;  %v2446_v20 = vadd.f32 0.0036580483, %v2445_v52 }
 0xc7f   : > { %v2492_v42 = vmul.f32 %v2484_v59, %v2148_v46  ;;  %v2420_v61 = vmul.f32 %v2419_v53, %v4438_v11  ;;  %v2457_v19 = vadd.f32 0.014752088, %v2456_v60  ;;  %v2409_v58 = vmul.f32 %v2408_v57, %v4438_v11 }
 0xc80   : > { %v2381_v4 = vadd.f32 0.4994258, %v2380_v51  ;;  %v2339_v22 = vadd.f32 0.112945676, %v2338_v10  ;;  %v2328_v25 = vadd.f32 0.05243302, %v2327_v62  ;;  %v2447_v29 = vmul.f32 %v2446_v20, %v4516_v50 }
 0xc81   : > { %2650 = vmatmul.f32.vlgmr.msrb.gmra.mxu2 %v2492_v42  ;;  %v2421_v16 = vadd.f32 0.4994258, %v2420_v61  ;;  %v2458_v31 = vmul.f32 %v2457_v19, %v4516_v50  ;;  %v2370_v8 = vadd.f32 0.18741608, %v2369_v63  ;;  %v2410_v32 = vadd.f32 0.18741608, %v2409_v58 }
 0xc82   : > { %v2382_v55 = vmul.f32 %v2381_v4, %v4333_v5  ;;  %v2340_v37 = vmul.f32 %v2339_v22, %v4483_v9  ;;  %v2329_v34 = vmul.f32 %v2328_v25, %v4483_v9  ;;  %v2448_v39 = vadd.f32 0.05243302, %v2447_v29 }
 0xc83   : > { %v2422_v40 = vmul.f32 %v2421_v16, %v4438_v11  ;;  %v2459_v3 = vadd.f32 0.112945676, %v2458_v31  ;;  %v2371_v0 = vmul.f32 %v2370_v8, %v4333_v5  ;;  %v2411_v43 = vmul.f32 %v2410_v32, %v4438_v11 }
 0xc84   : > { %v2383_v26 = vadd.f32 1.0, %v2382_v55  ;;  %v2341_v35 = vadd.f32 0.4994258, %v2340_v37  ;;  %v2330_v2 = vadd.f32 0.18741608, %v2329_v34  ;;  %v2449_v12 = vmul.f32 %v2448_v39, %v4516_v50 }
 0xc85   : > { %v2423_v15 = vadd.f32 1.0, %v2422_v40  ;;  %v2460_v56 = vmul.f32 %v2459_v3, %v4516_v50  ;;  %v2372_v45 = vadd.f32 1.1283791, %v2371_v0  ;;  %v2412_v5 = vadd.f32 1.1283791, %v2411_v43 }
 0xc86   : > { %3141 = vrcp.f32 %v2383_v26  ;;  %v2342_v30 = vmul.f32 %v2341_v35, %v4483_v9  ;;  %v2150_v46 = vmul.f32 0.5, %v4278_v47  ;;  %v2331_v11 = vmul.f32 %v2330_v2, %v4483_v9 }
 0xc87   : > { %3143 = vrcp.f32 %v2423_v15  ;;  %v2461_v41 = vadd.f32 0.4994258, %v2460_v56  ;;  %v2395_v59 = vand.u32 2147483648, %v2383_v26  ;;  %v2393_v51 = vand.u32 2147483647, %v2383_v26 }
 0xc88   : > { %v4573_v38 = vadd.f32 1.0, %v2342_v30  ;;  %v2373_v53 = vmul.f32 %v2372_v45, %v4297_v27  ;;  %v2151_v44 = vmul.f32 0.5, %v4328_v54  ;;  %v2450_v60 = vadd.f32 0.18741608, %v2449_v12 }
 0xc89   : > { %v2462_v24 = vmul.f32 %v2461_v41, %v4516_v50  ;;  %v2413_v57 = vmul.f32 %v2412_v5, %v4362_v28  ;;  %vm2389_vm8 = vweird.f32 %v2383_v26  ;;  %v2435_v47 = vand.u32 2147483648, %v2423_v15 }
 0xc8a   : > { %3145 = vrcp.f32 %v4573_v38  ;;  %v2396_v9 = vor.u32 1.1754944e-38, %v2395_v59  ;;  %v2433_v10 = vand.u32 2147483647, %v2423_v15  ;;  %v2332_v19 = vadd.f32 1.1283791, %v2331_v11 }
 0xc8b   : > { %v4578_v48 = vadd.f32 1.0, %v2462_v24  ;;  %vm2394_vm11 = vcmp.eq.f32.partialorder %v2393_v51, 8.507059e+37  ;;  %v2451_v54 = vmul.f32 %v2450_v60, %v4516_v50  ;;  %vm2429_vm12 = vweird.f32 %v2423_v15 }
 0xc8c   : > { %v3142_v33 = vpop.eup %3141  ;;  %v2436_v22 = vor.u32 1.1754944e-38, %v2435_v47  ;;  %v2355_v58 = vand.u32 2147483648, %v4573_v38  ;;  %vm2434_vm14 = vcmp.eq.f32.partialorder %v2433_v10, 8.507059e+37  ;;  %vm2349_vm0 = vweird.f32 %v4573_v38 }
 0xc8d   : > { %v2385_v1 = vmul.f32 %v3142_v33, %v2383_v26  ;;  %v3144_v14 = vpop.eup %3143  ;;  %vm2390_vm7 = vweird.f32 %v3142_v33  ;;  %3147 = vrcp.f32 %v4578_v48  ;;  %v2353_v26 = vand.u32 2147483647, %v4573_v38 }
 0xc8e   : > { %v2425_v49 = vmul.f32 %v3144_v14, %v2423_v15  ;;  %vm2391_vm9 = vmor %vm2389_vm8, %vm2390_vm7  ;;  %vm2430_vm10 = vweird.f32 %v3144_v14  ;;  %v2452_v50 = vadd.f32 1.1283791, %v2451_v54  ;;  %v2356_v56 = vor.u32 1.1754944e-38, %v2355_v58 }
 0xc8f   : > { %v2386_v17 = vsub.f32 1.0, %v2385_v1  ;;  %vm2431_vm13 = vmor %vm2429_vm12, %vm2430_vm10  ;;  %v2475_v34 = vand.u32 2147483648, %v4578_v48  ;;  %v2473_v30 = vand.u32 2147483647, %v4578_v48  ;;  %v2333_v41 = vmul.f32 %v2332_v19, %v4449_v6 }
 0xc90   : > { %v2426_v42 = vsub.f32 1.0, %v2425_v49  ;;  %v3146_v4 = vpop.eup %3145  ;;  %vm2354_vm3 = vcmp.eq.f32.partialorder %v2353_v26, 8.507059e+37  ;;  %vm2469_vm4 = vweird.f32 %v4578_v48  ;;  %v2453_v12 = vmul.f32 %v2452_v50, %v4486_v13  ;;  %v3090_v13 = vld [vmem:[%s864_s20] ss:$0 sm:$0xff]  ;;  %s4770_s20 = sld [smem:[#allocation22_spill]] (!%p3013_p11) }
 0xc91   : > { %v2387_v52 = vmul.f32 %v3142_v33, %v2386_v17  ;;  %v2345_v27 = vmul.f32 %v3146_v4, %v4573_v38  ;;  %vm2350_vm15 = vweird.f32 %v3146_v4  ;;  %v2476_v45 = vor.u32 1.1754944e-38, %v2475_v34 }
 0xc92   : > { %v2427_v61 = vmul.f32 %v3144_v14, %v2426_v42  ;;  %vm2351_vm1 = vmor %vm2349_vm0, %vm2350_vm15  ;;  %vm2474_vm6 = vcmp.eq.f32.partialorder %v2473_v30, 8.507059e+37  ;;  %v2149_v11 = vmul.f32 0.5, %v4346_v23 }
 0xc93   : > { %v2388_v62 = vadd.f32 %v3142_v33, %v2387_v52  ;;  %v3148_v28 = vpop.eup %3147  ;;  %v2346_v31 = vsub.f32 1.0, %v2345_v27 }
 0xc94   : > { %v2428_v55 = vadd.f32 %v3144_v14, %v2427_v61  ;;  %v2465_v40 = vmul.f32 %v3148_v28, %v4578_v48  ;;  %vm2470_vm2 = vweird.f32 %v3148_v28  ;;  %v2152_v48 = vmul.f32 0.5, %v4463_v36 }
 0xc95   : > { %v2392_v63 = vsel %vm2391_vm9, %v3142_v33, %v2388_v62  ;;  %v2347_v8 = vmul.f32 %v3146_v4, %v2346_v31  ;;  %vm2471_vm5 = vmor %vm2469_vm4, %vm2470_vm2 }
 0xc96   : > { %v2397_v20 = vsel %vm2394_vm11, %v2396_v9, %v2392_v63  ;;  %v2432_v25 = vsel %vm2431_vm13, %v3144_v14, %v2428_v55  ;;  %v2466_v32 = vsub.f32 1.0, %v2465_v40 }
 0xc97   : > { %v2398_v16 = vmul.f32 %v2397_v20, %v2373_v53  ;;  %v2437_v3 = vsel %vm2434_vm14, %v2436_v22, %v2432_v25  ;;  %v2348_v35 = vadd.f32 %v3146_v4, %v2347_v8 }
 0xc98   : > { %v2438_v29 = vmul.f32 %v2437_v3, %v2413_v57  ;;  %v2467_v39 = vmul.f32 %v3148_v28, %v2466_v32 }
 0xc99   : > { %v3010_v37 = vclamps-f32 %v2398_v16, 1.0  ;;  %v2352_v33 = vsel %vm2351_vm1, %v3146_v4, %v2348_v35 }
 0xc9a   : > { %v3011_v0 = vclamps-f32 %v2438_v29, 1.0  ;;  %v2357_v24 = vsel %vm2354_vm3, %v2356_v56, %v2352_v33  ;;  %v2468_v38 = vadd.f32 %v3148_v28, %v2467_v39 }
 0xc9b   : > { %v2486_v15 = vadd.f32 1.0, %v3010_v37  ;;  %v2358_v1 = vmul.f32 %v2357_v24, %v2333_v41 }
 0xc9c   : > { %v2487_v2 = vadd.f32 1.0, %v3011_v0  ;;  %v2472_v5 = vsel %vm2471_vm5, %v3148_v28, %v2468_v38 }
 0xc9d   : > { %v2494_v43 = vmul.f32 %v2486_v15, %v2150_v46  ;;  %v3009_v17 = vclamps-f32 %v2358_v1, 1.0  ;;  %v2477_v6 = vsel %vm2474_vm6, %v2476_v45, %v2472_v5 }
 0xc9e   : > { %v2495_v14 = vmul.f32 %v2487_v2, %v2151_v44  ;;  %v2478_v46 = vmul.f32 %v2477_v6, %v2453_v12 }
 0xc9f   : > { %2607 = vmatmul.f32.gmra.mxu0 %v2494_v43  ;;  %v2485_v59 = vadd.f32 1.0, %v3009_v17 }
 0xca0   : > { %2630 = vmatmul.f32.gmra.mxu1 %v2495_v14  ;;  %v3012_v49 = vclamps-f32 %v2478_v46, 1.0 }
 0xca1   : > { %v2493_v52 = vmul.f32 %v2485_v59, %v2149_v11 }
 0xca2   : > { %v2488_v51 = vadd.f32 1.0, %v3012_v49 }
 0xca3   : > { %2584 = vmatmul.f32.gmra.mxu3 %v2493_v52 }
 0xca4   : > { %v2496_v53 = vmul.f32 %v2488_v51, %v2152_v48 }
 0xca6   : > { %2653 = vmatmul.f32.gmra.mxu2 %v2496_v53 }
 0xcf1   : > { %v2628_v62 = vpop.f32.mrf.mxu1 }
 0xcf2   : > { %v2605_v42 = vpop.f32.mrf.mxu0 }
 0xcfd   : > { %v2582_v44 = vpop.f32.mrf.mxu3 }
 0xcfe   : > { %v2583_v60 = vadd.f32 %v3090_v13, %v2582_v44 }
 0xd00   : > { %v2606_v57 = vadd.f32 %v2605_v42, %v2583_v60 }
 0xd02   : > { %v2629_v23 = vadd.f32 %v2628_v62, %v2606_v57 }
 0xd04   : > { %v2651_v47 = vpop.f32.mrf.mxu2 }
 0xd05   : > { %v2652_v4 = vadd.f32 %v2651_v47, %v2629_v23 }
 0xd07   : > { %v2657_v9 = vadd.f32 %v2652_v4, %v4116_v18 }
 0xd09   : > { %2659 = vst [vmem:[#allocation2] sm:$0xff] %v2657_v9 }
 0xd1c   : > { %v2608_v10 = vpop.f32.mrf.mxu0 }
 0xd1d   : > { %v2631_v63 = vpop.f32.mrf.mxu1 }
 0xd26   : > { %v2585_v36 = vpop.f32.mrf.mxu3 }
 0xd27   : > { %v2586_v61 = vadd.f32 %v3090_v13, %v2585_v36 }
 0xd29   : > { %v2609_v19 = vadd.f32 %v2608_v10, %v2586_v61  ;;  %v2654_v54 = vpop.f32.mrf.mxu2 }
 0xd2b   : > { %v2632_v27 = vadd.f32 %v2631_v63, %v2609_v19 }
 0xd2d   : > { %v2655_v20 = vadd.f32 %v2654_v54, %v2632_v27  ;;  %2664 = sbr.rel (%p3013_p11) target bundleno = 3775 (0xebf), region = 120 }
 0xd2f   : > { %v2658_v55 = vadd.f32 %v2655_v20, %v4120_v21 }
 0xd31   : > { %2660 = vst [vmem:[#allocation2 + $0x8] sm:$0x3] %v2658_v55 }
 0xd32   : > { %2667 = vadd.xlane.f32.xlu0 %v2657_v9  ;;  %v2710_v18 = vld [vmem:[%s4768_s22 + $0x78] sm:$0xff]  ;;  %v2709_v21 = vld [vmem:[%s4768_s22 + $0x70] sm:$0xff]  ;;  %v2708_v58 = vld [vmem:[%s4768_s22 + $0x68] sm:$0xff] }
 0xd33   : > { %2712 = vmatpush.msra.mxu0 %v2710_v18  ;;  %2753 = vmatpush.msra.mxu1 %v2710_v18  ;;  %v2707_v25 = vld [vmem:[%s4768_s22 + $0x60] sm:$0xff]  ;;  %v2706_v26 = vld [vmem:[%s4768_s22 + $0x58] sm:$0xff]  ;;  %v2705_v40 = vld [vmem:[%s4768_s22 + $0x50] sm:$0xff] }
 0xd34   : > { %v2704_v37 = vld [vmem:[%s4768_s22 + $0x48] sm:$0xff]  ;;  %v2703_v3 = vld [vmem:[%s4768_s22 + $0x40] sm:$0xff]  ;;  %v2702_v8 = vld [vmem:[%s4768_s22 + $0x38] sm:$0xff] }
 0xd35   : > { %2713 = vmatpush.msra.mxu0 %v2709_v21  ;;  %2754 = vmatpush.msra.mxu1 %v2709_v21  ;;  %v2701_v50 = vld [vmem:[%s4768_s22 + $0x30] sm:$0xff]  ;;  %v2700_v29 = vld [vmem:[%s4768_s22 + $0x28] sm:$0xff]  ;;  %v2699_v32 = vld [vmem:[%s4768_s22 + $0x20] sm:$0xff] }
 0xd36   : > { %v2698_v15 = vld [vmem:[%s4768_s22 + $0x18] sm:$0xff]  ;;  %v2697_v35 = vld [vmem:[%s4768_s22 + $0x10] sm:$0xff]  ;;  %v2696_v56 = vld [vmem:[%s4768_s22 + $0x8] sm:$0xff] }
 0xd37   : > { %2714 = vmatpush.msra.mxu0 %v2708_v58  ;;  %2755 = vmatpush.msra.mxu1 %v2708_v58  ;;  %v2695_v34 = vld [vmem:[%s4768_s22] sm:$0xff] }
 0xd38   : > { %v3149_v1 = vld [vmem:[%s4769_s4] ss:$0 sm:$0xff] }
 0xd39   : > { %2715 = vmatpush.msra.mxu0 %v2707_v25  ;;  %2756 = vmatpush.msra.mxu1 %v2707_v25  ;;  %v2711_v6 = vld [vmem:[%s4771_s11] sm:$0x1] }
 0xd3a   : > { %v2749_v11 = vld [vmem:[%s4771_s11] sm:$0x1] }
 0xd3b   : > { %2716 = vmatpush.msra.mxu0 %v2706_v26  ;;  %2757 = vmatpush.msra.mxu1 %v2706_v26 }
 0xd3d   : > { %2717 = vmatpush.msra.mxu0 %v2705_v40  ;;  %2758 = vmatpush.msra.mxu1 %v2705_v40 }
 0xd3f   : > { %2718 = vmatpush.msra.mxu0 %v2704_v37  ;;  %2759 = vmatpush.msra.mxu1 %v2704_v37 }
 0xd41   : > { %2719 = vmatpush.msra.mxu0 %v2703_v3  ;;  %2760 = vmatpush.msra.mxu1 %v2703_v3 }
 0xd43   : > { %2720 = vmatpush.msra.mxu0 %v2702_v8  ;;  %2761 = vmatpush.msra.mxu1 %v2702_v8 }
 0xd45   : > { %2721 = vmatpush.msra.mxu0 %v2701_v50  ;;  %2762 = vmatpush.msra.mxu1 %v2701_v50 }
 0xd47   : > { %2722 = vmatpush.msra.mxu0 %v2700_v29  ;;  %2763 = vmatpush.msra.mxu1 %v2700_v29 }
 0xd49   : > { %2723 = vmatpush.msra.mxu0 %v2699_v32  ;;  %2764 = vmatpush.msra.mxu1 %v2699_v32 }
 0xd4b   : > { %2724 = vmatpush.msra.mxu0 %v2698_v15  ;;  %2765 = vmatpush.msra.mxu1 %v2698_v15 }
 0xd4d   : > { %2725 = vmatpush.msra.mxu0 %v2697_v35  ;;  %2766 = vmatpush.msra.mxu1 %v2697_v35 }
 0xd4f   : > { %2726 = vmatpush.msra.mxu0 %v2696_v56  ;;  %2767 = vmatpush.msra.mxu1 %v2696_v56 }
 0xd51   : > { %2727 = vmatpush.msra.mxu0 %v2695_v34  ;;  %2768 = vmatpush.msra.mxu1 %v2695_v34 }
 0xda5   : > { %v2668_v28 = vpop.xlane.xlu0 %2667 }
 0xda6   : > { %v2669_v16 = vmul.f32 %v2668_v28, %v3887_v7 }
 0xda8   : > { %v4611_v22 = vsub.f32 %v2657_v9, %v2669_v16 }
 0xdaa   : > { %v2671_v31 = vmul.f32 %v4611_v22, %v4611_v22 }
 0xdac   : > { %2672 = vadd.xlane.f32.xlu0 %v2671_v31 }
 0xe1f   : > { %v2673_v0 = vpop.xlane.xlu0 %2672 }
 0xe20   : > { %v2674_v39 = vmul.f32 %v2673_v0, %v3887_v7  ;;  %v3150_v7 = vld [vmem:[%s4770_s20] ss:$0 sm:$0xff] }
 0xe22   : > { %v2675_v30 = vadd.f32 1e-12, %v2674_v39 }
 0xe24   : > { %3151 = vrsqrt.f32 %v2675_v30  ;;  %vm2682_vm8 = vweird.f32 %v2675_v30 }
 0xe2a   : > { %v3152_v41 = vpop.eup %3151 }
 0xe2b   : > { %v2677_v43 = vmul.f32 %v3152_v41, %v2675_v30  ;;  %vm2683_vm7 = vweird.f32 %v3152_v41 }
 0xe2c   : > { %vm2684_vm9 = vmor %vm2682_vm8, %vm2683_vm7 }
 0xe2d   : > { %v2678_v33 = vmul.f32 %v3152_v41, %v2677_v43 }
 0xe2f   : > { %v2679_v2 = vmul.f32 0.5, %v2678_v33 }
 0xe31   : > { %v2680_v24 = vsub.f32 1.5, %v2679_v2 }
 0xe33   : > { %v2681_v38 = vmul.f32 %v3152_v41, %v2680_v24 }
 0xe35   : > { %v2685_v45 = vsel %vm2684_vm9, %v3152_v41, %v2681_v38 }
 0xe36   : > { %v2686_v12 = vmul.f32 %v2685_v45, %v4611_v22 }
 0xe38   : > { %v2690_v14 = vmul.f32 %v3149_v1, %v2686_v12 }
 0xe3a   : > { %v2694_v5 = vadd.f32 %v3150_v7, %v2690_v14 }
 0xe3c   : > { %2728 = vmatmul.f32.vlgmr.msra.gmra.mxu0 %v2694_v5  ;;  %v2751_v17 = vrot.slane %v2694_v5, 5 }
 0xe3e   : > { %2769 = vmatmul.f32.vlgmr.msra.gmra.mxu1 %v2751_v17 }
 0xeb9   : > { %v2729_v46 = vpop.f32.mrf.mxu0 }
 0xeba   : > { %v2730_v59 = vadd.f32 %v2729_v46, %v2711_v6 }
 0xebb   : > { %v2770_v49 = vpop.f32.mrf.mxu1 }
 0xebc   : > { %2732 = vst [vmem:[#allocation9] sm:$0x1] %v2730_v59  ;;  %v2771_v52 = vadd.f32 %v2770_v49, %v2749_v11 }
 0xebe   : > { %2773 = vst [vmem:[#allocation9 + $0x1] sm:$0x1] %v2771_v52 }
 0xebf PF: > { %p3041_p2 = scmp.eq.s32.totalorder %s3423_s3, 1  ;;  %s3293_s27 = smov [#allocation9]  }
 0xec0   : > { %s2780_s24 = sshll.u32 %s3293_s27, 4  ;;  %s4772_s0 = sld [smem:[#allocation29_spill]]  ;;  %s2781_s24 = int_to_ptr.vmem [resolvable:$true] %s2780_s24 }
 0xec6   : > { %s2782_s29 = sshll.u32 %s4772_s0, 4  ;;  %s2783_s29 = int_to_ptr.hbm [resolvable:$true] %s2782_s29 }
 0xec7   : > { %3030 = dma.vmem_to_hbm [thread:$0]  (%p3041_p2), %s2781_s24, 32, %s2783_s29, [#allocation6]  }
 0xec8   : > { %3266 = dma.done.wait (%p3041_p2), [#allocation6], 32  }
 0xec9   : > { %3268 = vsyncadd (%p3041_p2), [#allocation6], 4294967264 }
 0xeca PF: > { %s4773_s27 = sld [smem:[#allocation14_spill]]  ;;  %s4776_s2 = smov %s3275_s25 }
 0xecb   : > { %s4774_s23 = sld [smem:[#allocation13_spill]] }
 0xecc   : > { %s4775_s26 = sld [smem:[#allocation15_spill]] }
 0xed0   : > { %p35_p3 = scmp.ge.s32.totalorder %s4773_s27, 4  }
 0xed1   : > { %s4777_s25 = smov %s4774_s23 }
 0xed2   :  { %37 = sbr.rel (!%p35_p3) target bundleno = 21 (0x15), region = 192 }
 0xed7   :  { %2796 = vsyncpa [#allocation5], 1 }
 0xed8   :  { %2798 = vsyncpa [#allocation5 + $0x1], 1 }
 0xed9   :  { %2799 = vsyncpa [#allocation8], 1 }
 0xeda   :  { %2801 = vsyncpa [#allocation8 + $0x1], 1 }
 0xedb   :  { %2802 = vsyncpa [#allocation6], 1 }
 0xedc   :  { %2804 = vsyncpa [#allocation6 + $0x1], 1 }

</bundles_post_ra>
